<compile_context>
chip_gen: v5e
topology: v5e:2x2
jax: 0.10.0
libtpu: 0.0.40
codegen_flags: <defaults>
</compile_context>

<pallas_src>
import functools

import jax
import jax.numpy as jnp
import numpy as np
from jax.experimental import pallas as pl
from jax.experimental.pallas import tpu as pltpu

BN_EPS = 0.8          # BatchNorm1d(out_len, 0.8) -> second positional arg is eps
LRELU_SLOPE = 0.2
VMEM_LIMIT = 32 * 1024 * 1024   # explicit scoped-VMEM limit (safe on v5e/v6e/v7x)


def _leaky_relu(x):
    return jnp.where(x > 0, x, LRELU_SLOPE * x)


# --------------------------------------------------------------------------
# Kernel 1: layers 1-4 (full batch in one block so BatchNorm stats are exact)
# --------------------------------------------------------------------------
def _hidden_kernel(z_ref,
                   w1_ref, b1_ref,
                   w2_ref, b2_ref, g2_ref, be2_ref,
                   w3_ref, b3_ref, g3_ref, be3_ref,
                   w4_ref, b4_ref, g4_ref, be4_ref,
                   h_ref):
    # Native bf16 x bf16 -> f32 MXU dots: cast the activation, never the weight.
    x = z_ref[...].astype(jnp.bfloat16)

    # block(seq, 128, normalize=False): Linear + LeakyReLU
    h = jnp.dot(x, w1_ref[...], preferred_element_type=jnp.float32) + b1_ref[...]
    h = _leaky_relu(h)

    def bn_block(h, w_ref, b_ref, g_ref, beta_ref):
        y = jnp.dot(h.astype(jnp.bfloat16), w_ref[...],
                    preferred_element_type=jnp.float32) + b_ref[...]
        # training-mode BatchNorm1d: batch mean / biased batch variance (f32)
        mean = jnp.mean(y, axis=0, keepdims=True)
        var = jnp.mean((y - mean) * (y - mean), axis=0, keepdims=True)
        # fold affine into a single scale/shift FMA
        scale = g_ref[...] * jax.lax.rsqrt(var + BN_EPS)
        shift = beta_ref[...] - mean * scale
        return _leaky_relu(y * scale + shift)

    h = bn_block(h, w2_ref, b2_ref, g2_ref, be2_ref)   # 128 -> 256
    h = bn_block(h, w3_ref, b3_ref, g3_ref, be3_ref)   # 256 -> 512
    h = bn_block(h, w4_ref, b4_ref, g4_ref, be4_ref)   # 512 -> 1024

    # Store bf16: feeds the output kernel's bf16 dot directly (no per-step cast).
    h_ref[...] = h.astype(jnp.bfloat16)


# --------------------------------------------------------------------------
# Kernel 2: final Linear + Tanh, gridded over the (128-padded) N dimension
# --------------------------------------------------------------------------
def _output_kernel(h_ref, w5_ref, b5_ref, o_ref):
    # h_ref / w5_ref are bf16 -> native MXU path, f32 accumulate.
    o = jnp.dot(h_ref[...], w5_ref[...],
                preferred_element_type=jnp.float32) + b5_ref[...]
    o_ref[...] = jnp.tanh(o)


def _pad128(n):
    return ((n + 127) // 128) * 128


def _pick_tn(n_pad):
    """Final-layer N tile size.

    - Small outputs (<=1024 padded lanes): one block, no per-step overhead.
    - Large outputs: largest of 2048/1024/512/256/128 dividing n_pad, preferring
      an EVEN grid count so v7x's two TensorCores split the w5 stream evenly.
    """
    if n_pad <= 1024:
        return n_pad
    candidates = (2048, 1024, 512, 256, 128)
    for tn in candidates:
        if n_pad % tn == 0 and (n_pad // tn) % 2 == 0:
            return tn
    for tn in candidates:
        if n_pad % tn == 0:
            return tn
    return 128


def init_generator_params(key, seq_length, img_shape):
    """Deterministic parameter init mirroring PyTorch defaults (U(-1/sqrt(in), 1/sqrt(in))).

    Weights are stored in bf16 (HBM-traffic optimization + native MXU operand);
    biases / BN affine in f32.  w5/b5 are zero-padded along N to a multiple of
    128 lanes (tanh(0)=0 on the pad, sliced off in the wrapper).
    """
    out_dim = int(np.prod(img_shape))
    out_pad = _pad128(out_dim)
    dims = [(seq_length, 128), (128, 256), (256, 512), (512, 1024), (1024, out_dim)]
    params = {}
    for i, (fin, fout) in enumerate(dims, start=1):
        key, kw, kb = jax.random.split(key, 3)
        bound = 1.0 / np.sqrt(fin)
        w = jax.random.uniform(kw, (fin, fout), jnp.float32, -bound, bound)
        b = jax.random.uniform(kb, (1, fout), jnp.float32, -bound, bound)
        if i == 5 and out_pad != out_dim:
            w = jnp.pad(w, ((0, 0), (0, out_pad - out_dim)))
            b = jnp.pad(b, ((0, 0), (0, out_pad - out_dim)))
        params[f"w{i}"] = w.astype(jnp.bfloat16)
        params[f"b{i}"] = b
    # BatchNorm affine params for layers 2..4 (PyTorch default: gamma=1, beta=0)
    for i, (_, fout) in zip((2, 3, 4), dims[1:4]):
        params[f"g{i}"] = jnp.ones((1, fout), jnp.float32)
        params[f"be{i}"] = jnp.zeros((1, fout), jnp.float32)
    return params


@functools.partial(jax.jit, static_argnames=("img_shape",))
def generator_forward(z, params, img_shape):
    B = z.shape[0]
    out_dim = int(np.prod(img_shape))
    n_pad = params["w5"].shape[1]            # multiple of 128

    vmem = pl.BlockSpec(memory_space=pltpu.MemorySpace.VMEM)
    hidden_args = (
        z,
        params["w1"], params["b1"],
        params["w2"], params["b2"], params["g2"], params["be2"],
        params["w3"], params["b3"], params["g3"], params["be3"],
        params["w4"], params["b4"], params["g4"], params["be4"],
    )
    # ---- layers 1-4: single block (full batch => exact BN statistics) ----
    # NOTE: no grid splits over M/K here on purpose; B=8 makes every layer
    # memory-bound, so extra grid axes would only add per-step overhead.
    h = pl.pallas_call(
        _hidden_kernel,
        out_shape=jax.ShapeDtypeStruct((B, 1024), jnp.bfloat16),
        in_specs=[vmem] * len(hidden_args),
        out_specs=vmem,
        compiler_params=pltpu.CompilerParams(vmem_limit_bytes=VMEM_LIMIT),
    )(*hidden_args)

    # ---- final layer: grid over N (lane-dense, double-buffered w5 DMA) ----
    tn = _pick_tn(n_pad)
    grid_n = n_pad // tn
    flat = pl.pallas_call(
        _output_kernel,
        out_shape=jax.ShapeDtypeStruct((B, n_pad), jnp.float32),
        grid_spec=pltpu.PrefetchScalarGridSpec(
            num_scalar_prefetch=0,
            grid=(grid_n,),
            in_specs=[
                pl.BlockSpec((B, 1024), lambda j: (0, 0)),   # resident h (bf16)
                pl.BlockSpec((1024, tn), lambda j: (0, j)),  # streamed w5 (bf16)
                pl.BlockSpec((1, tn), lambda j: (0, j)),
            ],
            out_specs=pl.BlockSpec((B, tn), lambda j: (0, j)),
        ),
        compiler_params=pltpu.CompilerParams(
            dimension_semantics=("parallel",),   # v7x: shard N over both TCs
            vmem_limit_bytes=VMEM_LIMIT,
        ),
    )(h, params["w5"], params["b5"])

    # drop the N padding, then view(img.size(0), *img_shape) -> NCHW
    return flat[:, :out_dim].reshape(B, *img_shape)


def _reference_forward(z, params, img_shape):
    """Pure-JAX reference using the identical bf16 contraction path."""
    def dot_bf16(a, w):
        return jnp.dot(a.astype(jnp.bfloat16), w, preferred_element_type=jnp.float32)

    h = _leaky_relu(dot_bf16(z, params["w1"]) + params["b1"])
    for i in (2, 3, 4):
        y = dot_bf16(h, params[f"w{i}"]) + params[f"b{i}"]
        mean = jnp.mean(y, axis=0, keepdims=True)
        var = jnp.mean((y - mean) ** 2, axis=0, keepdims=True)
        yn = (y - mean) * jax.lax.rsqrt(var + BN_EPS)
        h = _leaky_relu(yn * params[f"g{i}"] + params[f"be{i}"])
    o = jnp.tanh(dot_bf16(h, params["w5"]) + params["b5"])
    out_dim = int(np.prod(img_shape))
    return o[:, :out_dim].reshape(z.shape[0], *img_shape)


if __name__ == "__main__":
    # Small shapes: batch=8, seq_length=32, img_shape=(3, 8, 8)
    seq_length = 32
    img_shape = (3, 8, 8)
    batch = 8            # multiple of 8 -> clean f32 sublane tiling

    key = jax.random.PRNGKey(0)
    k_params, k_z = jax.random.split(key)
    params = init_generator_params(k_params, seq_length, img_shape)
    z = jax.random.normal(k_z, (batch, seq_length), jnp.float32)

    img = generator_forward(z, params, img_shape)
    img = jax.block_until_ready(img)

    ref = _reference_forward(z, params, img_shape)
    assert img.shape == (batch,) + img_shape, img.shape
    # bf16 MXU contraction on both sides -> compare at bf16-level tolerance
    np.testing.assert_allclose(np.asarray(img), np.asarray(ref), rtol=1e-2, atol=1e-2)

    print("KERNEL_OK")
</pallas_src>

<mosaic_0001>
module attributes {stable_mosaic.version = 11 : i64} {
  func.func @_output_kernel(%arg0: i32, %arg1: memref<8x1024xbf16, #tpu.memory_space<vmem>>, %arg2: memref<1024x256xbf16, #tpu.memory_space<vmem>>, %arg3: memref<1x256xf32, #tpu.memory_space<vmem>>, %arg4: memref<8x256xf32, #tpu.memory_space<vmem>>) attributes {dimension_semantics = [#tpu.dimension_semantics<parallel>], iteration_bounds = array<i64: 1>, scalar_prefetch = 0 : i64, scratch_operands = 0 : i64, tpu.core_type = #tpu.core_type<tc>, window_params = [{pipeline_mode = #tpu.pipeline_mode<synchronous>, transform_indices = @transform_0, window_bounds = array<i64: 8, 1024>}, {transform_indices = @transform_1, window_bounds = array<i64: 1024, 256>}, {transform_indices = @transform_2, window_bounds = array<i64: 1, 256>}, {transform_indices = @transform_3, window_bounds = array<i64: 8, 256>}]} {
    %c0 = arith.constant 0 : index
    %c0_0 = arith.constant 0 : index
    %0 = vector.load %arg1[%c0, %c0_0] : memref<8x1024xbf16, #tpu.memory_space<vmem>>, vector<8x1024xbf16>
    %c0_1 = arith.constant 0 : index
    %c0_2 = arith.constant 0 : index
    %1 = vector.load %arg2[%c0_1, %c0_2] : memref<1024x256xbf16, #tpu.memory_space<vmem>>, vector<1024x256xbf16>
    %cst = arith.constant dense<0.000000e+00> : vector<8x256xf32>
    %2 = tpu.matmul %0, %1, %cst {dimension_numbers = #tpu.dot_dimension_numbers<[1], [0], [0], [1], [0, 0, 1, 1], [], []>} : vector<8x1024xbf16>, vector<1024x256xbf16>, vector<8x256xf32> -> vector<8x256xf32>
    %c0_3 = arith.constant 0 : index
    %c0_4 = arith.constant 0 : index
    %3 = vector.load %arg3[%c0_3, %c0_4] : memref<1x256xf32, #tpu.memory_space<vmem>>, vector<1x256xf32>
    %4 = vector.broadcast %3 : vector<1x256xf32> to vector<8x256xf32>
    %5 = arith.addf %2, %4 : vector<8x256xf32>
    %6 = math.tanh %5 : vector<8x256xf32>
    %c0_5 = arith.constant 0 : index
    %c0_6 = arith.constant 0 : index
    %7 = vector.load %arg4[%c0_5, %c0_6] : memref<8x256xf32, #tpu.memory_space<vmem>>, vector<8x256xf32>
    tpu.vector_store %arg4[%c0_5, %c0_6], %6 {strides = array<i32>} : memref<8x256xf32, #tpu.memory_space<vmem>>, vector<8x256xf32>,
    return
  }
  func.func @transform_0(%arg0: i32) -> (i32, i32) {
    %c0_i32 = arith.constant 0 : i32
    %c0_i32_0 = arith.constant 0 : i32
    %c0_i32_1 = arith.constant 0 : i32
    return %c0_i32, %c0_i32_0 : i32, i32
  }
  func.func @transform_1(%arg0: i32) -> (i32, i32) {
    %c0_i32 = arith.constant 0 : i32
    %c0_i32_0 = arith.constant 0 : i32
    return %c0_i32, %arg0 : i32, i32
  }
  func.func @transform_2(%arg0: i32) -> (i32, i32) {
    %c0_i32 = arith.constant 0 : i32
    %c0_i32_0 = arith.constant 0 : i32
    return %c0_i32, %arg0 : i32, i32
  }
  func.func @transform_3(%arg0: i32) -> (i32, i32) {
    %c0_i32 = arith.constant 0 : i32
    %c0_i32_0 = arith.constant 0 : i32
    return %c0_i32, %arg0 : i32, i32
  }
}

module attributes {stable_mosaic.version = 11 : i64} {
  func.func @_hidden_kernel(%arg0: memref<8x32xf32, #tpu.memory_space<vmem>>, %arg1: memref<32x128xbf16, #tpu.memory_space<vmem>>, %arg2: memref<1x128xf32, #tpu.memory_space<vmem>>, %arg3: memref<128x256xbf16, #tpu.memory_space<vmem>>, %arg4: memref<1x256xf32, #tpu.memory_space<vmem>>, %arg5: memref<1x256xf32, #tpu.memory_space<vmem>>, %arg6: memref<1x256xf32, #tpu.memory_space<vmem>>, %arg7: memref<256x512xbf16, #tpu.memory_space<vmem>>, %arg8: memref<1x512xf32, #tpu.memory_space<vmem>>, %arg9: memref<1x512xf32, #tpu.memory_space<vmem>>, %arg10: memref<1x512xf32, #tpu.memory_space<vmem>>, %arg11: memref<512x1024xbf16, #tpu.memory_space<vmem>>, %arg12: memref<1x1024xf32, #tpu.memory_space<vmem>>, %arg13: memref<1x1024xf32, #tpu.memory_space<vmem>>, %arg14: memref<1x1024xf32, #tpu.memory_space<vmem>>, %arg15: memref<8x1024xbf16, #tpu.memory_space<vmem>>) attributes {dimension_semantics = [], scalar_prefetch = 0 : i64, scratch_operands = 0 : i64, tpu.core_type = #tpu.core_type<tc>} {
    %c0 = arith.constant 0 : index
    %c0_0 = arith.constant 0 : index
    %0 = vector.load %arg0[%c0, %c0_0] : memref<8x32xf32, #tpu.memory_space<vmem>>, vector<8x32xf32>
    %1 = arith.truncf %0 : vector<8x32xf32> to vector<8x32xbf16>
    %c0_1 = arith.constant 0 : index
    %c0_2 = arith.constant 0 : index
    %2 = vector.load %arg1[%c0_1, %c0_2] : memref<32x128xbf16, #tpu.memory_space<vmem>>, vector<32x128xbf16>
    %cst = arith.constant dense<0.000000e+00> : vector<8x128xf32>
    %3 = tpu.matmul %1, %2, %cst {dimension_numbers = #tpu.dot_dimension_numbers<[1], [0], [0], [1], [0, 0, 1, 1], [], []>} : vector<8x32xbf16>, vector<32x128xbf16>, vector<8x128xf32> -> vector<8x128xf32>
    %c0_3 = arith.constant 0 : index
    %c0_4 = arith.constant 0 : index
    %4 = vector.load %arg2[%c0_3, %c0_4] : memref<1x128xf32, #tpu.memory_space<vmem>>, vector<1x128xf32>
    %5 = vector.broadcast %4 : vector<1x128xf32> to vector<8x128xf32>
    %6 = arith.addf %3, %5 : vector<8x128xf32>
    %cst_5 = arith.constant 0.000000e+00 : f32
    %7 = vector.broadcast %cst_5 : f32 to vector<8x128xf32>
    %8 = arith.cmpf ogt, %6, %7 : vector<8x128xf32>
    %cst_6 = arith.constant 2.000000e-01 : f32
    %9 = vector.broadcast %cst_6 : f32 to vector<8x128xf32>
    %10 = arith.mulf %9, %6 : vector<8x128xf32>
    %11 = arith.select %8, %6, %10 : vector<8x128xi1>, vector<8x128xf32>
    %12 = arith.truncf %11 : vector<8x128xf32> to vector<8x128xbf16>
    %c0_7 = arith.constant 0 : index
    %c0_8 = arith.constant 0 : index
    %13 = vector.load %arg3[%c0_7, %c0_8] : memref<128x256xbf16, #tpu.memory_space<vmem>>, vector<128x256xbf16>
    %cst_9 = arith.constant dense<0.000000e+00> : vector<8x256xf32>
    %14 = tpu.matmul %12, %13, %cst_9 {dimension_numbers = #tpu.dot_dimension_numbers<[1], [0], [0], [1], [0, 0, 1, 1], [], []>} : vector<8x128xbf16>, vector<128x256xbf16>, vector<8x256xf32> -> vector<8x256xf32>
    %c0_10 = arith.constant 0 : index
    %c0_11 = arith.constant 0 : index
    %15 = vector.load %arg4[%c0_10, %c0_11] : memref<1x256xf32, #tpu.memory_space<vmem>>, vector<1x256xf32>
    %16 = vector.broadcast %15 : vector<1x256xf32> to vector<8x256xf32>
    %17 = arith.addf %14, %16 : vector<8x256xf32>
    %cst_12 = arith.constant dense<0.000000e+00> : vector<256xf32>
    %18 = vector.multi_reduction <add>, %17, %cst_12 [0] : vector<8x256xf32> to vector<256xf32>
    %19 = vector.shape_cast %18 : vector<256xf32> to vector<1x256xf32>
    %cst_13 = arith.constant 8.000000e+00 : f32
    %20 = vector.broadcast %cst_13 : f32 to vector<1x256xf32>
    %21 = arith.divf %19, %20 : vector<1x256xf32>
    %22 = vector.broadcast %21 : vector<1x256xf32> to vector<8x256xf32>
    %23 = arith.subf %17, %22 : vector<8x256xf32>
    %24 = vector.broadcast %21 : vector<1x256xf32> to vector<8x256xf32>
    %25 = arith.subf %17, %24 : vector<8x256xf32>
    %26 = arith.mulf %23, %25 : vector<8x256xf32>
    %cst_14 = arith.constant dense<0.000000e+00> : vector<256xf32>
    %27 = vector.multi_reduction <add>, %26, %cst_14 [0] : vector<8x256xf32> to vector<256xf32>
    %28 = vector.shape_cast %27 : vector<256xf32> to vector<1x256xf32>
    %cst_15 = arith.constant 8.000000e+00 : f32
    %29 = vector.broadcast %cst_15 : f32 to vector<1x256xf32>
    %30 = arith.divf %28, %29 : vector<1x256xf32>
    %c0_16 = arith.constant 0 : index
    %c0_17 = arith.constant 0 : index
    %31 = vector.load %arg5[%c0_16, %c0_17] : memref<1x256xf32, #tpu.memory_space<vmem>>, vector<1x256xf32>
    %cst_18 = arith.constant 8.000000e-01 : f32
    %32 = vector.broadcast %cst_18 : f32 to vector<1x256xf32>
    %33 = arith.addf %30, %32 : vector<1x256xf32>
    %34 = math.rsqrt %33 : vector<1x256xf32>
    %35 = arith.mulf %31, %34 : vector<1x256xf32>
    %c0_19 = arith.constant 0 : index
    %c0_20 = arith.constant 0 : index
    %36 = vector.load %arg6[%c0_19, %c0_20] : memref<1x256xf32, #tpu.memory_space<vmem>>, vector<1x256xf32>
    %37 = arith.mulf %21, %35 : vector<1x256xf32>
    %38 = arith.subf %36, %37 : vector<1x256xf32>
    %39 = vector.broadcast %35 : vector<1x256xf32> to vector<8x256xf32>
    %40 = arith.mulf %17, %39 : vector<8x256xf32>
    %41 = vector.broadcast %38 : vector<1x256xf32> to vector<8x256xf32>
    %42 = arith.addf %40, %41 : vector<8x256xf32>
    %cst_21 = arith.constant 0.000000e+00 : f32
    %43 = vector.broadcast %cst_21 : f32 to vector<8x256xf32>
    %44 = arith.cmpf ogt, %42, %43 : vector<8x256xf32>
    %cst_22 = arith.constant 2.000000e-01 : f32
    %45 = vector.broadcast %cst_22 : f32 to vector<8x256xf32>
    %46 = arith.mulf %45, %42 : vector<8x256xf32>
    %47 = arith.select %44, %42, %46 : vector<8x256xi1>, vector<8x256xf32>
    %48 = arith.truncf %47 : vector<8x256xf32> to vector<8x256xbf16>
    %c0_23 = arith.constant 0 : index
    %c0_24 = arith.constant 0 : index
    %49 = vector.load %arg7[%c0_23, %c0_24] : memref<256x512xbf16, #tpu.memory_space<vmem>>, vector<256x512xbf16>
    %cst_25 = arith.constant dense<0.000000e+00> : vector<8x512xf32>
    %50 = tpu.matmul %48, %49, %cst_25 {dimension_numbers = #tpu.dot_dimension_numbers<[1], [0], [0], [1], [0, 0, 1, 1], [], []>} : vector<8x256xbf16>, vector<256x512xbf16>, vector<8x512xf32> -> vector<8x512xf32>
    %c0_26 = arith.constant 0 : index
    %c0_27 = arith.constant 0 : index
    %51 = vector.load %arg8[%c0_26, %c0_27] : memref<1x512xf32, #tpu.memory_space<vmem>>, vector<1x512xf32>
    %52 = vector.broadcast %51 : vector<1x512xf32> to vector<8x512xf32>
    %53 = arith.addf %50, %52 : vector<8x512xf32>
    %cst_28 = arith.constant dense<0.000000e+00> : vector<512xf32>
    %54 = vector.multi_reduction <add>, %53, %cst_28 [0] : vector<8x512xf32> to vector<512xf32>
    %55 = vector.shape_cast %54 : vector<512xf32> to vector<1x512xf32>
    %cst_29 = arith.constant 8.000000e+00 : f32
    %56 = vector.broadcast %cst_29 : f32 to vector<1x512xf32>
    %57 = arith.divf %55, %56 : vector<1x512xf32>
    %58 = vector.broadcast %57 : vector<1x512xf32> to vector<8x512xf32>
    %59 = arith.subf %53, %58 : vector<8x512xf32>
    %60 = vector.broadcast %57 : vector<1x512xf32> to vector<8x512xf32>
    %61 = arith.subf %53, %60 : vector<8x512xf32>
    %62 = arith.mulf %59, %61 : vector<8x512xf32>
    %cst_30 = arith.constant dense<0.000000e+00> : vector<512xf32>
    %63 = vector.multi_reduction <add>, %62, %cst_30 [0] : vector<8x512xf32> to vector<512xf32>
    %64 = vector.shape_cast %63 : vector<512xf32> to vector<1x512xf32>
    %cst_31 = arith.constant 8.000000e+00 : f32
    %65 = vector.broadcast %cst_31 : f32 to vector<1x512xf32>
    %66 = arith.divf %64, %65 : vector<1x512xf32>
    %c0_32 = arith.constant 0 : index
    %c0_33 = arith.constant 0 : index
    %67 = vector.load %arg9[%c0_32, %c0_33] : memref<1x512xf32, #tpu.memory_space<vmem>>, vector<1x512xf32>
    %cst_34 = arith.constant 8.000000e-01 : f32
    %68 = vector.broadcast %cst_34 : f32 to vector<1x512xf32>
    %69 = arith.addf %66, %68 : vector<1x512xf32>
    %70 = math.rsqrt %69 : vector<1x512xf32>
    %71 = arith.mulf %67, %70 : vector<1x512xf32>
    %c0_35 = arith.constant 0 : index
    %c0_36 = arith.constant 0 : index
    %72 = vector.load %arg10[%c0_35, %c0_36] : memref<1x512xf32, #tpu.memory_space<vmem>>, vector<1x512xf32>
    %73 = arith.mulf %57, %71 : vector<1x512xf32>
    %74 = arith.subf %72, %73 : vector<1x512xf32>
    %75 = vector.broadcast %71 : vector<1x512xf32> to vector<8x512xf32>
    %76 = arith.mulf %53, %75 : vector<8x512xf32>
    %77 = vector.broadcast %74 : vector<1x512xf32> to vector<8x512xf32>
    %78 = arith.addf %76, %77 : vector<8x512xf32>
    %cst_37 = arith.constant 0.000000e+00 : f32
    %79 = vector.broadcast %cst_37 : f32 to vector<8x512xf32>
    %80 = arith.cmpf ogt, %78, %79 : vector<8x512xf32>
    %cst_38 = arith.constant 2.000000e-01 : f32
    %81 = vector.broadcast %cst_38 : f32 to vector<8x512xf32>
    %82 = arith.mulf %81, %78 : vector<8x512xf32>
    %83 = arith.select %80, %78, %82 : vector<8x512xi1>, vector<8x512xf32>
    %84 = arith.truncf %83 : vector<8x512xf32> to vector<8x512xbf16>
    %c0_39 = arith.constant 0 : index
    %c0_40 = arith.constant 0 : index
    %85 = vector.load %arg11[%c0_39, %c0_40] : memref<512x1024xbf16, #tpu.memory_space<vmem>>, vector<512x1024xbf16>
    %cst_41 = arith.constant dense<0.000000e+00> : vector<8x1024xf32>
    %86 = tpu.matmul %84, %85, %cst_41 {dimension_numbers = #tpu.dot_dimension_numbers<[1], [0], [0], [1], [0, 0, 1, 1], [], []>} : vector<8x512xbf16>, vector<512x1024xbf16>, vector<8x1024xf32> -> vector<8x1024xf32>
    %c0_42 = arith.constant 0 : index
    %c0_43 = arith.constant 0 : index
    %87 = vector.load %arg12[%c0_42, %c0_43] : memref<1x1024xf32, #tpu.memory_space<vmem>>, vector<1x1024xf32>
    %88 = vector.broadcast %87 : vector<1x1024xf32> to vector<8x1024xf32>
    %89 = arith.addf %86, %88 : vector<8x1024xf32>
    %cst_44 = arith.constant dense<0.000000e+00> : vector<1024xf32>
    %90 = vector.multi_reduction <add>, %89, %cst_44 [0] : vector<8x1024xf32> to vector<1024xf32>
    %91 = vector.shape_cast %90 : vector<1024xf32> to vector<1x1024xf32>
    %cst_45 = arith.constant 8.000000e+00 : f32
    %92 = vector.broadcast %cst_45 : f32 to vector<1x1024xf32>
    %93 = arith.divf %91, %92 : vector<1x1024xf32>
    %94 = vector.broadcast %93 : vector<1x1024xf32> to vector<8x1024xf32>
    %95 = arith.subf %89, %94 : vector<8x1024xf32>
    %96 = vector.broadcast %93 : vector<1x1024xf32> to vector<8x1024xf32>
    %97 = arith.subf %89, %96 : vector<8x1024xf32>
    %98 = arith.mulf %95, %97 : vector<8x1024xf32>
    %cst_46 = arith.constant dense<0.000000e+00> : vector<1024xf32>
    %99 = vector.multi_reduction <add>, %98, %cst_46 [0] : vector<8x1024xf32> to vector<1024xf32>
    %100 = vector.shape_cast %99 : vector<1024xf32> to vector<1x1024xf32>
    %cst_47 = arith.constant 8.000000e+00 : f32
    %101 = vector.broadcast %cst_47 : f32 to vector<1x1024xf32>
    %102 = arith.divf %100, %101 : vector<1x1024xf32>
    %c0_48 = arith.constant 0 : index
    %c0_49 = arith.constant 0 : index
    %103 = vector.load %arg13[%c0_48, %c0_49] : memref<1x1024xf32, #tpu.memory_space<vmem>>, vector<1x1024xf32>
    %cst_50 = arith.constant 8.000000e-01 : f32
    %104 = vector.broadcast %cst_50 : f32 to vector<1x1024xf32>
    %105 = arith.addf %102, %104 : vector<1x1024xf32>
    %106 = math.rsqrt %105 : vector<1x1024xf32>
    %107 = arith.mulf %103, %106 : vector<1x1024xf32>
    %c0_51 = arith.constant 0 : index
    %c0_52 = arith.constant 0 : index
    %108 = vector.load %arg14[%c0_51, %c0_52] : memref<1x1024xf32, #tpu.memory_space<vmem>>, vector<1x1024xf32>
    %109 = arith.mulf %93, %107 : vector<1x1024xf32>
    %110 = arith.subf %108, %109 : vector<1x1024xf32>
    %111 = vector.broadcast %107 : vector<1x1024xf32> to vector<8x1024xf32>
    %112 = arith.mulf %89, %111 : vector<8x1024xf32>
    %113 = vector.broadcast %110 : vector<1x1024xf32> to vector<8x1024xf32>
    %114 = arith.addf %112, %113 : vector<8x1024xf32>
    %cst_53 = arith.constant 0.000000e+00 : f32
    %115 = vector.broadcast %cst_53 : f32 to vector<8x1024xf32>
    %116 = arith.cmpf ogt, %114, %115 : vector<8x1024xf32>
    %cst_54 = arith.constant 2.000000e-01 : f32
    %117 = vector.broadcast %cst_54 : f32 to vector<8x1024xf32>
    %118 = arith.mulf %117, %114 : vector<8x1024xf32>
    %119 = arith.select %116, %114, %118 : vector<8x1024xi1>, vector<8x1024xf32>
    %120 = arith.truncf %119 : vector<8x1024xf32> to vector<8x1024xbf16>
    %c0_55 = arith.constant 0 : index
    %c0_56 = arith.constant 0 : index
    %121 = vector.load %arg15[%c0_55, %c0_56] : memref<8x1024xbf16, #tpu.memory_space<vmem>>, vector<8x1024xbf16>
    tpu.vector_store %arg15[%c0_55, %c0_56], %120 {strides = array<i32>} : memref<8x1024xbf16, #tpu.memory_space<vmem>>, vector<8x1024xbf16>,
    return
  }
}

</mosaic_0001>

<bundles_post_ra>
// kernel: generator_forward.3
= control target key start
LH: loop header
LB: loop body
LE: loop exit
PB: predicated region body
PF: predicated region fallthrough
CT: control target
= control target key end

     0   :  { %8 = vsyncpa [#allocation3], 0  ;;  %s1848_s0 = inlined_call_operand.vmem [shape: bf16[8,1024], index: 0, kind: input, shape index: {}]   ;;  %s1849_s1 = inlined_call_operand.hbm [shape: bf16[1024,256], index: 1, kind: input, shape index: {}]   ;;  %s1850_s2 = inlined_call_operand.hbm [shape: f32[1,256], index: 2, kind: input, shape index: {}]   ;;  %s1851_s3 = inlined_call_operand.vmem [shape: f32[8,256], index: 3, kind: output, shape index: {}]  }
   0x1   :  { %s16_s14 = sshll.u32 %s1849_s1, 4  ;;  %s17_s14 = int_to_ptr.hbm [resolvable:$true] %s16_s14 }
   0x2   :  { %9 = vsyncpa [#allocation5], 0  ;;  %s1768_s15 = smov [#allocation2]   ;;  %s30_s19 = sshll.u32 %s1850_s2, 4  ;;  %s31_s19 = int_to_ptr.hbm [resolvable:$true] %s30_s19 }
   0x3   :  { %s18_s16 = sshll.u32 %s1768_s15, 4  ;;  %s1769_s20 = smov 128   ;;  %s19_s16 = int_to_ptr.vmem [resolvable:$true] %s18_s16 }
   0x4   :  { %s1770_s21 = smov 8   ;;  %s1771_s22 = smov [#allocation4]  }
   0x5   :  { %24 = dma.hbm_to_vmem [thread:$0]  %s17_s14, 16384, %s19_s16, [#allocation3], %s1769_s20, %s1769_s20, %s1770_s21  }
   0x6   :  { %s32_s23 = sshll.u32 %s1771_s22, 4  ;;  %s33_s23 = int_to_ptr.vmem [resolvable:$true] %s32_s23 }
   0x7   :  { %35 = dma.hbm_to_vmem [thread:$0]  %s31_s19, 32, %s33_s23, [#allocation5]  }
   0x8   :  { %1764 = dma.done.wait [#allocation3], 16384  }
   0x9   :  { %1765 = vsyncadd [#allocation3], 4294950912 }
   0xa   :  { %1766 = dma.done.wait [#allocation5], 32  }
   0xb   :  { %1767 = vsyncadd [#allocation5], 4294967264  ;;  %v1126_v0 = vld [vmem:[#allocation2 + $0x70] sm:$0xf]  ;;  %v1595_v1 = vld [vmem:[#allocation2 + $0x74] sm:$0xf0] }
   0xc   :  { %v1190_v2 = vld [vmem:[#allocation2 + $0xf0] sm:$0xf]  ;;  %v1127_v3 = vor.u32 %v1595_v1, %v1126_v0  ;;  %v1611_v4 = vld [vmem:[#allocation2 + $0xf4] sm:$0xf0]  ;;  %v1118_v11 = vld [vmem:[#allocation2 + $0x60] sm:$0xf] }
   0xd   :  { %v1254_v5 = vld [vmem:[#allocation2 + $0x170] sm:$0xf]  ;;  %v1627_v6 = vld [vmem:[#allocation2 + $0x174] sm:$0xf0]  ;;  %v1191_v7 = vor.u32 %v1611_v4, %v1190_v2  ;;  %v1593_v13 = vld [vmem:[#allocation2 + $0x64] sm:$0xf0] }
   0xe   :  { %v1255_v8 = vor.u32 %v1627_v6, %v1254_v5  ;;  %v1318_v9 = vld [vmem:[#allocation2 + $0x1f0] sm:$0xf]  ;;  %v1643_v10 = vld [vmem:[#allocation2 + $0x1f4] sm:$0xf0]  ;;  %850 = vmatpush.bf16.msra.mxu0 %v1127_v3  ;;  %v1182_v14 = vld [vmem:[#allocation2 + $0xe0] sm:$0xf]  ;;  %v1119_v16 = vor.u32 %v1593_v13, %v1118_v11 }
   0xf   :  { %v1319_v12 = vor.u32 %v1643_v10, %v1318_v9  ;;  %v1609_v15 = vld [vmem:[#allocation2 + $0xe4] sm:$0xf0]  ;;  %863 = vmatpush.bf16.msra.mxu1 %v1191_v7  ;;  %v1246_v18 = vld [vmem:[#allocation2 + $0x160] sm:$0xf]  ;;  %v1110_v23 = vld [vmem:[#allocation2 + $0x50] sm:$0xf] }
  0x10   :  { %876 = vmatpush.bf16.msra.mxu2 %v1255_v8  ;;  %v1183_v17 = vor.u32 %v1609_v15, %v1182_v14  ;;  %v1625_v19 = vld [vmem:[#allocation2 + $0x164] sm:$0xf0]  ;;  %v1310_v20 = vld [vmem:[#allocation2 + $0x1e0] sm:$0xf]  ;;  %v1591_v24 = vld [vmem:[#allocation2 + $0x54] sm:$0xf0] }
  0x11   :  { %889 = vmatpush.bf16.msra.mxu3 %v1319_v12  ;;  %v1247_v21 = vor.u32 %v1625_v19, %v1246_v18  ;;  %v1641_v22 = vld [vmem:[#allocation2 + $0x1e4] sm:$0xf0]  ;;  %v1174_v26 = vld [vmem:[#allocation2 + $0xd0] sm:$0xf]  ;;  %v1607_v27 = vld [vmem:[#allocation2 + $0xd4] sm:$0xf0]  ;;  %v1111_v29 = vor.u32 %v1591_v24, %v1110_v23 }
  0x12   :  { %v1311_v25 = vor.u32 %v1641_v22, %v1310_v20  ;;  %v1238_v28 = vld [vmem:[#allocation2 + $0x150] sm:$0xf]  ;;  %851 = vmatpush.bf16.msra.mxu0 %v1119_v16  ;;  %v1623_v30 = vld [vmem:[#allocation2 + $0x154] sm:$0xf0]  ;;  %v1175_v33 = vor.u32 %v1607_v27, %v1174_v26  ;;  %v1102_v35 = vld [vmem:[#allocation2 + $0x40] sm:$0xf] }
  0x13   :  { %v1302_v31 = vld [vmem:[#allocation2 + $0x1d0] sm:$0xf]  ;;  %v1639_v32 = vld [vmem:[#allocation2 + $0x1d4] sm:$0xf0]  ;;  %864 = vmatpush.bf16.msra.mxu1 %v1183_v17  ;;  %v1239_v34 = vor.u32 %v1623_v30, %v1238_v28  ;;  %v1589_v36 = vld [vmem:[#allocation2 + $0x44] sm:$0xf0] }
  0x14   :  { %877 = vmatpush.bf16.msra.mxu2 %v1247_v21  ;;  %v1166_v37 = vld [vmem:[#allocation2 + $0xc0] sm:$0xf]  ;;  %v1303_v38 = vor.u32 %v1639_v32, %v1302_v31  ;;  %v1605_v39 = vld [vmem:[#allocation2 + $0xc4] sm:$0xf0]  ;;  %v1103_v44 = vor.u32 %v1589_v36, %v1102_v35  ;;  %v1094_v47 = vld [vmem:[#allocation2 + $0x30] sm:$0xf] }
  0x15   :  { %890 = vmatpush.bf16.msra.mxu3 %v1311_v25  ;;  %v1230_v40 = vld [vmem:[#allocation2 + $0x140] sm:$0xf]  ;;  %v1621_v41 = vld [vmem:[#allocation2 + $0x144] sm:$0xf0]  ;;  %v1167_v45 = vor.u32 %v1605_v39, %v1166_v37  ;;  %v1587_v48 = vld [vmem:[#allocation2 + $0x34] sm:$0xf0] }
  0x16   :  { %v1294_v42 = vld [vmem:[#allocation2 + $0x1c0] sm:$0xf]  ;;  %v1637_v43 = vld [vmem:[#allocation2 + $0x1c4] sm:$0xf0]  ;;  %852 = vmatpush.bf16.msra.mxu0 %v1111_v29  ;;  %v1231_v46 = vor.u32 %v1621_v41, %v1230_v40  ;;  %v1158_v49 = vld [vmem:[#allocation2 + $0xb0] sm:$0xf]  ;;  %v1095_v56 = vor.u32 %v1587_v48, %v1094_v47 }
  0x17   :  { %865 = vmatpush.bf16.msra.mxu1 %v1175_v33  ;;  %v1295_v50 = vor.u32 %v1637_v43, %v1294_v42  ;;  %v1603_v51 = vld [vmem:[#allocation2 + $0xb4] sm:$0xf0]  ;;  %v1222_v52 = vld [vmem:[#allocation2 + $0x130] sm:$0xf]  ;;  %v1086_v59 = vld [vmem:[#allocation2 + $0x20] sm:$0xf] }
  0x18   :  { %878 = vmatpush.bf16.msra.mxu2 %v1239_v34  ;;  %v1619_v53 = vld [vmem:[#allocation2 + $0x134] sm:$0xf0]  ;;  %v1286_v54 = vld [vmem:[#allocation2 + $0x1b0] sm:$0xf]  ;;  %v1159_v57 = vor.u32 %v1603_v51, %v1158_v49  ;;  %v1585_v60 = vld [vmem:[#allocation2 + $0x24] sm:$0xf0] }
  0x19   :  { %891 = vmatpush.bf16.msra.mxu3 %v1303_v38  ;;  %v1635_v55 = vld [vmem:[#allocation2 + $0x1b4] sm:$0xf0]  ;;  %v1223_v58 = vor.u32 %v1619_v53, %v1222_v52  ;;  %v1150_v61 = vld [vmem:[#allocation2 + $0xa0] sm:$0xf]  ;;  %v1601_v63 = vld [vmem:[#allocation2 + $0xa4] sm:$0xf0]  ;;  %v1087_v4 = vor.u32 %v1585_v60, %v1086_v59 }
  0x1a   :  { %853 = vmatpush.bf16.msra.mxu0 %v1103_v44  ;;  %v1287_v62 = vor.u32 %v1635_v55, %v1286_v54  ;;  %v1214_v0 = vld [vmem:[#allocation2 + $0x120] sm:$0xf]  ;;  %v1617_v1 = vld [vmem:[#allocation2 + $0x124] sm:$0xf0]  ;;  %v1151_v5 = vor.u32 %v1601_v63, %v1150_v61  ;;  %v1078_v7 = vld [vmem:[#allocation2 + $0x10] sm:$0xf] }
  0x1b   :  { %866 = vmatpush.bf16.msra.mxu1 %v1167_v45  ;;  %v1278_v2 = vld [vmem:[#allocation2 + $0x1a0] sm:$0xf]  ;;  %v1633_v3 = vld [vmem:[#allocation2 + $0x1a4] sm:$0xf0]  ;;  %v1215_v6 = vor.u32 %v1617_v1, %v1214_v0  ;;  %v1583_v8 = vld [vmem:[#allocation2 + $0x14] sm:$0xf0] }
  0x1c   :  { %879 = vmatpush.bf16.msra.mxu2 %v1231_v46  ;;  %v1142_v9 = vld [vmem:[#allocation2 + $0x90] sm:$0xf]  ;;  %v1279_v10 = vor.u32 %v1633_v3, %v1278_v2  ;;  %v1599_v11 = vld [vmem:[#allocation2 + $0x94] sm:$0xf0]  ;;  %v1079_v16 = vor.u32 %v1583_v8, %v1078_v7  ;;  %v1070_v17 = vld [vmem:[#allocation2] sm:$0xf] }
  0x1d   :  { %892 = vmatpush.bf16.msra.mxu3 %v1295_v50  ;;  %v1206_v12 = vld [vmem:[#allocation2 + $0x110] sm:$0xf]  ;;  %v1615_v13 = vld [vmem:[#allocation2 + $0x114] sm:$0xf0]  ;;  %v1581_v18 = vld [vmem:[#allocation2 + $0x4] sm:$0xf0]  ;;  %v1143_v19 = vor.u32 %v1599_v11, %v1142_v9 }
  0x1e   :  { %854 = vmatpush.bf16.msra.mxu0 %v1095_v56  ;;  %v1270_v14 = vld [vmem:[#allocation2 + $0x190] sm:$0xf]  ;;  %v1631_v15 = vld [vmem:[#allocation2 + $0x194] sm:$0xf0]  ;;  %v1207_v20 = vor.u32 %v1615_v13, %v1206_v12  ;;  %v1134_v21 = vld [vmem:[#allocation2 + $0x80] sm:$0xf]  ;;  %v1071_v31 = vor.u32 %v1581_v18, %v1070_v17 }
  0x1f   :  { %867 = vmatpush.bf16.msra.mxu1 %v1159_v57  ;;  %v1597_v22 = vld [vmem:[#allocation2 + $0x84] sm:$0xf0]  ;;  %v1198_v23 = vld [vmem:[#allocation2 + $0x100] sm:$0xf]  ;;  %v1271_v24 = vor.u32 %v1631_v15, %v1270_v14  ;;  %v1382_v28 = vld [vmem:[#allocation2 + $0x270] sm:$0xf] }
  0x20   :  { %880 = vmatpush.bf16.msra.mxu2 %v1223_v58  ;;  %v1613_v25 = vld [vmem:[#allocation2 + $0x104] sm:$0xf0]  ;;  %v1262_v26 = vld [vmem:[#allocation2 + $0x180] sm:$0xf]  ;;  %v1659_v29 = vld [vmem:[#allocation2 + $0x274] sm:$0xf0]  ;;  %v1135_v35 = vor.u32 %v1597_v22, %v1134_v21 }
  0x21   :  { %893 = vmatpush.bf16.msra.mxu3 %v1287_v62  ;;  %v1629_v27 = vld [vmem:[#allocation2 + $0x184] sm:$0xf0]  ;;  %v1446_v30 = vld [vmem:[#allocation2 + $0x2f0] sm:$0xf]  ;;  %v1675_v32 = vld [vmem:[#allocation2 + $0x2f4] sm:$0xf0]  ;;  %v1199_v36 = vor.u32 %v1613_v25, %v1198_v23  ;;  %v1383_v40 = vor.u32 %v1659_v29, %v1382_v28 }
  0x22   :  { %855 = vmatpush.bf16.msra.mxu0 %v1087_v4  ;;  %v1510_v33 = vld [vmem:[#allocation2 + $0x370] sm:$0xf]  ;;  %v1691_v34 = vld [vmem:[#allocation2 + $0x374] sm:$0xf0]  ;;  %v1263_v39 = vor.u32 %v1629_v27, %v1262_v26  ;;  %v1447_v41 = vor.u32 %v1675_v32, %v1446_v30  ;;  %v1374_v43 = vld [vmem:[#allocation2 + $0x260] sm:$0xf] }
  0x23   :  { %868 = vmatpush.bf16.msra.mxu1 %v1151_v5  ;;  %v1574_v37 = vld [vmem:[#allocation2 + $0x3f0] sm:$0xf]  ;;  %v1707_v38 = vld [vmem:[#allocation2 + $0x3f4] sm:$0xf0]  ;;  %v1511_v42 = vor.u32 %v1691_v34, %v1510_v33  ;;  %v1657_v44 = vld [vmem:[#allocation2 + $0x264] sm:$0xf0] }
  0x24   :  { %881 = vmatpush.bf16.msra.mxu2 %v1215_v6  ;;  %v1438_v45 = vld [vmem:[#allocation2 + $0x2e0] sm:$0xf]  ;;  %v1575_v46 = vor.u32 %v1707_v38, %v1574_v37  ;;  %v1673_v47 = vld [vmem:[#allocation2 + $0x2e4] sm:$0xf0]  ;;  %v1375_v52 = vor.u32 %v1657_v44, %v1374_v43  ;;  %v1366_v53 = vld [vmem:[#allocation2 + $0x250] sm:$0xf] }
  0x25   :  { %894 = vmatpush.bf16.msra.mxu3 %v1279_v10  ;;  %v1502_v48 = vld [vmem:[#allocation2 + $0x360] sm:$0xf]  ;;  %v1689_v49 = vld [vmem:[#allocation2 + $0x364] sm:$0xf0]  ;;  %v1439_v54 = vor.u32 %v1673_v47, %v1438_v45  ;;  %v1655_v56 = vld [vmem:[#allocation2 + $0x254] sm:$0xf0] }
  0x26   :  { %856 = vmatpush.bf16.msra.mxu0 %v1079_v16  ;;  %v1566_v50 = vld [vmem:[#allocation2 + $0x3e0] sm:$0xf]  ;;  %v1705_v51 = vld [vmem:[#allocation2 + $0x3e4] sm:$0xf0]  ;;  %v1503_v55 = vor.u32 %v1689_v49, %v1502_v48  ;;  %v1430_v57 = vld [vmem:[#allocation2 + $0x2d0] sm:$0xf]  ;;  %v1367_v0 = vor.u32 %v1655_v56, %v1366_v53 }
  0x27   :  { %869 = vmatpush.bf16.msra.mxu1 %v1143_v19  ;;  %v1671_v58 = vld [vmem:[#allocation2 + $0x2d4] sm:$0xf0]  ;;  %v1567_v59 = vor.u32 %v1705_v51, %v1566_v50  ;;  %v1494_v60 = vld [vmem:[#allocation2 + $0x350] sm:$0xf]  ;;  %v45_v2 = vld [vmem:[%s1848_s0 + $0x8] sm:$0xff] }
  0x28   :  { %882 = vmatpush.bf16.msra.mxu2 %v1207_v20  ;;  %v1687_v61 = vld [vmem:[#allocation2 + $0x354] sm:$0xf0]  ;;  %v1558_v62 = vld [vmem:[#allocation2 + $0x3d0] sm:$0xf]  ;;  %v1431_v1 = vor.u32 %v1671_v58, %v1430_v57  ;;  %v44_v3 = vld [vmem:[%s1848_s0] sm:$0xff]  ;;  %v188_v8 = vunpack.c.l.b16 %v45_v2  ;;  %v189_v10 = vunpack.c.h.b16 %v45_v2 }
  0x29   :  { %895 = vmatpush.bf16.msra.mxu3 %v1271_v24  ;;  %v1703_v63 = vld [vmem:[#allocation2 + $0x3d4] sm:$0xf0]  ;;  %v1495_v4 = vor.u32 %v1687_v61, %v1494_v60  ;;  %v1358_v5 = vld [vmem:[#allocation2 + $0x240] sm:$0xf]  ;;  %v1653_v6 = vld [vmem:[#allocation2 + $0x244] sm:$0xf0]  ;;  %v186_v9 = vunpack.c.l.b16 %v44_v3  ;;  %v187_v15 = vunpack.c.h.b16 %v44_v3 }
  0x2a   :  { %857 = vmatpush.bf16.msra.mxu0 %v1071_v31  ;;  %v1422_v7 = vld [vmem:[#allocation2 + $0x2c0] sm:$0xf]  ;;  %v1559_v11 = vor.u32 %v1703_v63, %v1558_v62  ;;  %v1669_v12 = vld [vmem:[#allocation2 + $0x2c4] sm:$0xf0]  ;;  %v1804_v18 = vpack.c.b16 %v188_v8, %v188_v8  ;;  %v1808_v20 = vpack.c.b16 %v189_v10, %v189_v10  ;;  %v1359_v21 = vor.u32 %v1653_v6, %v1358_v5  ;;  %v1350_v25 = vld [vmem:[#allocation2 + $0x230] sm:$0xf] }
  0x2b   :  { %870 = vmatpush.bf16.msra.mxu1 %v1135_v35  ;;  %v1486_v13 = vld [vmem:[#allocation2 + $0x340] sm:$0xf]  ;;  %v1685_v14 = vld [vmem:[#allocation2 + $0x344] sm:$0xf0]  ;;  %v1806_v19 = vpack.c.b16 %v186_v9, %v186_v9  ;;  %v1810_v22 = vpack.c.b16 %v187_v15, %v187_v15  ;;  %v1423_v23 = vor.u32 %v1669_v12, %v1422_v7  ;;  %v1651_v26 = vld [vmem:[#allocation2 + $0x234] sm:$0xf0] }
  0x2c   :  { %883 = vmatpush.bf16.msra.mxu2 %v1199_v36  ;;  %v1550_v16 = vld [vmem:[#allocation2 + $0x3c0] sm:$0xf]  ;;  %v1701_v17 = vld [vmem:[#allocation2 + $0x3c4] sm:$0xf0]  ;;  %v1487_v24 = vor.u32 %v1685_v14, %v1486_v13  ;;  %v1414_v27 = vld [vmem:[#allocation2 + $0x2b0] sm:$0xf]  ;;  %v1351_v34 = vor.u32 %v1651_v26, %v1350_v25 }
  0x2d   :  { %896 = vmatpush.bf16.msra.mxu3 %v1263_v39  ;;  %v1551_v28 = vor.u32 %v1701_v17, %v1550_v16  ;;  %v1667_v29 = vld [vmem:[#allocation2 + $0x2b4] sm:$0xf0]  ;;  %v1478_v30 = vld [vmem:[#allocation2 + $0x330] sm:$0xf]  ;;  %858 = vmatmul.bf16.vlgmr.msra.gmra.mxu0 %v1806_v19  ;;  %v1342_v37 = vld [vmem:[#allocation2 + $0x220] sm:$0xf] }
  0x2e   :  { %902 = vmatpush.bf16.msrb.mxu0 %v1383_v40  ;;  %v1683_v31 = vld [vmem:[#allocation2 + $0x334] sm:$0xf0]  ;;  %v1542_v32 = vld [vmem:[#allocation2 + $0x3b0] sm:$0xf]  ;;  %871 = vmatmul.bf16.vlgmr.msra.gmra.mxu1 %v1810_v22  ;;  %v1415_v35 = vor.u32 %v1667_v29, %v1414_v27  ;;  %v1649_v38 = vld [vmem:[#allocation2 + $0x224] sm:$0xf0] }
  0x2f   :  { %915 = vmatpush.bf16.msrb.mxu1 %v1447_v41  ;;  %884 = vmatmul.bf16.vlgmr.msra.gmra.mxu2 %v1804_v18  ;;  %v1699_v33 = vld [vmem:[#allocation2 + $0x3b4] sm:$0xf0]  ;;  %v1479_v36 = vor.u32 %v1683_v31, %v1478_v30  ;;  %v1406_v39 = vld [vmem:[#allocation2 + $0x2a0] sm:$0xf]  ;;  %v1665_v41 = vld [vmem:[#allocation2 + $0x2a4] sm:$0xf0] }
  0x30   :  { %928 = vmatpush.bf16.msrb.mxu2 %v1511_v42  ;;  %897 = vmatmul.bf16.vlgmr.msra.gmra.mxu3 %v1808_v20  ;;  %v1543_v40 = vor.u32 %v1699_v33, %v1542_v32  ;;  %v1470_v42 = vld [vmem:[#allocation2 + $0x320] sm:$0xf]  ;;  %v1681_v43 = vld [vmem:[#allocation2 + $0x324] sm:$0xf0]  ;;  %v1407_v47 = vor.u32 %v1665_v41, %v1406_v39  ;;  %v1334_v49 = vld [vmem:[#allocation2 + $0x210] sm:$0xf] }
  0x31   :  { %941 = vmatpush.bf16.msrb.mxu3 %v1575_v46  ;;  %v1534_v44 = vld [vmem:[#allocation2 + $0x3a0] sm:$0xf]  ;;  %v1697_v45 = vld [vmem:[#allocation2 + $0x3a4] sm:$0xf0]  ;;  %v1343_v46 = vor.u32 %v1649_v38, %v1342_v37  ;;  %v1471_v48 = vor.u32 %v1681_v43, %v1470_v42  ;;  %v1647_v50 = vld [vmem:[#allocation2 + $0x214] sm:$0xf0] }
  0x32   :  { %903 = vmatpush.bf16.msrb.mxu0 %v1375_v52  ;;  %v1398_v51 = vld [vmem:[#allocation2 + $0x290] sm:$0xf]  ;;  %v1535_v52 = vor.u32 %v1697_v45, %v1534_v44  ;;  %v1663_v53 = vld [vmem:[#allocation2 + $0x294] sm:$0xf0]  ;;  %v1326_v58 = vld [vmem:[#allocation2 + $0x200] sm:$0xf] }
  0x33   :  { %916 = vmatpush.bf16.msrb.mxu1 %v1439_v54  ;;  %v1462_v54 = vld [vmem:[#allocation2 + $0x310] sm:$0xf]  ;;  %v1695_v57 = vld [vmem:[#allocation2 + $0x394] sm:$0xf0]  ;;  %v1645_v60 = vld [vmem:[#allocation2 + $0x204] sm:$0xf0]  ;;  %v1399_v63 = vor.u32 %v1663_v53, %v1398_v51 }
  0x34   :  { %929 = vmatpush.bf16.msrb.mxu2 %v1503_v55  ;;  %v1679_v55 = vld [vmem:[#allocation2 + $0x314] sm:$0xf0]  ;;  %v1526_v56 = vld [vmem:[#allocation2 + $0x390] sm:$0xf]  ;;  %v1390_v61 = vld [vmem:[#allocation2 + $0x280] sm:$0xf] }
  0x35   :  { %942 = vmatpush.bf16.msrb.mxu3 %v1567_v59  ;;  %v1335_v59 = vor.u32 %v1647_v50, %v1334_v49  ;;  %v1661_v62 = vld [vmem:[#allocation2 + $0x284] sm:$0xf0]  ;;  %v47_v3 = vld [vmem:[%s1848_s0 + $0x18] sm:$0xff]  ;;  %v1518_v5 = vld [vmem:[#allocation2 + $0x380] sm:$0xf] }
  0x36   :  { %904 = vmatpush.bf16.msrb.mxu0 %v1367_v0  ;;  %v1463_v0 = vor.u32 %v1679_v55, %v1462_v54  ;;  %v1677_v2 = vld [vmem:[#allocation2 + $0x304] sm:$0xf0]  ;;  %v46_v7 = vld [vmem:[%s1848_s0 + $0x10] sm:$0xff]  ;;  %v1128_v9 = vld [vmem:[#allocation2 + $0x78] sm:$0xf0]  ;;  %v192_v15 = vunpack.c.l.b16 %v47_v3  ;;  %v1391_v16 = vor.u32 %v1661_v62, %v1390_v61  ;;  %v193_v25 = vunpack.c.h.b16 %v47_v3 }
  0x37   :  { %917 = vmatpush.bf16.msrb.mxu1 %v1431_v1  ;;  %v1454_v1 = vld [vmem:[#allocation2 + $0x300] sm:$0xf]  ;;  %v1693_v6 = vld [vmem:[#allocation2 + $0x384] sm:$0xf0]  ;;  %v1594_v8 = vld [vmem:[#allocation2 + $0x74] sm:$0xf] }
  0x38   :  { %930 = vmatpush.bf16.msrb.mxu2 %v1495_v4  ;;  %v1527_v4 = vor.u32 %v1695_v57, %v1526_v56  ;;  %v1610_v10 = vld [vmem:[#allocation2 + $0xf4] sm:$0xf]  ;;  %v1192_v12 = vld [vmem:[#allocation2 + $0xf8] sm:$0xf0]  ;;  %v1455_v17 = vor.u32 %v1677_v2, %v1454_v1  ;;  %v1519_v26 = vor.u32 %v1693_v6, %v1518_v5  ;;  %v1131_v27 = vor.u32 %v1594_v8, %v1128_v9  ;;  %v1592_v31 = vld [vmem:[#allocation2 + $0x64] sm:$0xf] }
  0x39   :  { %943 = vmatpush.bf16.msrb.mxu3 %v1559_v11  ;;  %v1327_v11 = vor.u32 %v1645_v60, %v1326_v58  ;;  %v1626_v13 = vld [vmem:[#allocation2 + $0x174] sm:$0xf]  ;;  %v1256_v14 = vld [vmem:[#allocation2 + $0x178] sm:$0xf0]  ;;  %v1195_v29 = vor.u32 %v1610_v10, %v1192_v12  ;;  %v1120_v32 = vld [vmem:[#allocation2 + $0x68] sm:$0xf0]  ;;  %v1822_v38 = vpack.c.b16 %v192_v15, %v192_v15  ;;  %v1826_v42 = vpack.c.b16 %v193_v25, %v193_v25 }
  0x3a   :  { %905 = vmatpush.bf16.msrb.mxu0 %v1359_v21  ;;  %v1642_v21 = vld [vmem:[#allocation2 + $0x1f4] sm:$0xf]  ;;  %v1259_v30 = vor.u32 %v1626_v13, %v1256_v14  ;;  %v1608_v33 = vld [vmem:[#allocation2 + $0xe4] sm:$0xf]  ;;  %v1248_v37 = vld [vmem:[#allocation2 + $0x168] sm:$0xf0]  ;;  %v1123_v43 = vor.u32 %v1592_v31, %v1120_v32 }
  0x3b   :  { %918 = vmatpush.bf16.msrb.mxu1 %v1423_v23  ;;  %v1320_v23 = vld [vmem:[#allocation2 + $0x1f8] sm:$0xf0]  ;;  %v1640_v39 = vld [vmem:[#allocation2 + $0x1e4] sm:$0xf]  ;;  %v1606_v49 = vld [vmem:[#allocation2 + $0xd4] sm:$0xf] }
  0x3c   :  { %931 = vmatpush.bf16.msrb.mxu2 %v1487_v24  ;;  %v190_v24 = vunpack.c.l.b16 %v46_v7  ;;  %v1176_v51 = vld [vmem:[#allocation2 + $0xd8] sm:$0xf0]  ;;  %v1638_v54 = vld [vmem:[#allocation2 + $0x1d4] sm:$0xf]  ;;  %v1104_v60 = vld [vmem:[#allocation2 + $0x48] sm:$0xf0] }
  0x3d   :  { %944 = vmatpush.bf16.msrb.mxu3 %v1551_v28  ;;  %v191_v28 = vunpack.c.h.b16 %v46_v7  ;;  %v1240_v53 = vld [vmem:[#allocation2 + $0x158] sm:$0xf0]  ;;  %v1179_v57 = vor.u32 %v1606_v49, %v1176_v51  ;;  %v1604_v61 = vld [vmem:[#allocation2 + $0xc4] sm:$0xf]  ;;  %v1232_v1 = vld [vmem:[#allocation2 + $0x148] sm:$0xf0] }
  0x3e   :  { %906 = vmatpush.bf16.msrb.mxu0 %v1351_v34  ;;  %v1323_v34 = vor.u32 %v1642_v21, %v1320_v23  ;;  %v1824_v41 = vpack.c.b16 %v190_v24, %v190_v24  ;;  %v1304_v55 = vld [vmem:[#allocation2 + $0x1d8] sm:$0xf0]  ;;  %v1636_v2 = vld [vmem:[#allocation2 + $0x1c4] sm:$0xf]  ;;  %v1296_v3 = vld [vmem:[#allocation2 + $0x1c8] sm:$0xf0] }
  0x3f   :  { %919 = vmatpush.bf16.msrb.mxu1 %v1415_v35  ;;  %v1184_v35 = vld [vmem:[#allocation2 + $0xe8] sm:$0xf0]  ;;  %v1828_v44 = vpack.c.b16 %v191_v28, %v191_v28  ;;  %v1307_v62 = vor.u32 %v1638_v54, %v1304_v55  ;;  %v1586_v7 = vld [vmem:[#allocation2 + $0x34] sm:$0xf]  ;;  %v1096_v8 = vld [vmem:[#allocation2 + $0x38] sm:$0xf0]  ;;  %v1299_v10 = vor.u32 %v1636_v2, %v1296_v3 }
  0x40   :  { %932 = vmatpush.bf16.msrb.mxu2 %v1479_v36  ;;  %v1624_v36 = vld [vmem:[#allocation2 + $0x164] sm:$0xf]  ;;  %v1187_v45 = vor.u32 %v1608_v33, %v1184_v35  ;;  %v1602_v9 = vld [vmem:[#allocation2 + $0xb4] sm:$0xf]  ;;  %v1224_v13 = vld [vmem:[#allocation2 + $0x138] sm:$0xf0] }
  0x41   :  { %945 = vmatpush.bf16.msrb.mxu3 %v1543_v40  ;;  %v1312_v40 = vld [vmem:[#allocation2 + $0x1e8] sm:$0xf0]  ;;  %v1618_v12 = vld [vmem:[#allocation2 + $0x134] sm:$0xf]  ;;  %v1288_v15 = vld [vmem:[#allocation2 + $0x1b8] sm:$0xf0] }
  0x42   :  { %907 = vmatpush.bf16.msrb.mxu0 %v1343_v46  ;;  %v1251_v46 = vor.u32 %v1624_v36, %v1248_v37  ;;  %v1315_v50 = vor.u32 %v1640_v39, %v1312_v40  ;;  %v1634_v14 = vld [vmem:[#allocation2 + $0x1b4] sm:$0xf]  ;;  %v1227_v21 = vor.u32 %v1618_v12, %v1224_v13  ;;  %v1584_v23 = vld [vmem:[#allocation2 + $0x24] sm:$0xf]  ;;  %v1088_v24 = vld [vmem:[#allocation2 + $0x28] sm:$0xf0] }
  0x43   :  { %920 = vmatpush.bf16.msrb.mxu1 %v1407_v47  ;;  %v1590_v47 = vld [vmem:[#allocation2 + $0x54] sm:$0xf]  ;;  %v1600_v25 = vld [vmem:[#allocation2 + $0xa4] sm:$0xf]  ;;  %v1280_v31 = vld [vmem:[#allocation2 + $0x1a8] sm:$0xf0]  ;;  %v1091_v32 = vor.u32 %v1584_v23, %v1088_v24 }
  0x44   :  { %933 = vmatpush.bf16.msrb.mxu2 %v1471_v48  ;;  %v1112_v48 = vld [vmem:[#allocation2 + $0x58] sm:$0xf0]  ;;  %v1616_v28 = vld [vmem:[#allocation2 + $0x124] sm:$0xf]  ;;  %v1582_v35 = vld [vmem:[#allocation2 + $0x14] sm:$0xf] }
  0x45   :  { %946 = vmatpush.bf16.msrb.mxu3 %v1535_v52  ;;  %v1622_v52 = vld [vmem:[#allocation2 + $0x154] sm:$0xf]  ;;  %v1115_v56 = vor.u32 %v1590_v47, %v1112_v48  ;;  %v1080_v36 = vld [vmem:[#allocation2 + $0x18] sm:$0xf0]  ;;  %v1580_v49 = vld [vmem:[#allocation2 + $0x4] sm:$0xf] }
  0x46   :  { %908 = vmatpush.bf16.msrb.mxu0 %v1335_v59  ;;  %v1243_v58 = vor.u32 %v1622_v52, %v1240_v53  ;;  %v1588_v59 = vld [vmem:[#allocation2 + $0x44] sm:$0xf]  ;;  %v1598_v37 = vld [vmem:[#allocation2 + $0x94] sm:$0xf]  ;;  %v1144_v40 = vld [vmem:[#allocation2 + $0x98] sm:$0xf0]  ;;  %v1083_v48 = vor.u32 %v1582_v35, %v1080_v36 }
  0x47   :  { %921 = vmatpush.bf16.msrb.mxu1 %v1399_v63  ;;  %v1168_v63 = vld [vmem:[#allocation2 + $0xc8] sm:$0xf0]  ;;  %v1272_v47 = vld [vmem:[#allocation2 + $0x198] sm:$0xf0]  ;;  %v1147_v51 = vor.u32 %v1598_v37, %v1144_v40  ;;  %v1596_v53 = vld [vmem:[#allocation2 + $0x84] sm:$0xf] }
  0x48   :  { %934 = vmatpush.bf16.msrb.mxu2 %v1463_v0  ;;  %v1620_v0 = vld [vmem:[#allocation2 + $0x144] sm:$0xf]  ;;  %v1171_v5 = vor.u32 %v1604_v61, %v1168_v63  ;;  %v1136_v54 = vld [vmem:[#allocation2 + $0x88] sm:$0xf0]  ;;  %v1384_v61 = vld [vmem:[#allocation2 + $0x278] sm:$0xf0] }
  0x49   :  { %947 = vmatpush.bf16.msrb.mxu3 %v1527_v4  ;;  %v1107_v4 = vor.u32 %v1588_v59, %v1104_v60  ;;  %v1235_v6 = vor.u32 %v1620_v0, %v1232_v1  ;;  %v1612_v55 = vld [vmem:[#allocation2 + $0x104] sm:$0xf]  ;;  %v1264_v59 = vld [vmem:[#allocation2 + $0x188] sm:$0xf0]  ;;  %v1658_v60 = vld [vmem:[#allocation2 + $0x274] sm:$0xf]  ;;  %v1139_v3 = vor.u32 %v1596_v53, %v1136_v54 }
  0x4a   :  { %909 = vmatpush.bf16.msrb.mxu0 %v1327_v11  ;;  %v1160_v11 = vld [vmem:[#allocation2 + $0xb8] sm:$0xf0]  ;;  %v1690_v1 = vld [vmem:[#allocation2 + $0x374] sm:$0xf]  ;;  %v1376_v12 = vld [vmem:[#allocation2 + $0x268] sm:$0xf0] }
  0x4b   :  { %922 = vmatpush.bf16.msrb.mxu1 %v1391_v16  ;;  %v1099_v16 = vor.u32 %v1586_v7, %v1096_v8  ;;  %v1448_v0 = vld [vmem:[#allocation2 + $0x2f8] sm:$0xf0]  ;;  %v1387_v8 = vor.u32 %v1658_v60, %v1384_v61  ;;  %v1672_v13 = vld [vmem:[#allocation2 + $0x2e4] sm:$0xf]  ;;  %v1568_v23 = vld [vmem:[#allocation2 + $0x3e8] sm:$0xf0] }
  0x4c   :  { %935 = vmatpush.bf16.msrb.mxu2 %v1455_v17  ;;  %v1163_v17 = vor.u32 %v1602_v9, %v1160_v11  ;;  %v1512_v2 = vld [vmem:[#allocation2 + $0x378] sm:$0xf0]  ;;  %v1656_v11 = vld [vmem:[#allocation2 + $0x264] sm:$0xf]  ;;  %v1666_v53 = vld [vmem:[#allocation2 + $0x2b4] sm:$0xf] }
  0x4d   :  { %948 = vmatpush.bf16.msrb.mxu3 %v1519_v26  ;;  %910 = vmatmul.bf16.vlgmr.msrb.gmra.mxu0 %v1824_v41  ;;  %v1291_v26 = vor.u32 %v1634_v14, %v1288_v15  ;;  %v1440_v15 = vld [vmem:[#allocation2 + $0x2e8] sm:$0xf0]  ;;  %v1379_v24 = vor.u32 %v1656_v11, %v1376_v12  ;;  %v1560_v35 = vld [vmem:[#allocation2 + $0x3d8] sm:$0xf0]  ;;  %v1652_v40 = vld [vmem:[#allocation2 + $0x244] sm:$0xf] }
  0x4e   :  { %954 = vmatpush.bf16.msra.mxu0 %v1131_v27  ;;  %923 = vmatmul.bf16.vlgmr.msrb.gmra.mxu1 %v1828_v44  ;;  %v1152_v27 = vld [vmem:[#allocation2 + $0xa8] sm:$0xf0]  ;;  %v1646_v11 = vld [vmem:[#allocation2 + $0x214] sm:$0xf]  ;;  %v1336_v12 = vld [vmem:[#allocation2 + $0x218] sm:$0xf0] }
  0x4f   :  { %967 = vmatpush.bf16.msra.mxu1 %v1195_v29  ;;  %936 = vmatmul.bf16.vlgmr.msrb.gmra.mxu2 %v1822_v38  ;;  %v1216_v29 = vld [vmem:[#allocation2 + $0x128] sm:$0xf0]  ;;  %v1155_v33 = vor.u32 %v1600_v25, %v1152_v27  ;;  %v1443_v25 = vor.u32 %v1672_v13, %v1440_v15  ;;  %v1654_v27 = vld [vmem:[#allocation2 + $0x254] sm:$0xf]  ;;  %v1400_v15 = vld [vmem:[#allocation2 + $0x298] sm:$0xf0] }
  0x50   :  { %980 = vmatpush.bf16.msra.mxu2 %v1259_v30  ;;  %949 = vmatmul.bf16.vlgmr.msrb.gmra.mxu3 %v1826_v42  ;;  %v1632_v30 = vld [vmem:[#allocation2 + $0x1a4] sm:$0xf]  ;;  %v1662_v13 = vld [vmem:[#allocation2 + $0x294] sm:$0xf] }
  0x51   :  { %993 = vmatpush.bf16.msra.mxu3 %v1323_v34  ;;  %v1219_v34 = vor.u32 %v1616_v28, %v1216_v29  ;;  %v1283_v39 = vor.u32 %v1632_v30, %v1280_v31  ;;  %v1368_v28 = vld [vmem:[#allocation2 + $0x258] sm:$0xf0]  ;;  %v1670_v29 = vld [vmem:[#allocation2 + $0x2d4] sm:$0xf] }
  0x52   :  { %955 = vmatpush.bf16.msra.mxu0 %v1123_v43  ;;  %v1614_v43 = vld [vmem:[#allocation2 + $0x114] sm:$0xf]  ;;  %v1432_v31 = vld [vmem:[#allocation2 + $0x2d8] sm:$0xf0]  ;;  %v1371_v36 = vor.u32 %v1654_v27, %v1368_v28  ;;  %v1644_v27 = vld [vmem:[#allocation2 + $0x204] sm:$0xf] }
  0x53   :  { %968 = vmatpush.bf16.msra.mxu1 %v1187_v45  ;;  %v1208_v45 = vld [vmem:[#allocation2 + $0x118] sm:$0xf0]  ;;  %v1435_v37 = vor.u32 %v1670_v29, %v1432_v31  ;;  %v1328_v28 = vld [vmem:[#allocation2 + $0x208] sm:$0xf0]  ;;  %v1660_v29 = vld [vmem:[#allocation2 + $0x284] sm:$0xf] }
  0x54   :  { %981 = vmatpush.bf16.msra.mxu2 %v1251_v46  ;;  %v1630_v46 = vld [vmem:[#allocation2 + $0x194] sm:$0xf]  ;;  %v1211_v52 = vor.u32 %v1614_v43, %v1208_v45  ;;  %v1360_v43 = vld [vmem:[#allocation2 + $0x248] sm:$0xf0] }
  0x55   :  { %994 = vmatpush.bf16.msra.mxu3 %v1315_v50  ;;  %v1072_v50 = vld [vmem:[#allocation2 + $0x8] sm:$0xf0] }
  0x56   :  { %956 = vmatpush.bf16.msra.mxu0 %v1115_v56  ;;  %v1275_v56 = vor.u32 %v1630_v46, %v1272_v47  ;;  %v1075_v63 = vor.u32 %v1580_v49, %v1072_v50  ;;  %v1424_v46 = vld [vmem:[#allocation2 + $0x2c8] sm:$0xf0]  ;;  %v1684_v47 = vld [vmem:[#allocation2 + $0x344] sm:$0xf] }
  0x57   :  { %969 = vmatpush.bf16.msra.mxu1 %v1179_v57  ;;  %v1200_v57 = vld [vmem:[#allocation2 + $0x108] sm:$0xf0]  ;;  %v1700_v49 = vld [vmem:[#allocation2 + $0x3c4] sm:$0xf] }
  0x58   :  { %982 = vmatpush.bf16.msra.mxu2 %v1243_v58  ;;  %v1628_v58 = vld [vmem:[#allocation2 + $0x184] sm:$0xf]  ;;  %v1392_v31 = vld [vmem:[#allocation2 + $0x288] sm:$0xf0] }
  0x59   :  { %995 = vmatpush.bf16.msra.mxu3 %v1307_v62  ;;  %v1674_v62 = vld [vmem:[#allocation2 + $0x2f4] sm:$0xf]  ;;  %v1267_v7 = vor.u32 %v1628_v58, %v1264_v59  ;;  %v1544_v59 = vld [vmem:[#allocation2 + $0x3b8] sm:$0xf0] }
  0x5a   :  { %957 = vmatpush.bf16.msra.mxu0 %v1107_v4  ;;  %v1203_v4 = vor.u32 %v1612_v55, %v1200_v57  ;;  %v1451_v9 = vor.u32 %v1674_v62, %v1448_v0  ;;  %v1416_v55 = vld [vmem:[#allocation2 + $0x2b8] sm:$0xf0]  ;;  %v1698_v58 = vld [vmem:[#allocation2 + $0x3b4] sm:$0xf]  ;;  %v1344_v0 = vld [vmem:[#allocation2 + $0x228] sm:$0xf0] }
  0x5b   :  { %970 = vmatpush.bf16.msra.mxu1 %v1171_v5  ;;  %v1706_v5 = vld [vmem:[#allocation2 + $0x3f4] sm:$0xf]  ;;  %v1480_v57 = vld [vmem:[#allocation2 + $0x338] sm:$0xf0]  ;;  %v1419_v61 = vor.u32 %v1666_v53, %v1416_v55 }
  0x5c   :  { %983 = vmatpush.bf16.msra.mxu2 %v1235_v6  ;;  %v1576_v6 = vld [vmem:[#allocation2 + $0x3f8] sm:$0xf0] }
  0x5d   :  { %996 = vmatpush.bf16.msra.mxu3 %v1299_v10  ;;  %v1515_v10 = vor.u32 %v1690_v1, %v1512_v2  ;;  %v1579_v14 = vor.u32 %v1706_v5, %v1576_v6  ;;  %v1664_v1 = vld [vmem:[#allocation2 + $0x2a4] sm:$0xf]  ;;  %v1547_v2 = vor.u32 %v1698_v58, %v1544_v59  ;;  %v1472_v5 = vld [vmem:[#allocation2 + $0x328] sm:$0xf0] }
  0x5e   :  { %958 = vmatpush.bf16.msra.mxu0 %v1099_v16  ;;  %v1688_v16 = vld [vmem:[#allocation2 + $0x364] sm:$0xf] }
  0x5f   :  { %971 = vmatpush.bf16.msra.mxu1 %v1163_v17  ;;  %v1504_v17 = vld [vmem:[#allocation2 + $0x368] sm:$0xf0]  ;;  %v1696_v6 = vld [vmem:[#allocation2 + $0x3a4] sm:$0xf] }
  0x60   :  { %984 = vmatpush.bf16.msra.mxu2 %v1227_v21  ;;  %v1704_v21 = vld [vmem:[#allocation2 + $0x3e4] sm:$0xf] }
  0x61   :  { %997 = vmatpush.bf16.msra.mxu3 %v1291_v26  ;;  %v1507_v26 = vor.u32 %v1688_v16, %v1504_v17  ;;  %v1571_v30 = vor.u32 %v1704_v21, %v1568_v23  ;;  %v1678_v16 = vld [vmem:[#allocation2 + $0x314] sm:$0xf]  ;;  %v1464_v17 = vld [vmem:[#allocation2 + $0x318] sm:$0xf0] }
  0x62   :  { %959 = vmatpush.bf16.msra.mxu0 %v1091_v32  ;;  %v1686_v32 = vld [vmem:[#allocation2 + $0x354] sm:$0xf]  ;;  %v1528_v23 = vld [vmem:[#allocation2 + $0x398] sm:$0xf0] }
  0x63   :  { %972 = vmatpush.bf16.msra.mxu1 %v1155_v33  ;;  %v1496_v33 = vld [vmem:[#allocation2 + $0x358] sm:$0xf0]  ;;  %v1694_v21 = vld [vmem:[#allocation2 + $0x394] sm:$0xf] }
  0x64   :  { %985 = vmatpush.bf16.msra.mxu2 %v1219_v34  ;;  %v1702_v34 = vld [vmem:[#allocation2 + $0x3d4] sm:$0xf] }
  0x65   :  { %998 = vmatpush.bf16.msra.mxu3 %v1283_v39  ;;  %v1499_v39 = vor.u32 %v1686_v32, %v1496_v33  ;;  %v1563_v45 = vor.u32 %v1702_v34, %v1560_v35  ;;  %v1676_v32 = vld [vmem:[#allocation2 + $0x304] sm:$0xf]  ;;  %v1456_v33 = vld [vmem:[#allocation2 + $0x308] sm:$0xf0] }
  0x66   :  { %960 = vmatpush.bf16.msra.mxu0 %v1083_v48  ;;  %v1488_v48 = vld [vmem:[#allocation2 + $0x348] sm:$0xf0]  ;;  %v1692_v34 = vld [vmem:[#allocation2 + $0x384] sm:$0xf] }
  0x67   :  { %973 = vmatpush.bf16.msra.mxu1 %v1147_v51  ;;  %v1650_v51 = vld [vmem:[#allocation2 + $0x234] sm:$0xf]  ;;  %v1520_v35 = vld [vmem:[#allocation2 + $0x388] sm:$0xf0] }
  0x68   :  { %986 = vmatpush.bf16.msra.mxu2 %v1211_v52  ;;  %v1352_v52 = vld [vmem:[#allocation2 + $0x238] sm:$0xf0] }
  0x69   :  { %999 = vmatpush.bf16.msra.mxu3 %v1275_v56  ;;  %v1682_v56 = vld [vmem:[#allocation2 + $0x334] sm:$0xf]  ;;  %v1355_v60 = vor.u32 %v1650_v51, %v1352_v52 }
  0x6a   :  { %961 = vmatpush.bf16.msra.mxu0 %v1075_v63  ;;  %v1483_v62 = vor.u32 %v1682_v56, %v1480_v57  ;;  %v1648_v63 = vld [vmem:[#allocation2 + $0x224] sm:$0xf] }
  0x6b   :  { %974 = vmatpush.bf16.msra.mxu1 %v1139_v3  ;;  %v1408_v3 = vld [vmem:[#allocation2 + $0x2a8] sm:$0xf0] }
  0x6c   :  { %987 = vmatpush.bf16.msra.mxu2 %v1203_v4  ;;  %v1680_v4 = vld [vmem:[#allocation2 + $0x324] sm:$0xf] }
  0x6d   :  { %1000 = vmatpush.bf16.msra.mxu3 %v1267_v7  ;;  %962 = vmatmul.bf16.vlgmr.msra.gmra.mxu0 %v1806_v19  ;;  %v1552_v19 = vld [vmem:[#allocation2 + $0x3c8] sm:$0xf0] }
  0x6e   :  { %1006 = vmatpush.bf16.msrb.mxu0 %v1387_v8  ;;  %975 = vmatmul.bf16.vlgmr.msra.gmra.mxu1 %v1810_v22  ;;  %v1491_v22 = vor.u32 %v1684_v47, %v1488_v48  ;;  %v1555_v54 = vor.u32 %v1700_v49, %v1552_v19  ;;  %v1536_v7 = vld [vmem:[#allocation2 + $0x3a8] sm:$0xf0]  ;;  %v1347_v8 = vor.u32 %v1648_v63, %v1344_v0 }
  0x6f   :  { %1019 = vmatpush.bf16.msrb.mxu1 %v1451_v9  ;;  %988 = vmatmul.bf16.vlgmr.msra.gmra.mxu2 %v1804_v18  ;;  %v1668_v18 = vld [vmem:[#allocation2 + $0x2c4] sm:$0xf]  ;;  %v1411_v9 = vor.u32 %v1664_v1, %v1408_v3 }
  0x70   :  { %1032 = vmatpush.bf16.msrb.mxu2 %v1515_v10  ;;  %1001 = vmatmul.bf16.vlgmr.msra.gmra.mxu3 %v1808_v20  ;;  %v1363_v20 = vor.u32 %v1652_v40, %v1360_v43  ;;  %v1427_v50 = vor.u32 %v1668_v18, %v1424_v46  ;;  %v1475_v10 = vor.u32 %v1680_v4, %v1472_v5  ;;  %v176_v43 = vld [vmem:[#allocation4] sm:$0x3] }
  0x71   :  { %1045 = vmatpush.bf16.msrb.mxu3 %v1579_v14  ;;  %v1539_v14 = vor.u32 %v1696_v6, %v1536_v7  ;;  %v1523_v40 = vor.u32 %v1692_v34, %v1520_v35  ;;  %v178_v46 = vperm.slane %v176_v43, 0  ;;  %v179_v5 = vperm.slane %v176_v43, 1 }
  0x72   :  { %1007 = vmatpush.bf16.msrb.mxu0 %v1379_v24  ;;  %v1339_v24 = vor.u32 %v1646_v11, %v1336_v12 }
  0x73   :  { %1020 = vmatpush.bf16.msrb.mxu1 %v1443_v25  ;;  %v1403_v25 = vor.u32 %v1662_v13, %v1400_v15 }
  0x74   :  { %1033 = vmatpush.bf16.msrb.mxu2 %v1507_v26  ;;  %v1467_v26 = vor.u32 %v1678_v16, %v1464_v17 }
  0x75   :  { %1046 = vmatpush.bf16.msrb.mxu3 %v1571_v30  ;;  %v1531_v30 = vor.u32 %v1694_v21, %v1528_v23 }
  0x76   :  { %1008 = vmatpush.bf16.msrb.mxu0 %v1371_v36  ;;  %v1331_v36 = vor.u32 %v1644_v27, %v1328_v28 }
  0x77   :  { %1021 = vmatpush.bf16.msrb.mxu1 %v1435_v37  ;;  %v1395_v37 = vor.u32 %v1660_v29, %v1392_v31 }
  0x78   :  { %1034 = vmatpush.bf16.msrb.mxu2 %v1499_v39  ;;  %v1459_v39 = vor.u32 %v1676_v32, %v1456_v33 }
  0x79   :  { %1047 = vmatpush.bf16.msrb.mxu3 %v1563_v45 }
  0x7a   :  { %1009 = vmatpush.bf16.msrb.mxu0 %v1363_v20 }
  0x7b   :  { %1022 = vmatpush.bf16.msrb.mxu1 %v1427_v50 }
  0x7c   :  { %1035 = vmatpush.bf16.msrb.mxu2 %v1491_v22 }
  0x7d   :  { %1048 = vmatpush.bf16.msrb.mxu3 %v1555_v54 }
  0x7e   :  { %1010 = vmatpush.bf16.msrb.mxu0 %v1355_v60 }
  0x7f   :  { %1023 = vmatpush.bf16.msrb.mxu1 %v1419_v61 }
  0x80   :  { %1036 = vmatpush.bf16.msrb.mxu2 %v1483_v62 }
  0x81   :  { %1049 = vmatpush.bf16.msrb.mxu3 %v1547_v2 }
  0x82   :  { %1011 = vmatpush.bf16.msrb.mxu0 %v1347_v8 }
  0x83   :  { %1024 = vmatpush.bf16.msrb.mxu1 %v1411_v9 }
  0x84   :  { %1037 = vmatpush.bf16.msrb.mxu2 %v1475_v10 }
  0x85   :  { %1050 = vmatpush.bf16.msrb.mxu3 %v1539_v14 }
  0x86   :  { %1012 = vmatpush.bf16.msrb.mxu0 %v1339_v24 }
  0x87   :  { %1025 = vmatpush.bf16.msrb.mxu1 %v1403_v25 }
  0x88   :  { %1038 = vmatpush.bf16.msrb.mxu2 %v1467_v26 }
  0x89   :  { %1051 = vmatpush.bf16.msrb.mxu3 %v1531_v30 }
  0x8a   :  { %1013 = vmatpush.bf16.msrb.mxu0 %v1331_v36 }
  0x8b   :  { %1026 = vmatpush.bf16.msrb.mxu1 %v1395_v37 }
  0x8c   :  { %1039 = vmatpush.bf16.msrb.mxu2 %v1459_v39 }
  0x8d   :  { %1052 = vmatpush.bf16.msrb.mxu3 %v1523_v40  ;;  %1014 = vmatmul.bf16.vlgmr.msrb.gmra.mxu0 %v1824_v41 }
  0x8e   :  { %1027 = vmatmul.bf16.vlgmr.msrb.gmra.mxu1 %v1828_v44 }
  0x8f   :  { %1040 = vmatmul.bf16.vlgmr.msrb.gmra.mxu2 %v1822_v38 }
  0x90   :  { %1053 = vmatmul.bf16.vlgmr.msrb.gmra.mxu3 %v1826_v42 }
  0xaa   :  { %v859_v18 = vpop.f32.mrf.mxu0 }
  0xab   :  { %v872_v45 = vpop.f32.mrf.mxu1  ;;  %v860_v49 = vadd.f32 %v859_v18, %v178_v46 }
  0xad   :  { %v873_v50 = vadd.f32 %v872_v45, %v860_v49 }
  0xb2   :  { %v885_v47 = vpop.f32.mrf.mxu2  ;;  %v861_v19 = vpop.f32.mrf.mxu0 }
  0xb3   :  { %v898_v48 = vpop.f32.mrf.mxu3  ;;  %v874_v20 = vpop.f32.mrf.mxu1  ;;  %v886_v52 = vadd.f32 %v885_v47, %v873_v50 }
  0xb5   :  { %v899_v41 = vadd.f32 %v898_v48, %v886_v52 }
  0xba   :  { %v887_v22 = vpop.f32.mrf.mxu2 }
  0xbb   :  { %v900_v51 = vpop.f32.mrf.mxu3 }
  0xca   :  { %v911_v53 = vpop.f32.mrf.mxu0 }
  0xcb   :  { %v912_v44 = vadd.f32 %v911_v53, %v899_v41  ;;  %v924_v54 = vpop.f32.mrf.mxu1 }
  0xcd   :  { %v925_v38 = vadd.f32 %v924_v54, %v912_v44 }
  0xd2   :  { %v937_v55 = vpop.f32.mrf.mxu2  ;;  %v913_v58 = vpop.f32.mrf.mxu0 }
  0xd3   :  { %v938_v42 = vadd.f32 %v937_v55, %v925_v38  ;;  %v950_v56 = vpop.f32.mrf.mxu3  ;;  %v926_v59 = vpop.f32.mrf.mxu1 }
  0xd5   :  { %v951_v57 = vadd.f32 %v950_v56, %v938_v42 }
  0xd7   :  { %1712 = vtanh.f32 %v951_v57 }
  0xda   :  { %v939_v60 = vpop.f32.mrf.mxu2 }
  0xdb   :  { %v952_v61 = vpop.f32.mrf.mxu3 }
  0xdd   :  { %v1713_v62 = vpop.eup %1712 }
  0xde   :  { %1060 = vst [vmem:[%s1851_s3] sm:$0xff] %v1713_v62 }
  0xea   :  { %v963_v63 = vpop.f32.mrf.mxu0 }
  0xeb   :  { %v976_v0 = vpop.f32.mrf.mxu1  ;;  %v964_v8 = vadd.f32 %v963_v63, %v179_v5 }
  0xed   :  { %v977_v9 = vadd.f32 %v976_v0, %v964_v8 }
  0xf2   :  { %v989_v1 = vpop.f32.mrf.mxu2  ;;  %v965_v3 = vpop.f32.mrf.mxu0 }
  0xf3   :  { %v1002_v2 = vpop.f32.mrf.mxu3  ;;  %v978_v4 = vpop.f32.mrf.mxu1  ;;  %v990_v10 = vadd.f32 %v989_v1, %v977_v9 }
  0xf5   :  { %v1003_v11 = vadd.f32 %v1002_v2, %v990_v10 }
  0xfa   :  { %v991_v6 = vpop.f32.mrf.mxu2 }
  0xfb   :  { %v1004_v7 = vpop.f32.mrf.mxu3 }
 0x10a   :  { %v1015_v12 = vpop.f32.mrf.mxu0 }
 0x10b   :  { %v1028_v13 = vpop.f32.mrf.mxu1  ;;  %v1016_v14 = vadd.f32 %v1015_v12, %v1003_v11 }
 0x10d   :  { %v1029_v15 = vadd.f32 %v1028_v13, %v1016_v14 }
 0x112   :  { %v1041_v16 = vpop.f32.mrf.mxu2  ;;  %v1017_v23 = vpop.f32.mrf.mxu0 }
 0x113   :  { %v1042_v17 = vadd.f32 %v1041_v16, %v1029_v15  ;;  %v1054_v21 = vpop.f32.mrf.mxu3  ;;  %v1030_v24 = vpop.f32.mrf.mxu1 }
 0x115   :  { %v1055_v25 = vadd.f32 %v1054_v21, %v1042_v17 }
 0x117   :  { %1714 = vtanh.f32 %v1055_v25 }
 0x11a   :  { %v1043_v26 = vpop.f32.mrf.mxu2 }
 0x11b   :  { %v1056_v27 = vpop.f32.mrf.mxu3 }
 0x11d   :  { %v1715_v28 = vpop.eup %1714 }
 0x11e   :  { %1061 = vst [vmem:[%s1851_s3 + $0x8] sm:$0xff] %v1715_v28 }
 0x11f   :  { %1066 = vsyncpa [#allocation3], 1 }
 0x120   :  { %1067 = vsyncpa [#allocation5], 1 }

// kernel: generator_forward.2
= control target key start
LH: loop header
LB: loop body
LE: loop exit
PB: predicated region body
PF: predicated region fallthrough
CT: control target
= control target key end

     0   :  { %20 = vsyncpa [#allocation3], 0  ;;  %s6230_s0 = inlined_call_operand.hbm [shape: f32[8,32], index: 0, kind: input, shape index: {}]   ;;  %s6231_s1 = inlined_call_operand.hbm [shape: bf16[32,128], index: 1, kind: input, shape index: {}]   ;;  %s6232_s2 = inlined_call_operand.hbm [shape: f32[1,128], index: 2, kind: input, shape index: {}]   ;;  %s6233_s3 = inlined_call_operand.hbm [shape: bf16[128,256], index: 3, kind: input, shape index: {}]   ;;  %s6234_s4 = inlined_call_operand.hbm [shape: f32[1,256], index: 4, kind: input, shape index: {}]   ;;  %s6235_s5 = inlined_call_operand.vmem [shape: f32[1,256], index: 5, kind: input, shape index: {}]   ;;  %s6236_s6 = inlined_call_operand.hbm [shape: f32[1,256], index: 6, kind: input, shape index: {}]   ;;  %s6237_s7 = inlined_call_operand.hbm [shape: bf16[256,512], index: 7, kind: input, shape index: {}]   ;;  %s6238_s8 = inlined_call_operand.hbm [shape: f32[1,512], index: 8, kind: input, shape index: {}]   ;;  %s6239_s9 = inlined_call_operand.hbm [shape: f32[1,512], index: 9, kind: input, shape index: {}]   ;;  %s6240_s10 = inlined_call_operand.hbm [shape: f32[1,512], index: 10, kind: input, shape index: {}]   ;;  %s6241_s11 = inlined_call_operand.hbm [shape: bf16[512,1024], index: 11, kind: input, shape index: {}]   ;;  %s6242_s12 = inlined_call_operand.hbm [shape: f32[1,1024], index: 12, kind: input, shape index: {}]   ;;  %s6243_s13 = inlined_call_operand.vmem [shape: f32[1,1024], index: 13, kind: input, shape index: {}]   ;;  %s6244_s14 = inlined_call_operand.hbm [shape: f32[1,1024], index: 14, kind: input, shape index: {}]   ;;  %s6245_s15 = inlined_call_operand.vmem [shape: bf16[8,1024], index: 15, kind: output, shape index: {}]  }
   0x1   :  { %21 = vsyncpa [#allocation5], 0 }
   0x2   :  { %22 = vsyncpa [#allocation8], 0 }
   0x3   :  { %23 = vsyncpa [#allocation11], 0 }
   0x4   :  { %24 = vsyncpa [#allocation14], 0 }
   0x5   :  { %25 = vsyncpa [#allocation17], 0  ;;  %s42_s20 = sshll.u32 %s6231_s1, 4  ;;  %s43_s20 = int_to_ptr.hbm [resolvable:$true] %s42_s20 }
   0x6   :  { %26 = vsyncpa [#allocation20], 0  ;;  %s5597_s21 = smov [#allocation4]   ;;  %s66_s25 = sshll.u32 %s6233_s3, 4  ;;  %s67_s25 = int_to_ptr.hbm [resolvable:$true] %s66_s25 }
   0x7   :  { %s44_s22 = sshll.u32 %s5597_s21, 4  ;;  %s5598_s26 = smov 64   ;;  %s45_s22 = int_to_ptr.vmem [resolvable:$true] %s44_s22 }
   0x8   :  { %s5599_s27 = smov 4   ;;  %s5600_s28 = smov [#allocation7]  }
   0x9   :  { %50 = dma.hbm_to_vmem [thread:$0]  %s43_s20, 256, %s45_s22, [#allocation5], %s5598_s26, %s5598_s26, %s5599_s27  }
   0xa   :  { %s68_s29 = sshll.u32 %s5600_s28, 4  ;;  %s5601_s30 = smov 128   ;;  %s69_s29 = int_to_ptr.vmem [resolvable:$true] %s68_s29 }
   0xb   :  { %s5602_s16 = smov 8   ;;  %s93_s18 = sshll.u32 %s6236_s6, 4  ;;  %s94_s18 = int_to_ptr.hbm [resolvable:$true] %s93_s18 }
   0xc   :  { %74 = dma.hbm_to_vmem [thread:$0]  %s67_s25, 2048, %s69_s29, [#allocation8], %s5601_s30, %s5601_s30, %s5602_s16  }
   0xd   :  { %s5603_s19 = smov [#allocation10]   ;;  %s117_s24 = sshll.u32 %s6238_s8, 4  ;;  %s118_s24 = int_to_ptr.hbm [resolvable:$true] %s117_s24 }
   0xe   :  { %s95_s21 = sshll.u32 %s5603_s19, 4  ;;  %s5604_s20 = smov [#allocation13]   ;;  %s96_s21 = int_to_ptr.vmem [resolvable:$true] %s95_s21 }
   0xf   :  { %98 = dma.hbm_to_vmem [thread:$0]  %s94_s18, 32, %s96_s21, [#allocation11]  }
  0x10   :  { %s119_s22 = sshll.u32 %s5604_s20, 4  ;;  %s139_s25 = sshll.u32 %s6240_s10, 4  ;;  %s120_s22 = int_to_ptr.vmem [resolvable:$true] %s119_s22  ;;  %s140_s25 = int_to_ptr.hbm [resolvable:$true] %s139_s25 }
  0x11   :  { %122 = dma.hbm_to_vmem [thread:$0]  %s118_s24, 64, %s120_s22, [#allocation14]  }
  0x12   :  { %s163_s29 = sshll.u32 %s6242_s12, 4  ;;  %s5605_s30 = smov [#allocation16]   ;;  %s164_s29 = int_to_ptr.hbm [resolvable:$true] %s163_s29 }
  0x13   :  { %s141_s16 = sshll.u32 %s5605_s30, 4  ;;  %s5606_s8 = smov [#allocation19]   ;;  %s142_s16 = int_to_ptr.vmem [resolvable:$true] %s141_s16 }
  0x14   :  { %144 = dma.hbm_to_vmem [thread:$0]  %s140_s25, 64, %s142_s16, [#allocation17]  }
  0x15   :  { %s165_s1 = sshll.u32 %s5606_s8, 4  ;;  %s32_s19 = sshll.u32 %s6230_s0, 4  ;;  %s166_s1 = int_to_ptr.vmem [resolvable:$true] %s165_s1  ;;  %s33_s19 = int_to_ptr.hbm [resolvable:$true] %s32_s19 }
  0x16   :  { %168 = dma.hbm_to_vmem [thread:$0]  %s164_s29, 128, %s166_s1, [#allocation20]  }
  0x17   :  { %s56_s23 = sshll.u32 %s6232_s2, 4  ;;  %s5607_s3 = smov [#allocation2]   ;;  %s57_s23 = int_to_ptr.hbm [resolvable:$true] %s56_s23 }
  0x18   :  { %s34_s12 = sshll.u32 %s5607_s3, 4  ;;  %s5608_s24 = smov [#allocation6]   ;;  %s35_s12 = int_to_ptr.vmem [resolvable:$true] %s34_s12 }
  0x19   :  { %37 = dma.hbm_to_vmem [thread:$0]  %s33_s19, 128, %s35_s12, [#allocation3]  }
  0x1a   :  { %s58_s20 = sshll.u32 %s5608_s24, 4  ;;  %s80_s27 = sshll.u32 %s6234_s4, 4  ;;  %s59_s20 = int_to_ptr.vmem [resolvable:$true] %s58_s20  ;;  %s81_s27 = int_to_ptr.hbm [resolvable:$true] %s80_s27 }
  0x1b   :  { %61 = dma.hbm_to_vmem [thread:$0]  %s57_s23, 16, %s59_s20, [#allocation5]  }
  0x1c   :  { %s103_s6 = sshll.u32 %s6237_s7, 4  ;;  %s5609_s28 = smov [#allocation9]   ;;  %s104_s6 = int_to_ptr.hbm [resolvable:$true] %s103_s6 }
  0x1d   :  { %s82_s2 = sshll.u32 %s5609_s28, 4  ;;  %s5610_s29 = smov [#allocation12]   ;;  %s83_s2 = int_to_ptr.vmem [resolvable:$true] %s82_s2 }
  0x1e   :  { %85 = dma.hbm_to_vmem [thread:$0]  %s81_s27, 32, %s83_s2, [#allocation8]  }
  0x1f   :  { %s105_s30 = sshll.u32 %s5610_s29, 4  ;;  %s5611_s16 = smov 256   ;;  %s106_s30 = int_to_ptr.vmem [resolvable:$true] %s105_s30 }
  0x20   :  { %s5612_s8 = smov 16   ;;  %s128_s17 = sshll.u32 %s6239_s9, 4  ;;  %s129_s17 = int_to_ptr.hbm [resolvable:$true] %s128_s17 }
  0x21   :  { %111 = dma.hbm_to_vmem [thread:$0]  %s104_s6, 8192, %s106_s30, [#allocation11], %s5611_s16, %s5611_s16, %s5612_s8  }
  0x22   :  { %s5613_s18 = smov [#allocation15]   ;;  %s149_s21 = sshll.u32 %s6241_s11, 4  ;;  %s150_s21 = int_to_ptr.hbm [resolvable:$true] %s149_s21 }
  0x23   :  { %s130_s19 = sshll.u32 %s5613_s18, 4  ;;  %s5614_s23 = smov [#allocation18]   ;;  %s131_s19 = int_to_ptr.vmem [resolvable:$true] %s130_s19 }
  0x24   :  { %133 = dma.hbm_to_vmem [thread:$0]  %s129_s17, 64, %s131_s19, [#allocation14]  }
  0x25   :  { %s151_s3 = sshll.u32 %s5614_s23, 4  ;;  %s5615_s12 = smov 512   ;;  %s152_s3 = int_to_ptr.vmem [resolvable:$true] %s151_s3 }
  0x26   :  { %s5616_s24 = smov 32   ;;  %s176_s9 = sshll.u32 %s6244_s14, 4  ;;  %s177_s9 = int_to_ptr.hbm [resolvable:$true] %s176_s9 }
  0x27   :  { %157 = dma.hbm_to_vmem [thread:$0]  %s150_s21, 32768, %s152_s3, [#allocation17], %s5615_s12, %s5615_s12, %s5616_s24  }
  0x28   :  { %s5617_s26 = smov [#allocation21]  }
  0x29   :  { %s178_s27 = sshll.u32 %s5617_s26, 4  ;;  %s179_s27 = int_to_ptr.vmem [resolvable:$true] %s178_s27 }
  0x2a   :  { %181 = dma.hbm_to_vmem [thread:$0]  %s177_s9, 128, %s179_s27, [#allocation20]  }
  0x2b   :  { %5583 = dma.done.wait [#allocation3], 128  }
  0x2c   :  { %5584 = vsyncadd [#allocation3], 4294967168 }
  0x2d   :  { %5585 = dma.done.wait [#allocation5], 272  }
  0x2e   :  { %5586 = vsyncadd [#allocation5], 4294967024 }
  0x2f   :  { %5587 = dma.done.wait [#allocation8], 2080  }
  0x30   :  { %5588 = vsyncadd [#allocation8], 4294965216 }
  0x31   :  { %5589 = dma.done.wait [#allocation11], 8224  }
  0x32   :  { %5590 = vsyncadd [#allocation11], 4294959072 }
  0x33   :  { %5591 = dma.done.wait [#allocation14], 128  }
  0x34   :  { %5592 = vsyncadd [#allocation14], 4294967168 }
  0x35   :  { %5593 = dma.done.wait [#allocation17], 32832  }
  0x36   :  { %5594 = vsyncadd [#allocation17], 4294934464 }
  0x37   :  { %5595 = dma.done.wait [#allocation20], 256  }
  0x38   :  { %5596 = vsyncadd [#allocation20], 4294967040  ;;  %v4881_v0 = vld [vmem:[#allocation4 + $0x8] sm:$0xff]  ;;  %v4880_v1 = vld [vmem:[#allocation4] sm:$0xff]  ;;  %vm257_vm0 = vcmask 261120   ;;  %v5618_v59 = vmov 8.0  }
  0x39   :  { %v235_v2 = vld [vmem:[#allocation2] sm:$0xff]  ;;  %v3594_v3 = vld [vmem:[#allocation7 + $0x70] sm:$0xf]  ;;  %v4897_v4 = vld [vmem:[#allocation7 + $0x74] sm:$0xf0]  ;;  %267 = vmatpush.bf16.msra.mxu0 %v4881_v0  ;;  %5241 = vrcp.f32 %v5618_v59  ;;  %vm471_vm6 = vcmask 1040384  }
  0x3a   :  { %v4896_v5 = vld [vmem:[#allocation7 + $0x74] sm:$0xf]  ;;  %v3595_v6 = vor.u32 %v4897_v4, %v3594_v3  ;;  %v3596_v7 = vld [vmem:[#allocation7 + $0x78] sm:$0xf0]  ;;  %v3586_v8 = vld [vmem:[#allocation7 + $0x60] sm:$0xf]  ;;  %v236_v14 = vpack.c.bf16 %v235_v2, %v235_v2 }
  0x3b   :  { %v4895_v9 = vld [vmem:[#allocation7 + $0x64] sm:$0xf0]  ;;  %v3599_v10 = vor.u32 %v4896_v5, %v3596_v7  ;;  %v4894_v11 = vld [vmem:[#allocation7 + $0x64] sm:$0xf]  ;;  %v3588_v12 = vld [vmem:[#allocation7 + $0x68] sm:$0xf0] }
  0x3c   :  { %380 = vmatpush.bf16.msra.mxu1 %v3595_v6  ;;  %v3587_v13 = vor.u32 %v4895_v9, %v3586_v8  ;;  %v3591_v15 = vor.u32 %v4894_v11, %v3588_v12  ;;  %v3578_v16 = vld [vmem:[#allocation7 + $0x50] sm:$0xf]  ;;  %v4893_v17 = vld [vmem:[#allocation7 + $0x54] sm:$0xf0]  ;;  %v4892_v18 = vld [vmem:[#allocation7 + $0x54] sm:$0xf] }
  0x3d   :  { %393 = vmatpush.bf16.msra.mxu2 %v3599_v10  ;;  %268 = vmatpush.bf16.msra.mxu0 %v4880_v1  ;;  %v3580_v19 = vld [vmem:[#allocation7 + $0x58] sm:$0xf0]  ;;  %v3579_v20 = vor.u32 %v4893_v17, %v3578_v16  ;;  %v3570_v22 = vld [vmem:[#allocation7 + $0x40] sm:$0xf]  ;;  %v4891_v23 = vld [vmem:[#allocation7 + $0x44] sm:$0xf0] }
  0x3e   :  { %v3583_v21 = vor.u32 %v4892_v18, %v3580_v19  ;;  %v4890_v24 = vld [vmem:[#allocation7 + $0x44] sm:$0xf]  ;;  %v3572_v25 = vld [vmem:[#allocation7 + $0x48] sm:$0xf0]  ;;  %v3571_v26 = vor.u32 %v4891_v23, %v3570_v22  ;;  %v3562_v28 = vld [vmem:[#allocation7 + $0x30] sm:$0xf] }
  0x3f   :  { %v3575_v27 = vor.u32 %v4890_v24, %v3572_v25  ;;  %v4889_v29 = vld [vmem:[#allocation7 + $0x34] sm:$0xf0]  ;;  %v4888_v30 = vld [vmem:[#allocation7 + $0x34] sm:$0xf]  ;;  %v3564_v31 = vld [vmem:[#allocation7 + $0x38] sm:$0xf0]  ;;  %v5242_v60 = vpop.eup %5241 }
  0x40   :  { %381 = vmatpush.bf16.msra.mxu1 %v3587_v13  ;;  %3535 = vmatmul.msk.bf16.vlgmr.msra.gmra.mxu0 %vm257_vm0, %v236_v14  ;;  %v3563_v32 = vor.u32 %v4889_v29, %v3562_v28  ;;  %v3567_v33 = vor.u32 %v4888_v30, %v3564_v31  ;;  %v3554_v34 = vld [vmem:[#allocation7 + $0x20] sm:$0xf]  ;;  %v4887_v35 = vld [vmem:[#allocation7 + $0x24] sm:$0xf0]  ;;  %v4886_v36 = vld [vmem:[#allocation7 + $0x24] sm:$0xf]  ;;  %vm423_vm2 = vweird.f32 %v5242_v60 }
  0x41   :  { %394 = vmatpush.bf16.msra.mxu2 %v3591_v15  ;;  %v3556_v37 = vld [vmem:[#allocation7 + $0x28] sm:$0xf0]  ;;  %v3555_v38 = vor.u32 %v4887_v35, %v3554_v34  ;;  %v3546_v40 = vld [vmem:[#allocation7 + $0x10] sm:$0xf]  ;;  %v4885_v41 = vld [vmem:[#allocation7 + $0x14] sm:$0xf0] }
  0x42   :  { %v3559_v39 = vor.u32 %v4886_v36, %v3556_v37  ;;  %v4884_v42 = vld [vmem:[#allocation7 + $0x14] sm:$0xf]  ;;  %v3547_v43 = vor.u32 %v4885_v41, %v3546_v40  ;;  %v3548_v44 = vld [vmem:[#allocation7 + $0x18] sm:$0xf0]  ;;  %v3538_v46 = vld [vmem:[#allocation7] sm:$0xf] }
  0x43   :  { %v3551_v45 = vor.u32 %v4884_v42, %v3548_v44  ;;  %v4883_v47 = vld [vmem:[#allocation7 + $0x4] sm:$0xf0]  ;;  %v4882_v48 = vld [vmem:[#allocation7 + $0x4] sm:$0xf]  ;;  %v3540_v50 = vld [vmem:[#allocation7 + $0x8] sm:$0xf0] }
  0x44   :  { %382 = vmatpush.bf16.msra.mxu1 %v3579_v20  ;;  %v3539_v49 = vor.u32 %v4883_v47, %v3538_v46  ;;  %v3543_v51 = vor.u32 %v4882_v48, %v3540_v50  ;;  %v5240_v52 = vld [vmem:[#allocation6] ss:$0 sm:$0xff]  ;;  %v294_v61 = vld [vmem:[#allocation9] sm:$0x3]  ;;  %v419_v62 = vmul.f32 8.0, %v5242_v60 }
  0x45   :  { %395 = vmatpush.bf16.msra.mxu2 %v3583_v21  ;;  %v296_v63 = vperm.slane %v294_v61, 0  ;;  %v297_v4 = vperm.slane %v294_v61, 1  ;;  %v3714_v7 = vld [vmem:[#allocation12 + $0xe0] sm:$0xf]  ;;  %v4928_v8 = vld [vmem:[#allocation12 + $0xec] sm:$0xf0] }
  0x46   :  { %v420_v1 = vsub.f32 1.0, %v419_v62  ;;  %v3842_v9 = vld [vmem:[#allocation12 + $0x1e0] sm:$0xf]  ;;  %v3715_v11 = vor.u32 %v4928_v8, %v3714_v7  ;;  %v4960_v12 = vld [vmem:[#allocation12 + $0x1ec] sm:$0xf0] }
  0x47   :  { %v4926_v13 = vld [vmem:[#allocation12 + $0xe4] sm:$0xf]  ;;  %v3716_v14 = vld [vmem:[#allocation12 + $0xf0] sm:$0xf0]  ;;  %v3843_v17 = vor.u32 %v4960_v12, %v3842_v9  ;;  %v3826_v29 = vld [vmem:[#allocation12 + $0x1c0] sm:$0xf] }
  0x48   :  { %383 = vmatpush.bf16.msra.mxu1 %v3571_v26  ;;  %v421_v5 = vmul.f32 %v5242_v60, %v420_v1  ;;  %v3719_v18 = vor.u32 %v4926_v13, %v3716_v14  ;;  %v4958_v19 = vld [vmem:[#allocation12 + $0x1e4] sm:$0xf]  ;;  %v3844_v20 = vld [vmem:[#allocation12 + $0x1f0] sm:$0xf0]  ;;  %900 = vmatpush.bf16.msra.mxu3 %v3715_v11  ;;  %v3698_v26 = vld [vmem:[#allocation12 + $0xc0] sm:$0xf] }
  0x49   :  { %396 = vmatpush.bf16.msra.mxu2 %v3575_v27  ;;  %v3847_v23 = vor.u32 %v4958_v19, %v3844_v20  ;;  %913 = vmatpush.bf16.msrb.mxu0 %v3843_v17  ;;  %v4924_v27 = vld [vmem:[#allocation12 + $0xcc] sm:$0xf0]  ;;  %v4922_v31 = vld [vmem:[#allocation12 + $0xc4] sm:$0xf]  ;;  %v3700_v35 = vld [vmem:[#allocation12 + $0xd0] sm:$0xf0] }
  0x4a   :  { %v422_v21 = vadd.f32 %v5242_v60, %v421_v5  ;;  %v3699_v28 = vor.u32 %v4924_v27, %v3698_v26  ;;  %v4956_v30 = vld [vmem:[#allocation12 + $0x1cc] sm:$0xf0]  ;;  %v4954_v36 = vld [vmem:[#allocation12 + $0x1c4] sm:$0xf]  ;;  %v3810_v47 = vld [vmem:[#allocation12 + $0x1a0] sm:$0xf] }
  0x4b   :  { %v3827_v34 = vor.u32 %v4956_v30, %v3826_v29  ;;  %v4920_v44 = vld [vmem:[#allocation12 + $0xac] sm:$0xf0]  ;;  %v4914_v1 = vld [vmem:[#allocation12 + $0x84] sm:$0xf]  ;;  %v3796_v8 = vld [vmem:[#allocation12 + $0x190] sm:$0xf0] }
  0x4c   :  { %384 = vmatpush.bf16.msra.mxu1 %v3563_v32  ;;  %v5747_v37 = vsel %vm423_vm2, %v5242_v60, %v422_v21  ;;  %901 = vmatpush.bf16.msra.mxu3 %v3699_v28  ;;  %v4952_v48 = vld [vmem:[#allocation12 + $0x1ac] sm:$0xf0]  ;;  %v3666_v60 = vld [vmem:[#allocation12 + $0x80] sm:$0xf]  ;;  %v4946_v7 = vld [vmem:[#allocation12 + $0x184] sm:$0xf] }
  0x4d   :  { %397 = vmatpush.bf16.msra.mxu2 %v3567_v33  ;;  %914 = vmatpush.bf16.msrb.mxu0 %v3827_v34  ;;  %v4916_v61 = vld [vmem:[#allocation12 + $0x8c] sm:$0xf0]  ;;  %v3650_v13 = vld [vmem:[#allocation12 + $0x60] sm:$0xf]  ;;  %v4910_v19 = vld [vmem:[#allocation12 + $0x64] sm:$0xf] }
  0x4e   :  { %v3667_v62 = vor.u32 %v4916_v61, %v3666_v60  ;;  %v4912_v14 = vld [vmem:[#allocation12 + $0x6c] sm:$0xf0]  ;;  %v3778_v17 = vld [vmem:[#allocation12 + $0x160] sm:$0xf]  ;;  %v3748_v60 = vld [vmem:[#allocation12 + $0x130] sm:$0xf0] }
  0x4f   :  { %v3634_v30 = vld [vmem:[#allocation12 + $0x40] sm:$0xf]  ;;  %v4940_v34 = vld [vmem:[#allocation12 + $0x14c] sm:$0xf0] }
  0x50   :  { %385 = vmatpush.bf16.msra.mxu1 %v3555_v38  ;;  %v3703_v38 = vor.u32 %v4922_v31, %v3700_v35  ;;  %v4908_v31 = vld [vmem:[#allocation12 + $0x4c] sm:$0xf0]  ;;  %v4906_v35 = vld [vmem:[#allocation12 + $0x44] sm:$0xf] }
  0x51   :  { %398 = vmatpush.bf16.msra.mxu2 %v3559_v39  ;;  %v3828_v39 = vld [vmem:[#allocation12 + $0x1d0] sm:$0xf0] }
  0x52   :  { %v3831_v42 = vor.u32 %v4954_v36, %v3828_v39 }
  0x54   :  { %386 = vmatpush.bf16.msra.mxu1 %v3547_v43  ;;  %v3682_v43 = vld [vmem:[#allocation12 + $0xa0] sm:$0xf] }
  0x55   :  { %399 = vmatpush.bf16.msra.mxu2 %v3551_v45  ;;  %v3683_v46 = vor.u32 %v4920_v44, %v3682_v43  ;;  %v3764_v43 = vld [vmem:[#allocation12 + $0x150] sm:$0xf0] }
  0x57   :  { %902 = vmatpush.bf16.msra.mxu3 %v3683_v46 }
  0x58   :  { %387 = vmatpush.bf16.msra.mxu1 %v3539_v49  ;;  %v4918_v49 = vld [vmem:[#allocation12 + $0xa4] sm:$0xf] }
  0x59   :  { %400 = vmatpush.bf16.msra.mxu2 %v3543_v51 }
  0x5b   :  { %903 = vmatpush.bf16.msra.mxu3 %v3667_v62 }
  0x5c   :  { %926 = vmatpush.bf16.msrb.mxu1 %v3719_v18  ;;  %v4944_v18 = vld [vmem:[#allocation12 + $0x16c] sm:$0xf0] }
  0x5d   :  { %939 = vmatpush.bf16.msrb.mxu2 %v3847_v23  ;;  %v3652_v23 = vld [vmem:[#allocation12 + $0x70] sm:$0xf0] }
  0x5e   :  { %v3655_v26 = vor.u32 %v4910_v19, %v3652_v23 }
  0x60   :  { %927 = vmatpush.bf16.msrb.mxu1 %v3703_v38 }
  0x61   :  { %940 = vmatpush.bf16.msrb.mxu2 %v3831_v42 }
  0xbd   :  { %v270_v53 = vpop.f32.mrf.mxu0 }
  0xbe   :  { %v271_v54 = vadd.f32 %v5240_v52, %v270_v53  ;;  %v3811_v52 = vor.u32 %v4952_v48, %v3810_v47  ;;  %v3684_v53 = vld [vmem:[#allocation12 + $0xb0] sm:$0xf0]  ;;  %v3618_v47 = vld [vmem:[#allocation12 + $0x20] sm:$0xf]  ;;  %v4904_v48 = vld [vmem:[#allocation12 + $0x2c] sm:$0xf0] }
  0xc0   :  { %v275_v55 = vmul.f32 0.2, %v271_v54  ;;  %vm274_vm1 = vcmp.gt.f32.partialorder %v271_v54, 0.0  ;;  %915 = vmatpush.bf16.msrb.mxu0 %v3811_v52  ;;  %v4936_v52 = vld [vmem:[#allocation12 + $0x12c] sm:$0xf0] }
  0xc2   :  { %v276_v56 = vsel %vm274_vm1, %v271_v54, %v275_v55  ;;  %v4950_v54 = vld [vmem:[#allocation12 + $0x1a4] sm:$0xf]  ;;  %v3812_v55 = vld [vmem:[#allocation12 + $0x1b0] sm:$0xf0] }
  0xc3   :  { %v277_v57 = vpack.c.bf16 %v276_v56, %v276_v56  ;;  %v3687_v56 = vor.u32 %v4918_v49, %v3684_v53  ;;  %v3619_v49 = vor.u32 %v4904_v48, %v3618_v47  ;;  %v4902_v53 = vld [vmem:[#allocation12 + $0x24] sm:$0xf]  ;;  %v3818_v47 = vld [vmem:[#allocation12 + $0x1a8] sm:$0xf] }
  0xc5   :  { %v272_v58 = vpop.f32.mrf.mxu0  ;;  %388 = vmatmul.bf16.vlgmr.msra.gmra.mxu1 %v277_v57  ;;  %401 = vmatmul.bf16.vlgmr.msra.gmra.mxu2 %v277_v57  ;;  %v3815_v57 = vor.u32 %v4950_v54, %v3812_v55 }
  0xc6   :  { %928 = vmatpush.bf16.msrb.mxu1 %v3687_v56 }
  0xc7   :  { %941 = vmatpush.bf16.msrb.mxu2 %v3815_v57  ;;  %v3620_v57 = vld [vmem:[#allocation12 + $0x30] sm:$0xf0] }
 0x142   :  { %v389_v0 = vpop.f32.mrf.mxu1 }
 0x143   :  { %v5738_v2 = vadd.f32 %v389_v0, %v296_v63  ;;  %v3794_v63 = vld [vmem:[#allocation12 + $0x180] sm:$0xf]  ;;  %v4948_v0 = vld [vmem:[#allocation12 + $0x18c] sm:$0xf0] }
 0x144   :  { %v3795_v5 = vor.u32 %v4948_v0, %v3794_v63  ;;  %v3602_v0 = vld [vmem:[#allocation12] sm:$0xf] }
 0x145   :  { %v406_v3 = vrot.slane %v5738_v2, 4 }
 0x146   :  { %916 = vmatpush.bf16.msrb.mxu0 %v3795_v5  ;;  %v4932_v5 = vld [vmem:[#allocation12 + $0x10c] sm:$0xf0] }
 0x147   :  { %v407_v6 = vadd.f32 %v406_v3, %v5738_v2 }
 0x148   :  { %v402_v10 = vpop.f32.mrf.mxu2 }
 0x149   :  { %v408_v15 = vrot.slane %v407_v6, 2  ;;  %v5742_v16 = vadd.f32 %v402_v10, %v297_v4  ;;  %v3799_v10 = vor.u32 %v4946_v7, %v3796_v8  ;;  %v3604_v7 = vld [vmem:[#allocation12 + $0x10] sm:$0xf0] }
 0x14a   :  { %v391_v22 = vpop.f32.mrf.mxu1 }
 0x14b   :  { %v409_v24 = vadd.f32 %v408_v15, %v407_v6  ;;  %v412_v25 = vrot.slane %v5742_v16, 4  ;;  %v3668_v6 = vld [vmem:[#allocation12 + $0x90] sm:$0xf0]  ;;  %v3651_v15 = vor.u32 %v4912_v14, %v3650_v13  ;;  %942 = vmatpush.bf16.msrb.mxu2 %v3799_v10  ;;  %v3779_v22 = vor.u32 %v4944_v18, %v3778_v17  ;;  %v4930_v13 = vld [vmem:[#allocation12 + $0x104] sm:$0xf] }
 0x14c   :  { %v3671_v9 = vor.u32 %v4914_v1, %v3668_v6  ;;  %v4900_v1 = vld [vmem:[#allocation12 + $0xc] sm:$0xf0]  ;;  %v4898_v6 = vld [vmem:[#allocation12 + $0x4] sm:$0xf]  ;;  %v3732_v14 = vld [vmem:[#allocation12 + $0x110] sm:$0xf0] }
 0x14d   :  { %v410_v32 = vrot.slane %v409_v24, 1  ;;  %v413_v33 = vadd.f32 %v412_v25, %v5742_v16  ;;  %v3780_v25 = vld [vmem:[#allocation12 + $0x170] sm:$0xf0]  ;;  %904 = vmatpush.bf16.msra.mxu3 %v3651_v15  ;;  %917 = vmatpush.bf16.msrb.mxu0 %v3779_v22  ;;  %v3722_v15 = vld [vmem:[#allocation12 + $0xe8] sm:$0xf]  ;;  %v3735_v19 = vor.u32 %v4930_v13, %v3732_v14 }
 0x14e   :  { %929 = vmatpush.bf16.msrb.mxu1 %v3671_v9  ;;  %v4929_v17 = vld [vmem:[#allocation12 + $0xf4] sm:$0xf0]  ;;  %v4927_v22 = vld [vmem:[#allocation12 + $0xec] sm:$0xf] }
 0x14f   :  { %v411_v40 = vadd.f32 %v410_v32, %v409_v24  ;;  %v414_v41 = vrot.slane %v413_v33, 2  ;;  %v4942_v24 = vld [vmem:[#allocation12 + $0x164] sm:$0xf]  ;;  %v3635_v32 = vor.u32 %v4908_v31, %v3634_v30  ;;  %v3723_v23 = vor.u32 %v4929_v17, %v3722_v15  ;;  %v3706_v31 = vld [vmem:[#allocation12 + $0xc8] sm:$0xf] }
 0x150   :  { %v404_v45 = vpop.f32.mrf.mxu2  ;;  %v3783_v27 = vor.u32 %v4942_v24, %v3780_v25  ;;  %v3724_v25 = vld [vmem:[#allocation12 + $0xf8] sm:$0xf0]  ;;  %v3658_v15 = vld [vmem:[#allocation12 + $0x68] sm:$0xf]  ;;  %v4913_v17 = vld [vmem:[#allocation12 + $0x74] sm:$0xf0] }
 0x151   :  { %v5750_v50 = vmul.f32 %v5747_v37, %v411_v40  ;;  %v415_v51 = vadd.f32 %v414_v41, %v413_v33  ;;  %v3762_v33 = vld [vmem:[#allocation12 + $0x140] sm:$0xf]  ;;  %v3636_v40 = vld [vmem:[#allocation12 + $0x50] sm:$0xf0]  ;;  %v4938_v41 = vld [vmem:[#allocation12 + $0x144] sm:$0xf]  ;;  %905 = vmatpush.bf16.msra.mxu3 %v3635_v32 }
 0x152   :  { %930 = vmatpush.bf16.msrb.mxu1 %v3655_v26  ;;  %943 = vmatpush.bf16.msrb.mxu2 %v3783_v27  ;;  %v3763_v39 = vor.u32 %v4940_v34, %v3762_v33  ;;  %v3639_v42 = vor.u32 %v4906_v35, %v3636_v40  ;;  %v3767_v46 = vor.u32 %v4938_v41, %v3764_v43  ;;  %v4959_v26 = vld [vmem:[#allocation12 + $0x1ec] sm:$0xf]  ;;  %v3852_v27 = vld [vmem:[#allocation12 + $0x1f8] sm:$0xf0]  ;;  %v4925_v32 = vld [vmem:[#allocation12 + $0xd4] sm:$0xf0] }
 0x153   :  { %v427_v58 = vsub.f32 %v5738_v2, %v5750_v50  ;;  %v416_v59 = vrot.slane %v415_v51, 1  ;;  %v3855_v30 = vor.u32 %v4959_v26, %v3852_v27  ;;  %v3834_v33 = vld [vmem:[#allocation12 + $0x1c8] sm:$0xf]  ;;  %v3707_v34 = vor.u32 %v4925_v32, %v3706_v31  ;;  %v4957_v35 = vld [vmem:[#allocation12 + $0x1d4] sm:$0xf0] }
 0x154   :  { %918 = vmatpush.bf16.msrb.mxu0 %v3763_v39  ;;  %v3835_v40 = vor.u32 %v4957_v35, %v3834_v33  ;;  %v3836_v43 = vld [vmem:[#allocation12 + $0x1d8] sm:$0xf0]  ;;  %v3642_v31 = vld [vmem:[#allocation12 + $0x48] sm:$0xf]  ;;  %v4909_v32 = vld [vmem:[#allocation12 + $0x54] sm:$0xf0] }
 0x155   :  { %v429_v3 = vmul.f32 %v427_v58, %v427_v58  ;;  %v417_v4 = vadd.f32 %v416_v59, %v415_v51  ;;  %v3746_v51 = vld [vmem:[#allocation12 + $0x120] sm:$0xf]  ;;  %v4934_v58 = vld [vmem:[#allocation12 + $0x124] sm:$0xf]  ;;  %906 = vmatpush.bf16.msra.mxu3 %v3619_v49  ;;  %v3623_v59 = vor.u32 %v4902_v53, %v3620_v57  ;;  %v4953_v49 = vld [vmem:[#allocation12 + $0x1b4] sm:$0xf0] }
 0x156   :  { %931 = vmatpush.bf16.msrb.mxu1 %v3639_v42  ;;  %944 = vmatpush.bf16.msrb.mxu2 %v3767_v46  ;;  %v3747_v56 = vor.u32 %v4936_v52, %v3746_v51  ;;  %v3751_v63 = vor.u32 %v4934_v58, %v3748_v60  ;;  %v4955_v42 = vld [vmem:[#allocation12 + $0x1cc] sm:$0xf]  ;;  %v4921_v46 = vld [vmem:[#allocation12 + $0xb4] sm:$0xf0]  ;;  %v3692_v52 = vld [vmem:[#allocation12 + $0xb8] sm:$0xf0] }
 0x157   :  { %v431_v11 = vrot.slane %v429_v3, 4  ;;  %v5755_v12 = vmul.f32 %v5747_v37, %v417_v4  ;;  %v3603_v4 = vor.u32 %v4900_v1, %v3602_v0  ;;  %v4919_v51 = vld [vmem:[#allocation12 + $0xac] sm:$0xf]  ;;  %v3820_v57 = vld [vmem:[#allocation12 + $0x1b8] sm:$0xf0] }
 0x158   :  { %919 = vmatpush.bf16.msrb.mxu0 %v3747_v56  ;;  %v4951_v56 = vld [vmem:[#allocation12 + $0x1ac] sm:$0xf]  ;;  %v3695_v58 = vor.u32 %v4919_v51, %v3692_v52  ;;  %v3674_v60 = vld [vmem:[#allocation12 + $0x88] sm:$0xf]  ;;  %v4949_v0 = vld [vmem:[#allocation12 + $0x194] sm:$0xf0] }
 0x159   :  { %v432_v20 = vadd.f32 %v431_v11, %v429_v3  ;;  %v428_v21 = vsub.f32 %v5742_v16, %v5755_v12  ;;  %v3730_v3 = vld [vmem:[#allocation12 + $0x100] sm:$0xf]  ;;  %v3607_v11 = vor.u32 %v4898_v6, %v3604_v7  ;;  %907 = vmatpush.bf16.msra.mxu3 %v3603_v4  ;;  %v4915_v1 = vld [vmem:[#allocation12 + $0x8c] sm:$0xf]  ;;  %v3788_v26 = vld [vmem:[#allocation12 + $0x178] sm:$0xf0] }
 0x15a   :  { %932 = vmatpush.bf16.msrb.mxu1 %v3623_v59  ;;  %945 = vmatpush.bf16.msrb.mxu2 %v3751_v63  ;;  %v3731_v10 = vor.u32 %v4932_v5, %v3730_v3  ;;  %v3823_v59 = vor.u32 %v4951_v56, %v3820_v57  ;;  %v3802_v63 = vld [vmem:[#allocation12 + $0x188] sm:$0xf]  ;;  %v3676_v3 = vld [vmem:[#allocation12 + $0x98] sm:$0xf0]  ;;  %v4947_v4 = vld [vmem:[#allocation12 + $0x18c] sm:$0xf] }
 0x15b   :  { %v433_v28 = vrot.slane %v432_v20, 2  ;;  %v430_v29 = vmul.f32 %v428_v21, %v428_v21  ;;  %v4961_v21 = vld [vmem:[#allocation12 + $0x1f4] sm:$0xf0]  ;;  %v3804_v5 = vld [vmem:[#allocation12 + $0x198] sm:$0xf0]  ;;  %v3803_v7 = vor.u32 %v4949_v0, %v3802_v63 }
 0x15c   :  { %920 = vmatpush.bf16.msrb.mxu0 %v3731_v10  ;;  %v3679_v10 = vor.u32 %v4915_v1, %v3676_v3  ;;  %v3770_v33 = vld [vmem:[#allocation12 + $0x148] sm:$0xf]  ;;  %v4907_v35 = vld [vmem:[#allocation12 + $0x4c] sm:$0xf]  ;;  %v3756_v57 = vld [vmem:[#allocation12 + $0x138] sm:$0xf0] }
 0x15d   :  { %v434_v36 = vadd.f32 %v433_v28, %v432_v20  ;;  %v437_v38 = vrot.slane %v430_v29, 4  ;;  %v3850_v20 = vld [vmem:[#allocation12 + $0x1e8] sm:$0xf]  ;;  %952 = vmatpush.bf16.msrb.mxu3 %v3723_v23  ;;  %v4935_v56 = vld [vmem:[#allocation12 + $0x12c] sm:$0xf] }
 0x15e   :  { %933 = vmatpush.bf16.msrb.mxu1 %v3607_v11  ;;  %v3851_v24 = vor.u32 %v4961_v21, %v3850_v20  ;;  %946 = vmatpush.bf16.msrb.mxu2 %v3735_v19  ;;  %v3807_v11 = vor.u32 %v4947_v4, %v3804_v5  ;;  %v3659_v19 = vor.u32 %v4913_v17, %v3658_v15  ;;  %v3786_v20 = vld [vmem:[#allocation12 + $0x168] sm:$0xf]  ;;  %v4945_v21 = vld [vmem:[#allocation12 + $0x174] sm:$0xf0] }
 0x15f   :  { %v435_v44 = vrot.slane %v434_v36, 1  ;;  %v438_v45 = vadd.f32 %v437_v38, %v430_v29  ;;  %v3727_v29 = vor.u32 %v4927_v22, %v3724_v25  ;;  %v3708_v38 = vld [vmem:[#allocation12 + $0xd8] sm:$0xf0]  ;;  %v4911_v22 = vld [vmem:[#allocation12 + $0x6c] sm:$0xf]  ;;  %v3787_v23 = vor.u32 %v4945_v21, %v3786_v20 }
 0x160   :  { %965 = vmatpush.bf16.msra.mxu0 %v3851_v24  ;;  %v3660_v24 = vld [vmem:[#allocation12 + $0x78] sm:$0xf0]  ;;  %v4943_v25 = vld [vmem:[#allocation12 + $0x16c] sm:$0xf]  ;;  %v3754_v52 = vld [vmem:[#allocation12 + $0x128] sm:$0xf]  ;;  %v3759_v1 = vor.u32 %v4935_v56, %v3756_v57 }
 0x161   :  { %v436_v54 = vadd.f32 %v435_v44, %v434_v36  ;;  %v439_v55 = vrot.slane %v438_v45, 2  ;;  %v4923_v36 = vld [vmem:[#allocation12 + $0xcc] sm:$0xf]  ;;  %v3839_v44 = vor.u32 %v4955_v42, %v3836_v43  ;;  %953 = vmatpush.bf16.msrb.mxu3 %v3707_v34  ;;  %v4941_v34 = vld [vmem:[#allocation12 + $0x154] sm:$0xf0] }
 0x162   :  { %978 = vmatpush.bf16.msra.mxu1 %v3727_v29  ;;  %991 = vmatpush.bf16.msra.mxu2 %v3855_v30  ;;  %v3711_v41 = vor.u32 %v4923_v36, %v3708_v38  ;;  %v3663_v29 = vor.u32 %v4911_v22, %v3660_v24  ;;  %v3791_v30 = vor.u32 %v4943_v25, %v3788_v26  ;;  %v3644_v42 = vld [vmem:[#allocation12 + $0x58] sm:$0xf0]  ;;  %v4939_v43 = vld [vmem:[#allocation12 + $0x14c] sm:$0xf]  ;;  %v4901_v3 = vld [vmem:[#allocation12 + $0x14] sm:$0xf0] }
 0x163   :  { %v443_v61 = vmul.f32 %v436_v54, %v5747_v37  ;;  %v440_v62 = vadd.f32 %v439_v55, %v438_v45  ;;  %v3690_v45 = vld [vmem:[#allocation12 + $0xa8] sm:$0xf]  ;;  %v3819_v55 = vor.u32 %v4953_v49, %v3818_v47  ;;  %v4933_v5 = vld [vmem:[#allocation12 + $0x114] sm:$0xf0]  ;;  %v475_v21 = vld [vmem:[#allocation10] sm:$0x3] }
 0x164   :  { %966 = vmatpush.bf16.msra.mxu0 %v3835_v40  ;;  %v3691_v54 = vor.u32 %v4921_v46, %v3690_v45  ;;  %v3643_v40 = vor.u32 %v4909_v32, %v3642_v31  ;;  %v3626_v45 = vld [vmem:[#allocation12 + $0x28] sm:$0xf]  ;;  %v4905_v46 = vld [vmem:[#allocation12 + $0x34] sm:$0xf0] }
 0x165   :  { %v5760_v8 = vadd.f32 0.8, %v443_v61  ;;  %v441_v9 = vrot.slane %v440_v62, 1  ;;  %v4917_v61 = vld [vmem:[#allocation12 + $0x94] sm:$0xf0] }
 0x166   :  { %979 = vmatpush.bf16.msra.mxu1 %v3711_v41  ;;  %992 = vmatpush.bf16.msra.mxu2 %v3839_v44  ;;  %v3675_v6 = vor.u32 %v4917_v61, %v3674_v60  ;;  %v3771_v41 = vor.u32 %v4941_v34, %v3770_v33  ;;  %v3772_v44 = vld [vmem:[#allocation12 + $0x158] sm:$0xf0]  ;;  %v3627_v60 = vor.u32 %v4905_v46, %v3626_v45  ;;  %v3738_v4 = vld [vmem:[#allocation12 + $0x108] sm:$0xf] }
 0x167   :  { %5243 = vrsqrt.f32 %v5760_v8  ;;  %v442_v18 = vadd.f32 %v441_v9, %v440_v62  ;;  %954 = vmatpush.bf16.msrb.mxu3 %v3691_v54  ;;  %v3775_v51 = vor.u32 %v4939_v43, %v3772_v44  ;;  %v4903_v54 = vld [vmem:[#allocation12 + $0x2c] sm:$0xf]  ;;  %vm454_vm8 = vweird.f32 %v5760_v8 }
 0x168   :  { %967 = vmatpush.bf16.msra.mxu0 %v3819_v55  ;;  %v3628_v55 = vld [vmem:[#allocation12 + $0x38] sm:$0xf0]  ;;  %v3739_v15 = vor.u32 %v4933_v5, %v3738_v4 }
 0x169   :  { %v444_v28 = vmul.f32 %v442_v18, %v5747_v37  ;;  %v3631_v0 = vor.u32 %v4903_v54, %v3628_v55  ;;  %v5022_v54 = vld [vmem:[#allocation18 + $0x1dc] sm:$0xf0] }
 0x16a   :  { %980 = vmatpush.bf16.msra.mxu1 %v3695_v58  ;;  %993 = vmatpush.bf16.msra.mxu2 %v3823_v59  ;;  %v445_v58 = vld [vmem:[%s6235_s5] sm:$0x3]  ;;  %v4338_v55 = vld [vmem:[#allocation18 + $0x3c0] sm:$0xf] }
 0x16b   :  { %v5764_v39 = vadd.f32 0.8, %v444_v28  ;;  %955 = vmatpush.bf16.msrb.mxu3 %v3675_v6  ;;  %v4899_v6 = vld [vmem:[#allocation12 + $0xc] sm:$0xf] }
 0x16c   :  { %968 = vmatpush.bf16.msra.mxu0 %v3803_v7  ;;  %v3612_v7 = vld [vmem:[#allocation12 + $0x18] sm:$0xf0] }
 0x16d   :  { %v5766_v48 = vpop.eup %5243  ;;  %5245 = vrsqrt.f32 %v5764_v39  ;;  %vm464_vm4 = vweird.f32 %v5764_v39  ;;  %v3615_v17 = vor.u32 %v4899_v6, %v3612_v7 }
 0x16e   :  { %v449_v53 = vmul.f32 %v5766_v48, %v5760_v8  ;;  %981 = vmatpush.bf16.msra.mxu1 %v3679_v10  ;;  %994 = vmatpush.bf16.msra.mxu2 %v3807_v11  ;;  %vm455_vm7 = vweird.f32 %v5766_v48  ;;  %v4931_v10 = vld [vmem:[#allocation12 + $0x10c] sm:$0xf]  ;;  %v3740_v11 = vld [vmem:[#allocation12 + $0x118] sm:$0xf0] }
 0x16f   :  { %956 = vmatpush.bf16.msrb.mxu3 %v3659_v19  ;;  %vm456_vm9 = vmor %vm454_vm8, %vm455_vm7  ;;  %v3743_v20 = vor.u32 %v4931_v10, %v3740_v11  ;;  %v5014_v10 = vld [vmem:[#allocation18 + $0x19c] sm:$0xf0] }
 0x170   :  { %v450_v62 = vmul.f32 %v5766_v48, %v449_v53  ;;  %969 = vmatpush.bf16.msra.mxu0 %v3787_v23  ;;  %v4937_v53 = vld [vmem:[#allocation12 + $0x134] sm:$0xf0]  ;;  %v4306_v11 = vld [vmem:[#allocation18 + $0x380] sm:$0xf] }
 0x171   :  { %v3755_v61 = vor.u32 %v4937_v53, %v3754_v52  ;;  %v4082_v53 = vld [vmem:[#allocation18 + $0x1c0] sm:$0xf] }
 0x172   :  { %v451_v13 = vmul.f32 0.5, %v450_v62  ;;  %982 = vmatpush.bf16.msra.mxu1 %v3663_v29  ;;  %995 = vmatpush.bf16.msra.mxu2 %v3791_v30  ;;  %v3610_v62 = vld [vmem:[#allocation12 + $0x8] sm:$0xf]  ;;  %v4083_v57 = vor.u32 %v5022_v54, %v4082_v53  ;;  %v4998_v53 = vld [vmem:[#allocation18 + $0x11c] sm:$0xf0] }
 0x173   :  { %v5772_v9 = vpop.eup %5245  ;;  %957 = vmatpush.bf16.msrb.mxu3 %v3643_v40  ;;  %v4242_v54 = vld [vmem:[#allocation18 + $0x300] sm:$0xf] }
 0x174   :  { %v459_v14 = vmul.f32 %v5772_v9, %v5764_v39  ;;  %vm465_vm3 = vweird.f32 %v5772_v9  ;;  %v452_v27 = vsub.f32 1.5, %v451_v13  ;;  %v3647_v39 = vor.u32 %v4907_v35, %v3644_v42  ;;  %970 = vmatpush.bf16.msra.mxu0 %v3771_v41 }
 0x175   :  { %vm5781_vm5 = vmor %vm464_vm4, %vm465_vm3 }
 0x176   :  { %v460_v18 = vmul.f32 %v5772_v9, %v459_v14  ;;  %v453_v47 = vmul.f32 %v5766_v48, %v452_v27  ;;  %983 = vmatpush.bf16.msra.mxu1 %v3647_v39  ;;  %996 = vmatpush.bf16.msra.mxu2 %v3775_v51  ;;  %v3611_v14 = vor.u32 %v4901_v3, %v3610_v62  ;;  %v5214_v3 = vld [vmem:[#allocation18 + $0x7dc] sm:$0xf0] }
 0x177   :  { %958 = vmatpush.bf16.msrb.mxu3 %v3627_v60  ;;  %v5150_v60 = vld [vmem:[#allocation18 + $0x5dc] sm:$0xf0] }
 0x178   :  { %v461_v28 = vmul.f32 0.5, %v460_v18  ;;  %v457_v8 = vsel %vm456_vm9, %v5766_v48, %v453_v47  ;;  %971 = vmatpush.bf16.msra.mxu0 %v3755_v61  ;;  %vm1121_vm9 = vcmask 1042434  }
 0x17a   :  { %v462_v36 = vsub.f32 1.5, %v461_v28  ;;  %984 = vmatpush.bf16.msra.mxu1 %v3631_v0  ;;  %997 = vmatpush.bf16.msra.mxu2 %v3759_v1  ;;  %v4850_v1 = vld [vmem:[#allocation18 + $0x7c0] sm:$0xf] }
 0x17b   :  { %959 = vmatpush.bf16.msrb.mxu3 %v3611_v14  ;;  %v4851_v5 = vor.u32 %v5214_v3, %v4850_v1  ;;  %v4754_v3 = vld [vmem:[#allocation18 + $0x700] sm:$0xf] }
 0x17c   :  { %v463_v49 = vmul.f32 %v5772_v9, %v462_v36  ;;  %972 = vmatpush.bf16.msra.mxu0 %v3739_v15 }
 0x17e   :  { %v467_v59 = vsel %vm5781_vm5, %v5772_v9, %v463_v49  ;;  %985 = vmatpush.bf16.msra.mxu1 %v3615_v17  ;;  %998 = vmatpush.bf16.msra.mxu2 %v3743_v20  ;;  %v5078_v17 = vld [vmem:[#allocation18 + $0x39c] sm:$0xf0] }
 0x17f   :  { %v470_v63 = vrot.slane %v467_v59, 7  ;;  %v4594_v59 = vld [vmem:[#allocation18 + $0x5c0] sm:$0xf] }
 0x180   :  { %v4595_v0 = vor.u32 %v5150_v60, %v4594_v59  ;;  %v5062_v59 = vld [vmem:[#allocation18 + $0x31c] sm:$0xf0] }
 0x181   :  { %v472_v9 = vsel %vm471_vm6, %v457_v8, %v470_v63  ;;  %v4498_v60 = vld [vmem:[#allocation18 + $0x500] sm:$0xf] }
 0x182   :  { %v474_v13 = vmul.f32 %v472_v9, %v445_v58  ;;  %v5086_v58 = vld [vmem:[#allocation18 + $0x3dc] sm:$0xf0] }
 0x183   :  { %v4339_v63 = vor.u32 %v5086_v58, %v4338_v55  ;;  %v4050_v9 = vld [vmem:[#allocation18 + $0x180] sm:$0xf] }
 0x184   :  { %v477_v18 = vperm.slane %v474_v13, 0  ;;  %v478_v19 = vperm.slane %v474_v13, 1  ;;  %v4051_v15 = vor.u32 %v5014_v10, %v4050_v9  ;;  %v3954_v10 = vld [vmem:[#allocation18 + $0xc0] sm:$0xf] }
 0x186   :  { %v482_v48 = vmul.f32 %v478_v19, %v5755_v12  ;;  %v481_v22 = vmul.f32 %v477_v18, %v5750_v50  ;;  %v490_v26 = vmul.f32 %v478_v19, %v5742_v16  ;;  %v489_v28 = vmul.f32 %v477_v18, %v5738_v2  ;;  %v5804_v2 = vld [vmem:[#allocation13] sm:$0xf]  ;;  %v4562_v18 = vld [vmem:[#allocation18 + $0x580] sm:$0xf] }
 0x187   :  { %v573_v38 = vperm.slane %v5804_v2, 1  ;;  %v572_v40 = vperm.slane %v5804_v2, 0  ;;  %v5142_v19 = vld [vmem:[#allocation18 + $0x59c] sm:$0xf0] }
 0x188   :  { %v485_v23 = vrot.slane %v482_v48, 7  ;;  %v575_v48 = vperm.slane %v5804_v2, 3 }
 0x18a   :  { %v486_v24 = vsel %vm471_vm6, %v481_v22, %v485_v23  ;;  %v4563_v22 = vor.u32 %v5142_v19, %v4562_v18  ;;  %v4818_v23 = vld [vmem:[#allocation18 + $0x780] sm:$0xf] }
 0x18b   :  { %v488_v25 = vsub.f32 %v475_v21, %v486_v24  ;;  %v4307_v21 = vor.u32 %v5078_v17, %v4306_v11  ;;  %v5206_v24 = vld [vmem:[#allocation18 + $0x79c] sm:$0xf0] }
 0x18c   :  { %v4990_v11 = vld [vmem:[#allocation18 + $0xdc] sm:$0xf0] }
 0x18d   :  { %v493_v27 = vperm.slane %v488_v25, 1  ;;  %v492_v29 = vperm.slane %v488_v25, 0  ;;  %v4210_v17 = vld [vmem:[#allocation18 + $0x2c0] sm:$0xf] }
 0x18e   :  { %v5054_v18 = vld [vmem:[#allocation18 + $0x2dc] sm:$0xf0] }
 0x18f   :  { %v497_v30 = vadd.f32 %v493_v27, %v490_v26  ;;  %v496_v31 = vadd.f32 %v492_v29, %v489_v28  ;;  %v574_v26 = vperm.slane %v5804_v2, 2  ;;  %v4819_v27 = vor.u32 %v5206_v24, %v4818_v23  ;;  %v4018_v29 = vld [vmem:[#allocation18 + $0x140] sm:$0xf] }
 0x190   :  { %v5118_v23 = vld [vmem:[#allocation18 + $0x4dc] sm:$0xf0] }
 0x191   :  { %vm498_vm10 = vcmp.gt.f32.partialorder %v496_v31, 0.0  ;;  %v500_v12 = vmul.f32 0.2, %v496_v31  ;;  %vm499_vm11 = vcmp.gt.f32.partialorder %v497_v30, 0.0  ;;  %v501_v32 = vmul.f32 0.2, %v497_v30 }
 0x193   :  { %v502_v33 = vsel %vm498_vm10, %v496_v31, %v500_v12  ;;  %v503_v34 = vsel %vm499_vm11, %v497_v30, %v501_v32  ;;  %v5006_v30 = vld [vmem:[#allocation18 + $0x15c] sm:$0xf0]  ;;  %vm1123_vm10 = vcmask 1041408  }
 0x194   :  { %v504_v50 = vpack.c.bf16 %v502_v33, %v502_v33  ;;  %v505_v35 = vpack.c.bf16 %v503_v34, %v503_v34  ;;  %v4274_v31 = vld [vmem:[#allocation18 + $0x340] sm:$0xf]  ;;  %v4019_v32 = vor.u32 %v5006_v30, %v4018_v29 }
 0x195   :  { %v5070_v33 = vld [vmem:[#allocation18 + $0x35c] sm:$0xf0] }
 0x196   :  { %908 = vmatmul.bf16.vlgmr.msra.gmra.mxu3 %v504_v50  ;;  %921 = vmatmul.bf16.vlgmr.msrb.gmra.mxu0 %v505_v35  ;;  %v4530_v34 = vld [vmem:[#allocation18 + $0x540] sm:$0xf]  ;;  %v4275_v2 = vor.u32 %v5070_v33, %v4274_v31 }
 0x197   :  { %934 = vmatmul.bf16.vlgmr.msrb.gmra.mxu1 %v504_v50  ;;  %947 = vmatmul.bf16.vlgmr.msrb.gmra.mxu2 %v505_v35  ;;  %v5182_v29 = vld [vmem:[#allocation18 + $0x6dc] sm:$0xf0] }
 0x198   :  { %2740 = vmatpush.bf16.msra.mxu3 %v4083_v57  ;;  %2753 = vmatpush.bf16.msrb.mxu0 %v4339_v63  ;;  %v4982_v33 = vld [vmem:[#allocation18 + $0x9c] sm:$0xf0] }
 0x199   :  { %2766 = vmatpush.bf16.msrb.mxu1 %v4595_v0  ;;  %2779 = vmatpush.bf16.msrb.mxu2 %v4851_v5  ;;  %v4243_v0 = vor.u32 %v5062_v59, %v4242_v54  ;;  %v4974_v59 = vld [vmem:[#allocation18 + $0x5c] sm:$0xf0] }
 0x19c   :  { %2741 = vmatpush.bf16.msra.mxu3 %v4051_v15  ;;  %2754 = vmatpush.bf16.msrb.mxu0 %v4307_v21  ;;  %v3955_v15 = vor.u32 %v4990_v11, %v3954_v10  ;;  %v4211_v21 = vor.u32 %v5054_v18, %v4210_v17  ;;  %v5166_v11 = vld [vmem:[#allocation18 + $0x65c] sm:$0xf0] }
 0x19d   :  { %2767 = vmatpush.bf16.msrb.mxu1 %v4563_v22  ;;  %2780 = vmatpush.bf16.msrb.mxu2 %v4819_v27  ;;  %v4466_v22 = vld [vmem:[#allocation18 + $0x4c0] sm:$0xf] }
 0x19e   :  { %v4467_v27 = vor.u32 %v5118_v23, %v4466_v22  ;;  %v3858_v17 = vld [vmem:[#allocation18] sm:$0xf] }
 0x19f   :  { %v4966_v18 = vld [vmem:[#allocation18 + $0x1c] sm:$0xf0] }
 0x1a0   :  { %2742 = vmatpush.bf16.msra.mxu3 %v4019_v32  ;;  %2755 = vmatpush.bf16.msrb.mxu0 %v4275_v2  ;;  %v3922_v32 = vld [vmem:[#allocation18 + $0x80] sm:$0xf] }
 0x1a1   :  { %v5046_v2 = vld [vmem:[#allocation18 + $0x29c] sm:$0xf0] }
 0x1a2   :  { %v5030_v22 = vld [vmem:[#allocation18 + $0x21c] sm:$0xf0] }
 0x1a3   :  { %v4370_v23 = vld [vmem:[#allocation18 + $0x400] sm:$0xf] }
 0x1a4   :  { %2756 = vmatpush.bf16.msrb.mxu0 %v4243_v0  ;;  %v5038_v0 = vld [vmem:[#allocation18 + $0x25c] sm:$0xf0] }
 0x1a6   :  { %960 = vmatmul.bf16.vlgmr.msrb.gmra.mxu3 %v504_v50  ;;  %973 = vmatmul.bf16.vlgmr.msra.gmra.mxu0 %v505_v35 }
 0x1a7   :  { %986 = vmatmul.bf16.vlgmr.msra.gmra.mxu1 %v504_v50  ;;  %999 = vmatmul.bf16.vlgmr.msra.gmra.mxu2 %v505_v35  ;;  %v5134_v50 = vld [vmem:[#allocation18 + $0x55c] sm:$0xf0] }
 0x1a8   :  { %2757 = vmatpush.bf16.msrb.mxu0 %v4211_v21  ;;  %v3859_v21 = vor.u32 %v4966_v18, %v3858_v17 }
 0x213   :  { %v922_v16 = vpop.f32.mrf.mxu0 }
 0x214   :  { %v935_v36 = vpop.f32.mrf.mxu1 }
 0x215   :  { %v936_v41 = vadd.f32 %v935_v36, %v573_v38  ;;  %v4531_v38 = vor.u32 %v5134_v50, %v4530_v34 }
 0x217   :  { %2768 = vmatpush.bf16.msrb.mxu1 %v4531_v38 }
 0x219   :  { %v909_v42 = vpop.f32.mrf.mxu3 }
 0x21a   :  { %v910_v43 = vadd.f32 %v909_v42, %v572_v40  ;;  %v948_v39 = vpop.f32.mrf.mxu2  ;;  %v4786_v40 = vld [vmem:[#allocation18 + $0x740] sm:$0xf] }
 0x21b   :  { %v5808_v44 = vadd.f32 %v948_v39, %v936_v41  ;;  %v924_v45 = vpop.f32.mrf.mxu0  ;;  %v5198_v41 = vld [vmem:[#allocation18 + $0x75c] sm:$0xf0] }
 0x21c   :  { %v5810_v46 = vadd.f32 %v922_v16, %v910_v43  ;;  %v937_v47 = vpop.f32.mrf.mxu1  ;;  %v4787_v45 = vor.u32 %v5198_v41, %v4786_v40 }
 0x21d   :  { %v1010_v49 = vrot.slane %v5808_v44, 4 }
 0x21e   :  { %v1004_v51 = vrot.slane %v5810_v46, 4  ;;  %2781 = vmatpush.bf16.msrb.mxu2 %v4787_v45 }
 0x21f   :  { %v1011_v52 = vadd.f32 %v1010_v49, %v5808_v44 }
 0x220   :  { %v1005_v56 = vadd.f32 %v1004_v51, %v5810_v46 }
 0x221   :  { %v1012_v61 = vrot.slane %v1011_v52, 2  ;;  %v911_v62 = vpop.f32.mrf.mxu3 }
 0x222   :  { %v1006_v4 = vrot.slane %v1005_v56, 2  ;;  %v950_v8 = vpop.f32.mrf.mxu2 }
 0x223   :  { %v1013_v6 = vadd.f32 %v1012_v61, %v1011_v52  ;;  %v974_v7 = vpop.f32.mrf.mxu0  ;;  %v3986_v52 = vld [vmem:[#allocation18 + $0x100] sm:$0xf] }
 0x224   :  { %v1007_v13 = vadd.f32 %v1006_v4, %v1005_v56  ;;  %v987_v14 = vpop.f32.mrf.mxu1  ;;  %v3987_v58 = vor.u32 %v4998_v53, %v3986_v52  ;;  %v5126_v61 = vld [vmem:[#allocation18 + $0x51c] sm:$0xf0] }
 0x225   :  { %v1014_v20 = vrot.slane %v1013_v6, 1  ;;  %v988_v16 = vadd.f32 %v987_v14, %v575_v48  ;;  %v4499_v1 = vor.u32 %v5126_v61, %v4498_v60  ;;  %v5190_v4 = vld [vmem:[#allocation18 + $0x71c] sm:$0xf0] }
 0x226   :  { %v1008_v25 = vrot.slane %v1007_v13, 1  ;;  %2743 = vmatpush.bf16.msra.mxu3 %v3987_v58  ;;  %v4690_v52 = vld [vmem:[#allocation18 + $0x680] sm:$0xf] }
 0x227   :  { %v1015_v28 = vadd.f32 %v1014_v20, %v1013_v6  ;;  %v4755_v6 = vor.u32 %v5190_v4, %v4754_v3  ;;  %2769 = vmatpush.bf16.msrb.mxu1 %v4499_v1  ;;  %v5174_v53 = vld [vmem:[#allocation18 + $0x69c] sm:$0xf0] }
 0x228   :  { %v1009_v12 = vadd.f32 %v1008_v25, %v1007_v13  ;;  %v3890_v58 = vld [vmem:[#allocation18 + $0x40] sm:$0xf] }
 0x229   :  { %v5819_v35 = vmul.f32 %v1015_v28, %v5747_v37  ;;  %v961_v36 = vpop.f32.mrf.mxu3  ;;  %2782 = vmatpush.bf16.msrb.mxu2 %v4755_v6  ;;  %v4722_v28 = vld [vmem:[#allocation18 + $0x6c0] sm:$0xf] }
 0x22a   :  { %v5822_v42 = vmul.f32 %v1009_v12, %v5747_v37  ;;  %v962_v43 = vadd.f32 %v961_v36, %v574_v26  ;;  %v1000_v39 = vpop.f32.mrf.mxu2  ;;  %2744 = vmatpush.bf16.msra.mxu3 %v3955_v15  ;;  %v4723_v12 = vor.u32 %v5182_v29, %v4722_v28  ;;  %v4178_v36 = vld [vmem:[#allocation18 + $0x280] sm:$0xf] }
 0x22b   :  { %v1033_v47 = vsub.f32 %v5808_v44, %v5819_v35  ;;  %v5826_v49 = vadd.f32 %v1000_v39, %v988_v16  ;;  %v976_v51 = vpop.f32.mrf.mxu0  ;;  %2770 = vmatpush.bf16.msrb.mxu1 %v4467_v27  ;;  %v3923_v16 = vor.u32 %v4982_v33, %v3922_v32  ;;  %v4179_v41 = vor.u32 %v5046_v2, %v4178_v36  ;;  %v5110_v39 = vld [vmem:[#allocation18 + $0x49c] sm:$0xf0]  ;;  %v5018_v33 = vld [vmem:[#allocation18 + $0x1c4] sm:$0xf] }
 0x22c   :  { %v1032_v55 = vsub.f32 %v5810_v46, %v5822_v42  ;;  %v5830_v56 = vadd.f32 %v974_v7, %v962_v43  ;;  %v989_v57 = vpop.f32.mrf.mxu1  ;;  %v4434_v43 = vld [vmem:[#allocation18 + $0x480] sm:$0xf]  ;;  %v5082_v36 = vld [vmem:[#allocation18 + $0x3c4] sm:$0xf] }
 0x22d   :  { %v1037_v62 = vmul.f32 %v1033_v47, %v1033_v47  ;;  %v1022_v63 = vrot.slane %v5826_v49, 4  ;;  %2783 = vmatpush.bf16.msrb.mxu2 %v4723_v12  ;;  %v4435_v51 = vor.u32 %v5110_v39, %v4434_v43  ;;  %2758 = vmatpush.bf16.msrb.mxu0 %v4179_v41  ;;  %v4691_v57 = vor.u32 %v5174_v53, %v4690_v52  ;;  %v4658_v6 = vld [vmem:[#allocation18 + $0x640] sm:$0xf]  ;;  %v4596_v39 = vld [vmem:[#allocation18 + $0x5e0] sm:$0xf0] }
 0x22e   :  { %v1036_v8 = vmul.f32 %v1032_v55, %v1032_v55  ;;  %v1016_v5 = vrot.slane %v5830_v56, 4  ;;  %2745 = vmatpush.bf16.msra.mxu3 %v3923_v16  ;;  %v4659_v15 = vor.u32 %v5166_v11, %v4658_v6  ;;  %v4626_v29 = vld [vmem:[#allocation18 + $0x600] sm:$0xf]  ;;  %v4820_v6 = vld [vmem:[#allocation18 + $0x7a0] sm:$0xf0] }
 0x22f   :  { %v1046_v7 = vrot.slane %v1037_v62, 4  ;;  %v1023_v9 = vadd.f32 %v1022_v63, %v5826_v49  ;;  %2771 = vmatpush.bf16.msrb.mxu1 %v4435_v51  ;;  %v4146_v63 = vld [vmem:[#allocation18 + $0x240] sm:$0xf] }
 0x230   :  { %v1040_v13 = vrot.slane %v1036_v8, 4  ;;  %v1017_v14 = vadd.f32 %v1016_v5, %v5830_v56  ;;  %v4147_v4 = vor.u32 %v5038_v0, %v4146_v63  ;;  %v5102_v5 = vld [vmem:[#allocation18 + $0x45c] sm:$0xf0]  ;;  %v5138_v63 = vld [vmem:[#allocation18 + $0x584] sm:$0xf] }
 0x231   :  { %v1047_v19 = vadd.f32 %v1046_v7, %v1037_v62  ;;  %v1024_v20 = vrot.slane %v1023_v9, 2  ;;  %v963_v48 = vpop.f32.mrf.mxu3  ;;  %v3891_v62 = vor.u32 %v4974_v59, %v3890_v58  ;;  %2784 = vmatpush.bf16.msrb.mxu2 %v4691_v57  ;;  %v5074_v59 = vld [vmem:[#allocation18 + $0x384] sm:$0xf] }
 0x232   :  { %v1041_v24 = vadd.f32 %v1040_v13, %v1036_v8  ;;  %v1018_v25 = vrot.slane %v1017_v14, 2  ;;  %v1002_v26 = vpop.f32.mrf.mxu2  ;;  %v4402_v8 = vld [vmem:[#allocation18 + $0x440] sm:$0xf]  ;;  %2759 = vmatpush.bf16.msrb.mxu0 %v4147_v4  ;;  %v4564_v0 = vld [vmem:[#allocation18 + $0x5a0] sm:$0xf0] }
 0x233   :  { %v1048_v30 = vrot.slane %v1047_v19, 2  ;;  %v1025_v31 = vadd.f32 %v1024_v20, %v1023_v9  ;;  %2746 = vmatpush.bf16.msra.mxu3 %v3891_v62  ;;  %v4403_v10 = vor.u32 %v5102_v5, %v4402_v8  ;;  %v4567_v8 = vor.u32 %v5138_v63, %v4564_v0  ;;  %v5202_v5 = vld [vmem:[#allocation18 + $0x784] sm:$0xf] }
 0x234   :  { %v1042_v34 = vrot.slane %v1041_v24, 2  ;;  %v1019_v50 = vadd.f32 %v1018_v25, %v1017_v14  ;;  %v4468_v63 = vld [vmem:[#allocation18 + $0x4e0] sm:$0xf0] }
 0x235   :  { %v1049_v38 = vadd.f32 %v1048_v30, %v1047_v19  ;;  %v1026_v40 = vrot.slane %v1025_v31, 1  ;;  %v4114_v19 = vld [vmem:[#allocation18 + $0x200] sm:$0xf]  ;;  %2772 = vmatpush.bf16.msrb.mxu1 %v4403_v10  ;;  %2785 = vmatpush.bf16.msrb.mxu2 %v4659_v15  ;;  %v5066_v15 = vld [vmem:[#allocation18 + $0x344] sm:$0xf] }
 0x236   :  { %v1043_v45 = vadd.f32 %v1042_v34, %v1041_v24  ;;  %v1020_v47 = vrot.slane %v1019_v50, 1  ;;  %v5094_v24 = vld [vmem:[#allocation18 + $0x41c] sm:$0xf0]  ;;  %v4115_v27 = vor.u32 %v5030_v22, %v4114_v19  ;;  %v4084_v34 = vld [vmem:[#allocation18 + $0x1e0] sm:$0xf0] }
 0x237   :  { %v1050_v54 = vrot.slane %v1049_v38, 1  ;;  %v1027_v55 = vadd.f32 %v1026_v40, %v1025_v31  ;;  %v4371_v28 = vor.u32 %v5094_v24, %v4370_v23  ;;  %v5158_v30 = vld [vmem:[#allocation18 + $0x61c] sm:$0xf0]  ;;  %2747 = vmatpush.bf16.msra.mxu3 %v3859_v21  ;;  %v4087_v16 = vor.u32 %v5018_v33, %v4084_v34  ;;  %v5146_v40 = vld [vmem:[#allocation18 + $0x5c4] sm:$0xf] }
 0x238   :  { %v1044_v60 = vrot.slane %v1043_v45, 1  ;;  %v1021_v61 = vadd.f32 %v1020_v47, %v1019_v50  ;;  %v4627_v32 = vor.u32 %v5158_v30, %v4626_v29  ;;  %2760 = vmatpush.bf16.msrb.mxu0 %v4115_v27  ;;  %v4852_v47 = vld [vmem:[#allocation18 + $0x7e0] sm:$0xf0]  ;;  %v4599_v52 = vor.u32 %v5146_v40, %v4596_v39 }
 0x239   :  { %v1051_v1 = vadd.f32 %v1050_v54, %v1049_v38  ;;  %v5837_v3 = vmul.f32 %v1027_v55, %v5747_v37  ;;  %2773 = vmatpush.bf16.msrb.mxu1 %v4371_v28  ;;  %v4340_v38 = vld [vmem:[#allocation18 + $0x3e0] sm:$0xf0] }
 0x23a   :  { %v1045_v7 = vadd.f32 %v1044_v60, %v1043_v45  ;;  %v5840_v9 = vmul.f32 %v1021_v61, %v5747_v37  ;;  %2786 = vmatpush.bf16.msrb.mxu2 %v4627_v32  ;;  %v4343_v43 = vor.u32 %v5082_v36, %v4340_v38  ;;  %v5210_v45 = vld [vmem:[#allocation18 + $0x7c4] sm:$0xf] }
 0x23b   :  { %v1065_v13 = vmul.f32 %v1051_v1, %v5747_v37  ;;  %v1035_v14 = vsub.f32 %v5826_v49, %v5837_v3  ;;  %2792 = vmatpush.bf16.msrb.mxu3 %v4087_v16  ;;  %v4855_v53 = vor.u32 %v5210_v45, %v4852_v47  ;;  %v5010_v54 = vld [vmem:[#allocation18 + $0x184] sm:$0xf] }
 0x23c   :  { %v1064_v20 = vmul.f32 %v1045_v7, %v5747_v37  ;;  %v1034_v48 = vsub.f32 %v5830_v56, %v5840_v9  ;;  %v4052_v55 = vld [vmem:[#allocation18 + $0x1a0] sm:$0xf0]  ;;  %2805 = vmatpush.bf16.msra.mxu0 %v4343_v43 }
 0x23d   :  { %v5848_v25 = vadd.f32 0.8, %v1065_v13  ;;  %v1039_v26 = vmul.f32 %v1035_v14, %v1035_v14  ;;  %v4055_v58 = vor.u32 %v5010_v54, %v4052_v55  ;;  %v4308_v60 = vld [vmem:[#allocation18 + $0x3a0] sm:$0xf0]  ;;  %2818 = vmatpush.bf16.msra.mxu1 %v4599_v52  ;;  %v4823_v13 = vor.u32 %v5202_v5, %v4820_v6 }
 0x23e   :  { %v5850_v31 = vadd.f32 0.8, %v1064_v20  ;;  %v1038_v12 = vmul.f32 %v1034_v48, %v1034_v48  ;;  %2831 = vmatpush.bf16.msra.mxu2 %v4855_v53  ;;  %v4311_v62 = vor.u32 %v5074_v59, %v4308_v60  ;;  %v5002_v7 = vld [vmem:[#allocation18 + $0x144] sm:$0xf] }
 0x23f   :  { %5247 = vrsqrt.f32 %v5848_v25  ;;  %v1058_v50 = vrot.slane %v1039_v26, 4  ;;  %2793 = vmatpush.bf16.msrb.mxu3 %v4055_v58  ;;  %v4020_v14 = vld [vmem:[#allocation18 + $0x160] sm:$0xf0]  ;;  %vm1089_vm13 = vweird.f32 %v5848_v25 }
 0x240   :  { %v1052_v2 = vrot.slane %v1038_v12, 4  ;;  %5249 = vrsqrt.f32 %v5850_v31  ;;  %2806 = vmatpush.bf16.msra.mxu0 %v4311_v62  ;;  %v4023_v18 = vor.u32 %v5002_v7, %v4020_v14  ;;  %v4276_v19 = vld [vmem:[#allocation18 + $0x360] sm:$0xf0]  ;;  %vm1079_vm14 = vweird.f32 %v5850_v31 }
 0x241   :  { %v1059_v41 = vadd.f32 %v1058_v50, %v1039_v26  ;;  %v5130_v20 = vld [vmem:[#allocation18 + $0x544] sm:$0xf]  ;;  %2819 = vmatpush.bf16.msra.mxu1 %v4567_v8  ;;  %v4279_v22 = vor.u32 %v5066_v15, %v4276_v19 }
 0x242   :  { %v1053_v51 = vadd.f32 %v1052_v2, %v1038_v12  ;;  %2832 = vmatpush.bf16.msra.mxu2 %v4823_v13  ;;  %v4532_v23 = vld [vmem:[#allocation18 + $0x560] sm:$0xf0] }
 0x243   :  { %v1060_v57 = vrot.slane %v1059_v41, 2  ;;  %v5194_v24 = vld [vmem:[#allocation18 + $0x744] sm:$0xf]  ;;  %2794 = vmatpush.bf16.msrb.mxu3 %v4023_v18  ;;  %v4535_v28 = vor.u32 %v5130_v20, %v4532_v23 }
 0x244   :  { %v1054_v61 = vrot.slane %v1053_v51, 2  ;;  %v4788_v29 = vld [vmem:[#allocation18 + $0x760] sm:$0xf0]  ;;  %2807 = vmatpush.bf16.msra.mxu0 %v4279_v22 }
 0x245   :  { %v5854_v1 = vpop.eup %5247  ;;  %v1061_v4 = vadd.f32 %v1060_v57, %v1059_v41  ;;  %v4994_v30 = vld [vmem:[#allocation18 + $0x104] sm:$0xf]  ;;  %v4791_v33 = vor.u32 %v5194_v24, %v4788_v29  ;;  %2820 = vmatpush.bf16.msra.mxu1 %v4535_v28 }
 0x246   :  { %v1084_v10 = vmul.f32 %v5854_v1, %v5848_v25  ;;  %v1055_v11 = vadd.f32 %v1054_v61, %v1053_v51  ;;  %v5858_v48 = vpop.eup %5249  ;;  %v3988_v12 = vld [vmem:[#allocation18 + $0x120] sm:$0xf0]  ;;  %vm1090_vm12 = vweird.f32 %v5854_v1 }
 0x247   :  { %v1062_v17 = vrot.slane %v1061_v4, 1  ;;  %v3991_v34 = vor.u32 %v4994_v30, %v3988_v12  ;;  %v5058_v50 = vld [vmem:[#allocation18 + $0x304] sm:$0xf]  ;;  %v1074_v36 = vmul.f32 %v5858_v48, %v5850_v31  ;;  %2833 = vmatpush.bf16.msra.mxu2 %v4791_v33  ;;  %vm1080_vm15 = vweird.f32 %v5858_v48  ;;  %vm5891_vm0 = vmor %vm1089_vm13, %vm1090_vm12 }
 0x248   :  { %v1056_v21 = vrot.slane %v1055_v11, 1  ;;  %v1085_v26 = vmul.f32 %v5854_v1, %v1084_v10  ;;  %v4244_v16 = vld [vmem:[#allocation18 + $0x320] sm:$0xf0]  ;;  %vm5904_vm3 = vmor %vm1079_vm14, %vm1080_vm15 }
 0x249   :  { %v1063_v27 = vadd.f32 %v1062_v17, %v1061_v4  ;;  %v4247_v38 = vor.u32 %v5058_v50, %v4244_v16  ;;  %v5122_v40 = vld [vmem:[#allocation18 + $0x504] sm:$0xf]  ;;  %2795 = vmatpush.bf16.msrb.mxu3 %v3991_v34  ;;  %v1075_v59 = vmul.f32 %v5858_v48, %v1074_v36 }
 0x24a   :  { %v1057_v32 = vadd.f32 %v1056_v21, %v1055_v11  ;;  %v4500_v41 = vld [vmem:[#allocation18 + $0x520] sm:$0xf0]  ;;  %v5865_v51 = vmul.f32 0.5, %v1085_v26 }
 0x24b   :  { %v1067_v2 = vmul.f32 %v1063_v27, %v5747_v37  ;;  %v4503_v39 = vor.u32 %v5122_v40, %v4500_v41  ;;  %v5186_v45 = vld [vmem:[#allocation18 + $0x704] sm:$0xf]  ;;  %2808 = vmatpush.bf16.msra.mxu0 %v4247_v38  ;;  %v5874_v18 = vmul.f32 0.5, %v1075_v59 }
 0x24c   :  { %v1066_v43 = vmul.f32 %v1057_v32, %v5747_v37  ;;  %v4756_v47 = vld [vmem:[#allocation18 + $0x720] sm:$0xf0]  ;;  %v1087_v19 = vsub.f32 1.5, %v5865_v51 }
 0x24d   :  { %v5867_v52 = vadd.f32 0.8, %v1067_v2  ;;  %v4759_v53 = vor.u32 %v5186_v45, %v4756_v47  ;;  %v4986_v54 = vld [vmem:[#allocation18 + $0xc4] sm:$0xf]  ;;  %2821 = vmatpush.bf16.msra.mxu1 %v4503_v39  ;;  %v1077_v40 = vsub.f32 1.5, %v5874_v18 }
 0x24e   :  { %v5869_v55 = vadd.f32 0.8, %v1066_v43  ;;  %v3956_v57 = vld [vmem:[#allocation18 + $0xe0] sm:$0xf0]  ;;  %v1088_v51 = vmul.f32 %v5854_v1, %v1087_v19 }
 0x24f   :  { %v5050_v58 = vld [vmem:[#allocation18 + $0x2c4] sm:$0xf]  ;;  %5251 = vrsqrt.f32 %v5867_v52  ;;  %v3959_v60 = vor.u32 %v4986_v54, %v3956_v57  ;;  %2834 = vmatpush.bf16.msra.mxu2 %v4759_v53  ;;  %vm1109_vm4 = vweird.f32 %v5867_v52 }
 0x250   :  { %v4212_v61 = vld [vmem:[#allocation18 + $0x2e0] sm:$0xf0]  ;;  %5253 = vrsqrt.f32 %v5869_v55  ;;  %vm1099_vm5 = vweird.f32 %v5869_v55 }
 0x251   :  { %v5114_v62 = vld [vmem:[#allocation18 + $0x4c4] sm:$0xf]  ;;  %v4215_v0 = vor.u32 %v5050_v58, %v4212_v61  ;;  %2796 = vmatpush.bf16.msrb.mxu3 %v3959_v60 }
 0x252   :  { %v5178_v4 = vld [vmem:[#allocation18 + $0x6c4] sm:$0xf]  ;;  %v4471_v6 = vor.u32 %v5114_v62, %v4468_v63 }
 0x253   :  { %v4724_v8 = vld [vmem:[#allocation18 + $0x6e0] sm:$0xf0]  ;;  %2809 = vmatpush.bf16.msra.mxu0 %v4215_v0 }
 0x254   :  { %v4978_v5 = vld [vmem:[#allocation18 + $0x84] sm:$0xf]  ;;  %v4727_v7 = vor.u32 %v5178_v4, %v4724_v8  ;;  %2822 = vmatpush.bf16.msra.mxu1 %v4471_v6 }
 0x255   :  { %v3924_v10 = vld [vmem:[#allocation18 + $0xa0] sm:$0xf0]  ;;  %v5877_v29 = vpop.eup %5251 }
 0x256   :  { %v5042_v11 = vld [vmem:[#allocation18 + $0x284] sm:$0xf]  ;;  %v3927_v13 = vor.u32 %v4978_v5, %v3924_v10  ;;  %2835 = vmatpush.bf16.msra.mxu2 %v4727_v7  ;;  %v5254_v34 = vpop.eup %5253  ;;  %v1104_v50 = vmul.f32 %v5877_v29, %v5867_v52  ;;  %vm1110_vm1 = vweird.f32 %v5877_v29  ;;  %v1092_v7 = vsel %vm5891_vm0, %v5854_v1, %v1088_v51 }
 0x257   :  { %v4180_v14 = vld [vmem:[#allocation18 + $0x2a0] sm:$0xf0]  ;;  %v1094_v2 = vmul.f32 %v5254_v34, %v5869_v55  ;;  %vm1100_vm2 = vweird.f32 %v5254_v34  ;;  %vm1111_vm7 = vmor %vm1109_vm4, %vm1110_vm1  ;;  %v1117_v1 = vrot.slane %v1092_v7, 7  ;;  %v1068_v55 = vld [vmem:[#allocation15] sm:$0xf] }
 0x258   :  { %v5106_v15 = vld [vmem:[#allocation18 + $0x484] sm:$0xf]  ;;  %v4183_v20 = vor.u32 %v5042_v11, %v4180_v14  ;;  %2797 = vmatpush.bf16.msrb.mxu3 %v3927_v13  ;;  %v1105_v41 = vmul.f32 %v5877_v29, %v1104_v50  ;;  %v1078_v11 = vmul.f32 %v5858_v48, %v1077_v40  ;;  %vm1101_vm8 = vmor %vm1099_vm5, %vm1100_vm2  ;;  %v1127_v50 = vld [vmem:[#allocation16] sm:$0xf] }
 0x259   :  { %v4436_v17 = vld [vmem:[#allocation18 + $0x4a0] sm:$0xf0]  ;;  %v1095_v53 = vmul.f32 %v5254_v34, %v1094_v2  ;;  %v5015_v13 = vld [vmem:[#allocation18 + $0x1a4] sm:$0xf0] }
 0x25a   :  { %v5170_v21 = vld [vmem:[#allocation18 + $0x684] sm:$0xf]  ;;  %v4439_v23 = vor.u32 %v5106_v15, %v4436_v17  ;;  %2810 = vmatpush.bf16.msra.mxu0 %v4183_v20  ;;  %v1106_v60 = vmul.f32 0.5, %v1105_v41  ;;  %v1082_v31 = vsel %vm5904_vm3, %v5858_v48, %v1078_v11  ;;  %v4058_v11 = vld [vmem:[#allocation18 + $0x188] sm:$0xf] }
 0x25b   :  { %v4692_v22 = vld [vmem:[#allocation18 + $0x6a0] sm:$0xf0]  ;;  %v1096_v63 = vmul.f32 0.5, %v1095_v53  ;;  %v1120_v20 = vsel %vm471_vm6, %v1082_v31, %v1117_v1  ;;  %v4314_v31 = vld [vmem:[#allocation18 + $0x388] sm:$0xf] }
 0x25c   :  { %v4695_v24 = vor.u32 %v5170_v21, %v4692_v22  ;;  %v4970_v26 = vld [vmem:[#allocation18 + $0x44] sm:$0xf]  ;;  %2823 = vmatpush.bf16.msra.mxu1 %v4439_v23  ;;  %v1107_v5 = vsub.f32 1.5, %v1106_v60  ;;  %v4602_v60 = vld [vmem:[#allocation18 + $0x5c8] sm:$0xf] }
 0x25d   :  { %v3892_v27 = vld [vmem:[#allocation18 + $0x60] sm:$0xf0]  ;;  %v1097_v10 = vsub.f32 1.5, %v1096_v63 }
 0x25e   :  { %v5034_v28 = vld [vmem:[#allocation18 + $0x244] sm:$0xf]  ;;  %v3895_v30 = vor.u32 %v4970_v26, %v3892_v27  ;;  %2836 = vmatpush.bf16.msra.mxu2 %v4695_v24  ;;  %v1108_v14 = vmul.f32 %v5877_v29, %v1107_v5 }
 0x25f   :  { %v4148_v12 = vld [vmem:[#allocation18 + $0x260] sm:$0xf0]  ;;  %v1098_v15 = vmul.f32 %v5254_v34, %v1097_v10 }
 0x260   :  { %v5098_v32 = vld [vmem:[#allocation18 + $0x444] sm:$0xf]  ;;  %v4151_v38 = vor.u32 %v5034_v28, %v4148_v12  ;;  %2798 = vmatpush.bf16.msrb.mxu3 %v3895_v30  ;;  %v1112_v17 = vsel %vm1111_vm7, %v5877_v29, %v1108_v14 }
 0x261   :  { %v4404_v33 = vld [vmem:[#allocation18 + $0x460] sm:$0xf0]  ;;  %v1102_v18 = vsel %vm1101_vm8, %v5254_v34, %v1098_v15  ;;  %v1119_v19 = vrot.slane %v1112_v17, 5 }
 0x262   :  { %v5162_v16 = vld [vmem:[#allocation18 + $0x644] sm:$0xf]  ;;  %v4407_v43 = vor.u32 %v5098_v32, %v4404_v33  ;;  %2811 = vmatpush.bf16.msra.mxu0 %v4151_v38  ;;  %v1118_v52 = vrot.slane %v1102_v18, 6  ;;  %v5079_v18 = vld [vmem:[#allocation18 + $0x3a4] sm:$0xf0] }
 0x263   :  { %v4660_v36 = vld [vmem:[#allocation18 + $0x660] sm:$0xf0] }
 0x264   :  { %v4663_v39 = vor.u32 %v5162_v16, %v4660_v36  ;;  %v4962_v45 = vld [vmem:[#allocation18 + $0x4] sm:$0xf]  ;;  %2824 = vmatpush.bf16.msra.mxu1 %v4407_v43  ;;  %v1122_v21 = vsel %vm1121_vm9, %v1118_v52, %v1119_v19  ;;  %v4570_v52 = vld [vmem:[#allocation18 + $0x588] sm:$0xf] }
 0x265   :  { %v3860_v47 = vld [vmem:[#allocation18 + $0x20] sm:$0xf0]  ;;  %v1124_v22 = vsel %vm1123_vm10, %v1120_v20, %v1122_v21  ;;  %v5143_v19 = vld [vmem:[#allocation18 + $0x5a4] sm:$0xf0]  ;;  %v4059_v21 = vor.u32 %v5015_v13, %v4058_v11 }
 0x266   :  { %v3863_v54 = vor.u32 %v4962_v45, %v3860_v47  ;;  %v5026_v57 = vld [vmem:[#allocation18 + $0x204] sm:$0xf]  ;;  %2837 = vmatpush.bf16.msra.mxu2 %v4663_v39  ;;  %v1126_v23 = vmul.f32 %v1124_v22, %v1068_v55  ;;  %v4090_v45 = vld [vmem:[#allocation18 + $0x1c8] sm:$0xf]  ;;  %v4315_v22 = vor.u32 %v5079_v18, %v4314_v31 }
 0x267   :  { %v4116_v58 = vld [vmem:[#allocation18 + $0x220] sm:$0xf0]  ;;  %v4826_v55 = vld [vmem:[#allocation18 + $0x788] sm:$0xf] }
 0x268   :  { %v5090_v59 = vld [vmem:[#allocation18 + $0x404] sm:$0xf]  ;;  %v4119_v0 = vor.u32 %v5026_v57, %v4116_v58  ;;  %2799 = vmatpush.bf16.msrb.mxu3 %v3863_v54  ;;  %v1129_v24 = vperm.slane %v1126_v23, 0  ;;  %v1130_v26 = vperm.slane %v1126_v23, 1  ;;  %v1131_v27 = vperm.slane %v1126_v23, 2 }
 0x269   :  { %v4372_v61 = vld [vmem:[#allocation18 + $0x420] sm:$0xf0]  ;;  %v1132_v28 = vperm.slane %v1126_v23, 3  ;;  %v5023_v57 = vld [vmem:[#allocation18 + $0x1e4] sm:$0xf0] }
 0x26a   :  { %v5154_v62 = vld [vmem:[#allocation18 + $0x604] sm:$0xf]  ;;  %v4375_v25 = vor.u32 %v5090_v59, %v4372_v61  ;;  %2812 = vmatpush.bf16.msra.mxu0 %v4119_v0  ;;  %v1138_v29 = vmul.f32 %v1130_v26, %v5819_v35  ;;  %v1139_v48 = vmul.f32 %v1131_v27, %v5840_v9  ;;  %v1137_v12 = vmul.f32 %v1129_v24, %v5822_v42  ;;  %v4346_v58 = vld [vmem:[#allocation18 + $0x3c8] sm:$0xf] }
 0x26b   :  { %v4628_v4 = vld [vmem:[#allocation18 + $0x620] sm:$0xf0]  ;;  %v1140_v30 = vmul.f32 %v1132_v28, %v5837_v3  ;;  %v1153_v40 = vmul.f32 %v1129_v24, %v5810_v46  ;;  %v1154_v35 = vmul.f32 %v1130_v26, %v5808_v44  ;;  %v1155_v9 = vmul.f32 %v1131_v27, %v5830_v56  ;;  %v5087_v59 = vld [vmem:[#allocation18 + $0x3e4] sm:$0xf0] }
 0x26c   :  { %v4631_v6 = vor.u32 %v5154_v62, %v4628_v4  ;;  %2825 = vmatpush.bf16.msra.mxu1 %v4375_v25  ;;  %v1145_v32 = vrot.slane %v1138_v29, 7  ;;  %v1146_v33 = vrot.slane %v1139_v48, 6  ;;  %v1156_v3 = vmul.f32 %v1132_v28, %v5826_v49  ;;  %v5151_v46 = vld [vmem:[#allocation18 + $0x5e4] sm:$0xf0] }
 0x26d   :  { %v1147_v34 = vrot.slane %v1140_v30, 5  ;;  %v4858_v61 = vld [vmem:[#allocation18 + $0x7c8] sm:$0xf]  ;;  %v4091_v8 = vor.u32 %v5023_v57, %v4090_v45  ;;  %v4347_v5 = vor.u32 %v5087_v59, %v4346_v58  ;;  %v4603_v1 = vor.u32 %v5151_v46, %v4602_v60 }
 0x26e   :  { %2838 = vmatpush.bf16.msra.mxu2 %v4631_v6  ;;  %v1148_v16 = vsel %vm471_vm6, %v1137_v12, %v1145_v32  ;;  %v5215_v44 = vld [vmem:[#allocation18 + $0x7e4] sm:$0xf0]  ;;  %v4571_v26 = vor.u32 %v5143_v19, %v4570_v52 }
 0x26f   :  { %v1149_v36 = vsel %vm1121_vm9, %v1146_v33, %v1147_v34  ;;  %v4859_v17 = vor.u32 %v5215_v44, %v4858_v61  ;;  %v5207_v20 = vld [vmem:[#allocation18 + $0x7a4] sm:$0xf0] }
 0x270   :  { %v1150_v2 = vsel %vm1123_vm10, %v1148_v16, %v1149_v36  ;;  %v4026_v23 = vld [vmem:[#allocation18 + $0x148] sm:$0xf]  ;;  %v4827_v27 = vor.u32 %v5207_v20, %v4826_v55 }
 0x271   :  { %v1152_v38 = vsub.f32 %v1127_v50, %v1150_v2  ;;  %v5007_v24 = vld [vmem:[#allocation18 + $0x164] sm:$0xf0] }
 0x272   :  { %v4282_v28 = vld [vmem:[#allocation18 + $0x348] sm:$0xf]  ;;  %v4027_v33 = vor.u32 %v5007_v24, %v4026_v23 }
 0x273   :  { %v1158_v42 = vperm.slane %v1152_v38, 0  ;;  %v1159_v41 = vperm.slane %v1152_v38, 1  ;;  %v1160_v43 = vperm.slane %v1152_v38, 2  ;;  %v1161_v39 = vperm.slane %v1152_v38, 3  ;;  %v5071_v29 = vld [vmem:[#allocation18 + $0x364] sm:$0xf0] }
 0x274   :  { %v4538_v48 = vld [vmem:[#allocation18 + $0x548] sm:$0xf]  ;;  %v4283_v34 = vor.u32 %v5071_v29, %v4282_v28 }
 0x275   :  { %v1166_v47 = vadd.f32 %v1158_v42, %v1153_v40  ;;  %v1167_v51 = vadd.f32 %v1159_v41, %v1154_v35  ;;  %v1168_v53 = vadd.f32 %v1160_v43, %v1155_v9  ;;  %v1169_v54 = vadd.f32 %v1161_v39, %v1156_v3  ;;  %v5135_v30 = vld [vmem:[#allocation18 + $0x564] sm:$0xf0] }
 0x276   :  { %v4794_v12 = vld [vmem:[#allocation18 + $0x748] sm:$0xf]  ;;  %v4539_v36 = vor.u32 %v5135_v30, %v4538_v48 }
 0x277   :  { %vm1172_vm11 = vcmp.gt.f32.partialorder %v1168_v53, 0.0  ;;  %vm1173_vm12 = vcmp.gt.f32.partialorder %v1169_v54, 0.0  ;;  %v1174_v56 = vmul.f32 0.2, %v1166_v47  ;;  %v1175_v49 = vmul.f32 0.2, %v1167_v51 }
 0x278   :  { %v1176_v62 = vmul.f32 0.2, %v1168_v53  ;;  %v1177_v63 = vmul.f32 0.2, %v1169_v54  ;;  %vm1170_vm13 = vcmp.gt.f32.partialorder %v1166_v47, 0.0  ;;  %vm1171_vm14 = vcmp.gt.f32.partialorder %v1167_v51, 0.0 }
 0x279   :  { %v1178_v0 = vsel %vm1170_vm13, %v1166_v47, %v1174_v56  ;;  %v1179_v4 = vsel %vm1171_vm14, %v1167_v51, %v1175_v49  ;;  %v5199_v32 = vld [vmem:[#allocation18 + $0x764] sm:$0xf0] }
 0x27a   :  { %v1181_v25 = vsel %vm1173_vm12, %v1169_v54, %v1177_v63  ;;  %v5931_v6 = vpack.c.bf16 %v1178_v0, %v1178_v0  ;;  %v5933_v7 = vpack.c.bf16 %v1179_v4, %v1179_v4  ;;  %v1180_v10 = vsel %vm1172_vm11, %v1168_v53, %v1176_v62  ;;  %v3994_v50 = vld [vmem:[#allocation18 + $0x108] sm:$0xf] }
 0x27b   :  { %v5935_v14 = vpack.c.bf16 %v1181_v25, %v1181_v25  ;;  %v5937_v15 = vpack.c.bf16 %v1180_v10, %v1180_v10  ;;  %v4999_v16 = vld [vmem:[#allocation18 + $0x124] sm:$0xf0]  ;;  %v4795_v2 = vor.u32 %v5199_v32, %v4794_v12 }
 0x27c   :  { %2748 = vmatmul.bf16.vlgmr.msra.gmra.mxu3 %v5931_v6  ;;  %2761 = vmatmul.bf16.vlgmr.msrb.gmra.mxu0 %v5933_v7  ;;  %v4250_v38 = vld [vmem:[#allocation18 + $0x308] sm:$0xf]  ;;  %v3995_v41 = vor.u32 %v4999_v16, %v3994_v50  ;;  %v4092_v50 = vld [vmem:[#allocation18 + $0x1e8] sm:$0xf0] }
 0x27d   :  { %2774 = vmatmul.bf16.vlgmr.msrb.gmra.mxu1 %v5937_v15  ;;  %2787 = vmatmul.bf16.vlgmr.msrb.gmra.mxu2 %v5935_v14  ;;  %v5063_v40 = vld [vmem:[#allocation18 + $0x324] sm:$0xf0]  ;;  %v5083_v16 = vld [vmem:[#allocation18 + $0x3cc] sm:$0xf] }
 0x27e   :  { %2844 = vmatpush.bf16.msra.mxu3 %v4091_v8  ;;  %2857 = vmatpush.bf16.msrb.mxu0 %v4347_v5  ;;  %v4506_v35 = vld [vmem:[#allocation18 + $0x508] sm:$0xf]  ;;  %v4251_v43 = vor.u32 %v5063_v40, %v4250_v38 }
 0x27f   :  { %2870 = vmatpush.bf16.msrb.mxu1 %v4603_v1  ;;  %2883 = vmatpush.bf16.msrb.mxu2 %v4859_v17  ;;  %v5127_v9 = vld [vmem:[#allocation18 + $0x524] sm:$0xf0] }
 0x280   :  { %v4762_v3 = vld [vmem:[#allocation18 + $0x708] sm:$0xf]  ;;  %v4507_v47 = vor.u32 %v5127_v9, %v4506_v35  ;;  %v4604_v35 = vld [vmem:[#allocation18 + $0x5e8] sm:$0xf0] }
 0x281   :  { %v5191_v42 = vld [vmem:[#allocation18 + $0x724] sm:$0xf0]  ;;  %v5211_v9 = vld [vmem:[#allocation18 + $0x7cc] sm:$0xf] }
 0x282   :  { %2845 = vmatpush.bf16.msra.mxu3 %v4059_v21  ;;  %2858 = vmatpush.bf16.msrb.mxu0 %v4315_v22  ;;  %v3962_v39 = vld [vmem:[#allocation18 + $0xc8] sm:$0xf]  ;;  %v4763_v51 = vor.u32 %v5191_v42, %v4762_v3  ;;  %v4860_v3 = vld [vmem:[#allocation18 + $0x7e8] sm:$0xf0] }
 0x283   :  { %2871 = vmatpush.bf16.msrb.mxu1 %v4571_v26  ;;  %2884 = vmatpush.bf16.msrb.mxu2 %v4827_v27  ;;  %v4991_v45 = vld [vmem:[#allocation18 + $0xe4] sm:$0xf0] }
 0x284   :  { %v4218_v53 = vld [vmem:[#allocation18 + $0x2c8] sm:$0xf]  ;;  %v3963_v46 = vor.u32 %v4991_v45, %v3962_v39  ;;  %v5011_v45 = vld [vmem:[#allocation18 + $0x18c] sm:$0xf] }
 0x285   :  { %v5055_v54 = vld [vmem:[#allocation18 + $0x2e4] sm:$0xf0] }
 0x286   :  { %2846 = vmatpush.bf16.msra.mxu3 %v4027_v33  ;;  %2859 = vmatpush.bf16.msrb.mxu0 %v4283_v34  ;;  %v4474_v57 = vld [vmem:[#allocation18 + $0x4c8] sm:$0xf]  ;;  %v4219_v61 = vor.u32 %v5055_v54, %v4218_v53  ;;  %v5019_v34 = vld [vmem:[#allocation18 + $0x1cc] sm:$0xf]  ;;  %v4863_v53 = vor.u32 %v5211_v9, %v4860_v3 }
 0x287   :  { %2872 = vmatpush.bf16.msrb.mxu1 %v4539_v36  ;;  %2885 = vmatpush.bf16.msrb.mxu2 %v4795_v2  ;;  %v5119_v58 = vld [vmem:[#allocation18 + $0x4e4] sm:$0xf0]  ;;  %v4348_v36 = vld [vmem:[#allocation18 + $0x3e8] sm:$0xf0] }
 0x288   :  { %v4730_v59 = vld [vmem:[#allocation18 + $0x6c8] sm:$0xf]  ;;  %v4475_v49 = vor.u32 %v5119_v58, %v4474_v57  ;;  %v5147_v2 = vld [vmem:[#allocation18 + $0x5cc] sm:$0xf]  ;;  %v4351_v39 = vor.u32 %v5083_v16, %v4348_v36 }
 0x289   :  { %v5183_v60 = vld [vmem:[#allocation18 + $0x6e4] sm:$0xf0]  ;;  %v5075_v54 = vld [vmem:[#allocation18 + $0x38c] sm:$0xf] }
 0x28a   :  { %2847 = vmatpush.bf16.msra.mxu3 %v3995_v41  ;;  %2860 = vmatpush.bf16.msrb.mxu0 %v4251_v43  ;;  %v3930_v44 = vld [vmem:[#allocation18 + $0x88] sm:$0xf]  ;;  %v4731_v62 = vor.u32 %v5183_v60, %v4730_v59  ;;  %v4095_v43 = vor.u32 %v5019_v34, %v4092_v50  ;;  %v4316_v57 = vld [vmem:[#allocation18 + $0x3a8] sm:$0xf0] }
 0x28b   :  { %v4983_v56 = vld [vmem:[#allocation18 + $0xa4] sm:$0xf0]  ;;  %2873 = vmatpush.bf16.msrb.mxu1 %v4507_v47  ;;  %2886 = vmatpush.bf16.msrb.mxu2 %v4763_v51  ;;  %v4060_v47 = vld [vmem:[#allocation18 + $0x1a8] sm:$0xf0]  ;;  %v4607_v51 = vor.u32 %v5147_v2, %v4604_v35 }
 0x28c   :  { %v4186_v63 = vld [vmem:[#allocation18 + $0x288] sm:$0xf]  ;;  %2800 = vmatmul.bf16.vlgmr.msrb.gmra.mxu3 %v5931_v6  ;;  %2813 = vmatmul.bf16.vlgmr.msra.gmra.mxu0 %v5933_v7  ;;  %v3931_v10 = vor.u32 %v4983_v56, %v3930_v44  ;;  %v5139_v58 = vld [vmem:[#allocation18 + $0x58c] sm:$0xf]  ;;  %v4319_v44 = vor.u32 %v5075_v54, %v4316_v57 }
 0x28d   :  { %v5047_v0 = vld [vmem:[#allocation18 + $0x2a4] sm:$0xf0]  ;;  %2826 = vmatmul.bf16.vlgmr.msra.gmra.mxu1 %v5937_v15  ;;  %2839 = vmatmul.bf16.vlgmr.msra.gmra.mxu2 %v5935_v14  ;;  %v4572_v59 = vld [vmem:[#allocation18 + $0x5a8] sm:$0xf0] }
 0x28e   :  { %v4442_v4 = vld [vmem:[#allocation18 + $0x488] sm:$0xf]  ;;  %2848 = vmatpush.bf16.msra.mxu3 %v3963_v46  ;;  %2861 = vmatpush.bf16.msrb.mxu0 %v4219_v61  ;;  %v4187_v11 = vor.u32 %v5047_v0, %v4186_v63  ;;  %v5203_v60 = vld [vmem:[#allocation18 + $0x78c] sm:$0xf]  ;;  %v4063_v61 = vor.u32 %v5011_v45, %v4060_v47 }
 0x28f   :  { %v5111_v8 = vld [vmem:[#allocation18 + $0x4a4] sm:$0xf0]  ;;  %2874 = vmatpush.bf16.msrb.mxu1 %v4475_v49  ;;  %2887 = vmatpush.bf16.msrb.mxu2 %v4731_v62  ;;  %v4828_v46 = vld [vmem:[#allocation18 + $0x7a8] sm:$0xf0]  ;;  %v4575_v62 = vor.u32 %v5139_v58, %v4572_v59 }
 0x290   :  { %v4698_v5 = vld [vmem:[#allocation18 + $0x688] sm:$0xf]  ;;  %v4443_v17 = vor.u32 %v5111_v8, %v4442_v4  ;;  %v5003_v56 = vld [vmem:[#allocation18 + $0x14c] sm:$0xf]  ;;  %v4831_v63 = vor.u32 %v5203_v60, %v4828_v46 }
 0x291   :  { %v5175_v25 = vld [vmem:[#allocation18 + $0x6a4] sm:$0xf0]  ;;  %v4028_v49 = vld [vmem:[#allocation18 + $0x168] sm:$0xf0] }
 0x292   :  { %v3898_v13 = vld [vmem:[#allocation18 + $0x48] sm:$0xf]  ;;  %v4699_v31 = vor.u32 %v5175_v25, %v4698_v5  ;;  %2849 = vmatpush.bf16.msra.mxu3 %v3931_v10  ;;  %2862 = vmatpush.bf16.msrb.mxu0 %v4187_v11  ;;  %v5067_v0 = vld [vmem:[#allocation18 + $0x34c] sm:$0xf]  ;;  %v4031_v11 = vor.u32 %v5003_v56, %v4028_v49 }
 0x293   :  { %v4975_v1 = vld [vmem:[#allocation18 + $0x64] sm:$0xf0]  ;;  %2875 = vmatpush.bf16.msrb.mxu1 %v4443_v17  ;;  %v4284_v4 = vld [vmem:[#allocation18 + $0x368] sm:$0xf0] }
 0x294   :  { %v4154_v18 = vld [vmem:[#allocation18 + $0x248] sm:$0xf]  ;;  %v3899_v23 = vor.u32 %v4975_v1, %v3898_v13  ;;  %2888 = vmatpush.bf16.msrb.mxu2 %v4699_v31  ;;  %v5131_v8 = vld [vmem:[#allocation18 + $0x54c] sm:$0xf]  ;;  %v4287_v13 = vor.u32 %v5067_v0, %v4284_v4 }
 0x295   :  { %v5039_v52 = vld [vmem:[#allocation18 + $0x264] sm:$0xf0]  ;;  %v4540_v5 = vld [vmem:[#allocation18 + $0x568] sm:$0xf0] }
 0x296   :  { %v4410_v19 = vld [vmem:[#allocation18 + $0x448] sm:$0xf]  ;;  %v4155_v24 = vor.u32 %v5039_v52, %v4154_v18  ;;  %2850 = vmatpush.bf16.msra.mxu3 %v3899_v23  ;;  %v5195_v25 = vld [vmem:[#allocation18 + $0x74c] sm:$0xf]  ;;  %v4543_v31 = vor.u32 %v5131_v8, %v4540_v5 }
 0x297   :  { %v5103_v55 = vld [vmem:[#allocation18 + $0x464] sm:$0xf0]  ;;  %v4796_v10 = vld [vmem:[#allocation18 + $0x768] sm:$0xf0] }
 0x298   :  { %v4666_v20 = vld [vmem:[#allocation18 + $0x648] sm:$0xf]  ;;  %v4411_v29 = vor.u32 %v5103_v55, %v4410_v19  ;;  %2863 = vmatpush.bf16.msrb.mxu0 %v4155_v24  ;;  %v4995_v1 = vld [vmem:[#allocation18 + $0x10c] sm:$0xf]  ;;  %v4799_v18 = vor.u32 %v5195_v25, %v4796_v10 }
 0x299   :  { %v5167_v21 = vld [vmem:[#allocation18 + $0x664] sm:$0xf0]  ;;  %v3996_v17 = vld [vmem:[#allocation18 + $0x128] sm:$0xf0] }
 0x29a   :  { %v3866_v22 = vld [vmem:[#allocation18 + $0x8] sm:$0xf]  ;;  %v4667_v48 = vor.u32 %v5167_v21, %v4666_v20  ;;  %2876 = vmatpush.bf16.msrb.mxu1 %v4411_v29  ;;  %v5059_v52 = vld [vmem:[#allocation18 + $0x30c] sm:$0xf]  ;;  %v3999_v23 = vor.u32 %v4995_v1, %v3996_v17  ;;  %v5024_v1 = vld [vmem:[#allocation18 + $0x1ec] sm:$0xf0] }
 0x29b   :  { %v4967_v26 = vld [vmem:[#allocation18 + $0x24] sm:$0xf0]  ;;  %v4252_v19 = vld [vmem:[#allocation18 + $0x328] sm:$0xf0]  ;;  %v4354_v17 = vld [vmem:[#allocation18 + $0x3d0] sm:$0xf] }
 0x29c   :  { %v4122_v27 = vld [vmem:[#allocation18 + $0x208] sm:$0xf]  ;;  %v3867_v38 = vor.u32 %v4967_v26, %v3866_v22  ;;  %2889 = vmatpush.bf16.msrb.mxu2 %v4667_v48  ;;  %v5123_v55 = vld [vmem:[#allocation18 + $0x50c] sm:$0xf]  ;;  %v4255_v24 = vor.u32 %v5059_v52, %v4252_v19 }
 0x29d   :  { %v5031_v28 = vld [vmem:[#allocation18 + $0x224] sm:$0xf0]  ;;  %v4508_v20 = vld [vmem:[#allocation18 + $0x528] sm:$0xf0] }
 0x29e   :  { %v4378_v30 = vld [vmem:[#allocation18 + $0x408] sm:$0xf]  ;;  %v4123_v40 = vor.u32 %v5031_v28, %v4122_v27  ;;  %2851 = vmatpush.bf16.msra.mxu3 %v3867_v38  ;;  %v5187_v21 = vld [vmem:[#allocation18 + $0x70c] sm:$0xf]  ;;  %v4511_v28 = vor.u32 %v5123_v55, %v4508_v20  ;;  %v5152_v55 = vld [vmem:[#allocation18 + $0x5ec] sm:$0xf0] }
 0x29f   :  { %v5095_v12 = vld [vmem:[#allocation18 + $0x424] sm:$0xf0]  ;;  %v4764_v22 = vld [vmem:[#allocation18 + $0x728] sm:$0xf0]  ;;  %v4866_v20 = vld [vmem:[#allocation18 + $0x7d0] sm:$0xf] }
 0x2a0   :  { %v4634_v32 = vld [vmem:[#allocation18 + $0x608] sm:$0xf]  ;;  %v4379_v42 = vor.u32 %v5095_v12, %v4378_v30  ;;  %2864 = vmatpush.bf16.msrb.mxu0 %v4123_v40  ;;  %v4987_v26 = vld [vmem:[#allocation18 + $0xcc] sm:$0xf]  ;;  %v4767_v29 = vor.u32 %v5187_v21, %v4764_v22  ;;  %v5216_v21 = vld [vmem:[#allocation18 + $0x7ec] sm:$0xf0] }
 0x2a1   :  { %v5159_v33 = vld [vmem:[#allocation18 + $0x624] sm:$0xf0]  ;;  %2852 = vmatmul.bf16.vlgmr.msra.gmra.mxu3 %v5931_v6  ;;  %v3964_v27 = vld [vmem:[#allocation18 + $0xe8] sm:$0xf0] }
 0x2a2   :  { %v4635_v41 = vor.u32 %v5159_v33, %v4634_v32  ;;  %2877 = vmatpush.bf16.msrb.mxu1 %v4379_v42  ;;  %2896 = vmatpush.bf16.msrb.mxu3 %v4095_v43  ;;  %v5051_v48 = vld [vmem:[#allocation18 + $0x2cc] sm:$0xf]  ;;  %v3967_v50 = vor.u32 %v4987_v26, %v3964_v27  ;;  %v4066_v27 = vld [vmem:[#allocation18 + $0x190] sm:$0xf] }
 0x2a3   :  { %2865 = vmatmul.bf16.vlgmr.msrb.gmra.mxu0 %v5933_v7  ;;  %v4220_v30 = vld [vmem:[#allocation18 + $0x2e8] sm:$0xf0] }
 0x2a4   :  { %2890 = vmatpush.bf16.msrb.mxu2 %v4635_v41  ;;  %2909 = vmatpush.bf16.msra.mxu0 %v4351_v39  ;;  %v5115_v12 = vld [vmem:[#allocation18 + $0x4cc] sm:$0xf]  ;;  %v4223_v16 = vor.u32 %v5051_v48, %v4220_v30  ;;  %v4867_v48 = vor.u32 %v5216_v21, %v4866_v20  ;;  %v4322_v30 = vld [vmem:[#allocation18 + $0x390] sm:$0xf] }
 0x2a5   :  { %2878 = vmatmul.bf16.vlgmr.msrb.gmra.mxu1 %v5937_v15  ;;  %v4476_v32 = vld [vmem:[#allocation18 + $0x4e8] sm:$0xf0]  ;;  %v5048_v20 = vld [vmem:[#allocation18 + $0x2ac] sm:$0xf0] }
 0x2a6   :  { %2922 = vmatpush.bf16.msra.mxu1 %v4607_v51  ;;  %2897 = vmatpush.bf16.msrb.mxu3 %v4063_v61  ;;  %v5179_v33 = vld [vmem:[#allocation18 + $0x6cc] sm:$0xf]  ;;  %v4479_v38 = vor.u32 %v5115_v12, %v4476_v32  ;;  %v5080_v12 = vld [vmem:[#allocation18 + $0x3ac] sm:$0xf0] }
 0x2a7   :  { %2891 = vmatmul.bf16.vlgmr.msrb.gmra.mxu2 %v5935_v14  ;;  %v4732_v34 = vld [vmem:[#allocation18 + $0x6e8] sm:$0xf0]  ;;  %v4578_v32 = vld [vmem:[#allocation18 + $0x590] sm:$0xf] }
 0x2a8   :  { %2935 = vmatpush.bf16.msra.mxu2 %v4863_v53  ;;  %2910 = vmatpush.bf16.msra.mxu0 %v4319_v44  ;;  %v4979_v36 = vld [vmem:[#allocation18 + $0x8c] sm:$0xf]  ;;  %v4735_v40 = vor.u32 %v5179_v33, %v4732_v34  ;;  %v5144_v33 = vld [vmem:[#allocation18 + $0x5ac] sm:$0xf0] }
 0x2a9   :  { %v3932_v2 = vld [vmem:[#allocation18 + $0xa8] sm:$0xf0]  ;;  %v4834_v34 = vld [vmem:[#allocation18 + $0x790] sm:$0xf] }
 0x2aa   :  { %2923 = vmatpush.bf16.msra.mxu1 %v4575_v62  ;;  %2898 = vmatpush.bf16.msrb.mxu3 %v4031_v11  ;;  %v5043_v35 = vld [vmem:[#allocation18 + $0x28c] sm:$0xf]  ;;  %v3935_v39 = vor.u32 %v4979_v36, %v3932_v2  ;;  %v4323_v36 = vor.u32 %v5080_v12, %v4322_v30  ;;  %v4034_v2 = vld [vmem:[#allocation18 + $0x150] sm:$0xf] }
 0x2ab   :  { %v4188_v9 = vld [vmem:[#allocation18 + $0x2a8] sm:$0xf0]  ;;  %v4450_v21 = vld [vmem:[#allocation18 + $0x490] sm:$0xf] }
 0x2ac   :  { %2936 = vmatpush.bf16.msra.mxu2 %v4831_v63  ;;  %2911 = vmatpush.bf16.msra.mxu0 %v4287_v13  ;;  %v5107_v3 = vld [vmem:[#allocation18 + $0x48c] sm:$0xf]  ;;  %v4191_v45 = vor.u32 %v5043_v35, %v4188_v9  ;;  %v4098_v13 = vld [vmem:[#allocation18 + $0x1d0] sm:$0xf] }
 0x2ad   :  { %v4444_v42 = vld [vmem:[#allocation18 + $0x4a8] sm:$0xf0]  ;;  %v4290_v9 = vld [vmem:[#allocation18 + $0x350] sm:$0xf] }
 0x2ae   :  { %2924 = vmatpush.bf16.msra.mxu1 %v4543_v31  ;;  %2899 = vmatpush.bf16.msrb.mxu3 %v3999_v23  ;;  %v5171_v41 = vld [vmem:[#allocation18 + $0x68c] sm:$0xf]  ;;  %v4447_v53 = vor.u32 %v5107_v3, %v4444_v42  ;;  %v5088_v31 = vld [vmem:[#allocation18 + $0x3ec] sm:$0xf0] }
 0x2af   :  { %v4700_v43 = vld [vmem:[#allocation18 + $0x6a8] sm:$0xf0]  ;;  %v4355_v26 = vor.u32 %v5088_v31, %v4354_v17  ;;  %v5072_v3 = vld [vmem:[#allocation18 + $0x36c] sm:$0xf0] }
 0x2b0   :  { %2937 = vmatpush.bf16.msra.mxu2 %v4799_v18  ;;  %2912 = vmatpush.bf16.msra.mxu0 %v4255_v24  ;;  %v4971_v47 = vld [vmem:[#allocation18 + $0x4c] sm:$0xf]  ;;  %v4703_v54 = vor.u32 %v5171_v41, %v4700_v43  ;;  %v4610_v18 = vld [vmem:[#allocation18 + $0x5d0] sm:$0xf]  ;;  %v4099_v24 = vor.u32 %v5024_v1, %v4098_v13 }
 0x2b1   :  { %v3900_v51 = vld [vmem:[#allocation18 + $0x68] sm:$0xf0]  ;;  %v4546_v42 = vld [vmem:[#allocation18 + $0x550] sm:$0xf] }
 0x2b2   :  { %2925 = vmatpush.bf16.msra.mxu1 %v4511_v28  ;;  %2900 = vmatpush.bf16.msrb.mxu3 %v3967_v50  ;;  %v5035_v57 = vld [vmem:[#allocation18 + $0x24c] sm:$0xf]  ;;  %v3903_v56 = vor.u32 %v4971_v47, %v3900_v51  ;;  %v5016_v28 = vld [vmem:[#allocation18 + $0x1ac] sm:$0xf0]  ;;  %v4291_v47 = vor.u32 %v5072_v3, %v4290_v9 }
 0x2b3   :  { %v4156_v58 = vld [vmem:[#allocation18 + $0x268] sm:$0xf0]  ;;  %v5208_v50 = vld [vmem:[#allocation18 + $0x7ac] sm:$0xf0] }
 0x2b4   :  { %2938 = vmatpush.bf16.msra.mxu2 %v4767_v29  ;;  %2913 = vmatpush.bf16.msra.mxu0 %v4223_v16  ;;  %v5099_v59 = vld [vmem:[#allocation18 + $0x44c] sm:$0xf]  ;;  %v4159_v49 = vor.u32 %v5035_v57, %v4156_v58  ;;  %v4611_v29 = vor.u32 %v5152_v55, %v4610_v18  ;;  %v4067_v16 = vor.u32 %v5016_v28, %v4066_v27  ;;  %v5136_v41 = vld [vmem:[#allocation18 + $0x56c] sm:$0xf0] }
 0x2b5   :  { %v4412_v60 = vld [vmem:[#allocation18 + $0x468] sm:$0xf0]  ;;  %v4835_v35 = vor.u32 %v5208_v50, %v4834_v34  ;;  %v4802_v43 = vld [vmem:[#allocation18 + $0x750] sm:$0xf] }
 0x2b6   :  { %2926 = vmatpush.bf16.msra.mxu1 %v4479_v38  ;;  %v5163_v46 = vld [vmem:[#allocation18 + $0x64c] sm:$0xf]  ;;  %2901 = vmatpush.bf16.msrb.mxu3 %v3935_v39  ;;  %v4415_v4 = vor.u32 %v5099_v59, %v4412_v60  ;;  %v5008_v38 = vld [vmem:[#allocation18 + $0x16c] sm:$0xf0] }
 0x2b7   :  { %v4668_v61 = vld [vmem:[#allocation18 + $0x668] sm:$0xf0]  ;;  %v5200_v39 = vld [vmem:[#allocation18 + $0x76c] sm:$0xf0] }
 0x2b8   :  { %2939 = vmatpush.bf16.msra.mxu2 %v4735_v40  ;;  %v4963_v44 = vld [vmem:[#allocation18 + $0xc] sm:$0xf]  ;;  %2914 = vmatpush.bf16.msra.mxu0 %v4191_v45  ;;  %v4671_v8 = vor.u32 %v5163_v46, %v4668_v61  ;;  %v4579_v40 = vor.u32 %v5144_v33, %v4578_v32  ;;  %v4035_v45 = vor.u32 %v5008_v38, %v4034_v2  ;;  %v4002_v51 = vld [vmem:[#allocation18 + $0x110] sm:$0xf] }
 0x2b9   :  { %v3868_v62 = vld [vmem:[#allocation18 + $0x28] sm:$0xf0]  ;;  %v4803_v57 = vor.u32 %v5200_v39, %v4802_v43  ;;  %v4258_v58 = vld [vmem:[#allocation18 + $0x310] sm:$0xf] }
 0x2ba   :  { %v5027_v63 = vld [vmem:[#allocation18 + $0x20c] sm:$0xf]  ;;  %2927 = vmatpush.bf16.msra.mxu1 %v4447_v53  ;;  %2902 = vmatpush.bf16.msrb.mxu3 %v3903_v56  ;;  %v3871_v52 = vor.u32 %v4963_v44, %v3868_v62  ;;  %v5000_v53 = vld [vmem:[#allocation18 + $0x12c] sm:$0xf0] }
 0x2bb   :  { %v4124_v0 = vld [vmem:[#allocation18 + $0x228] sm:$0xf0]  ;;  %v5064_v59 = vld [vmem:[#allocation18 + $0x32c] sm:$0xf0]  ;;  %v4003_v56 = vor.u32 %v5000_v53, %v4002_v51  ;;  %v4100_v51 = vld [vmem:[#allocation18 + $0x1f0] sm:$0xf0] }
 0x2bc   :  { %2940 = vmatpush.bf16.msra.mxu2 %v4703_v54  ;;  %v5091_v5 = vld [vmem:[#allocation18 + $0x40c] sm:$0xf]  ;;  %2915 = vmatpush.bf16.msra.mxu0 %v4159_v49  ;;  %v4127_v19 = vor.u32 %v5027_v63, %v4124_v0  ;;  %v4547_v54 = vor.u32 %v5136_v41, %v4546_v42  ;;  %v4514_v60 = vld [vmem:[#allocation18 + $0x510] sm:$0xf]  ;;  %v4259_v49 = vor.u32 %v5064_v59, %v4258_v58  ;;  %v5084_v53 = vld [vmem:[#allocation18 + $0x3d4] sm:$0xf] }
 0x2bd   :  { %v4380_v25 = vld [vmem:[#allocation18 + $0x428] sm:$0xf0]  ;;  %v5128_v46 = vld [vmem:[#allocation18 + $0x52c] sm:$0xf0] }
 0x2be   :  { %v5155_v10 = vld [vmem:[#allocation18 + $0x60c] sm:$0xf]  ;;  %2928 = vmatpush.bf16.msra.mxu1 %v4415_v4  ;;  %v4383_v22 = vor.u32 %v5091_v5, %v4380_v25  ;;  %2903 = vmatpush.bf16.msrb.mxu3 %v3871_v52  ;;  %v4770_v61 = vld [vmem:[#allocation18 + $0x710] sm:$0xf]  ;;  %v4515_v0 = vor.u32 %v5128_v46, %v4514_v60  ;;  %v4612_v60 = vld [vmem:[#allocation18 + $0x5f0] sm:$0xf0] }
 0x2bf   :  { %v4636_v11 = vld [vmem:[#allocation18 + $0x628] sm:$0xf0]  ;;  %v5192_v44 = vld [vmem:[#allocation18 + $0x72c] sm:$0xf0]  ;;  %v5212_v46 = vld [vmem:[#allocation18 + $0x7d4] sm:$0xf] }
 0x2c0   :  { %2941 = vmatpush.bf16.msra.mxu2 %v4671_v8  ;;  %v4639_v23 = vor.u32 %v5155_v10, %v4636_v11  ;;  %2916 = vmatpush.bf16.msra.mxu0 %v4127_v19  ;;  %v3970_v62 = vld [vmem:[#allocation18 + $0xd0] sm:$0xf]  ;;  %v4771_v4 = vor.u32 %v5192_v44, %v4770_v61  ;;  %v4868_v61 = vld [vmem:[#allocation18 + $0x7f0] sm:$0xf0] }
 0x2c1   :  { %2904 = vmatmul.bf16.vlgmr.msrb.gmra.mxu3 %v5931_v6  ;;  %v4992_v63 = vld [vmem:[#allocation18 + $0xec] sm:$0xf0] }
 0x2c2   :  { %2929 = vmatpush.bf16.msra.mxu1 %v4383_v22  ;;  %2948 = vmatpush.bf16.msra.mxu3 %v4099_v24  ;;  %v4226_v8 = vld [vmem:[#allocation18 + $0x2d0] sm:$0xf]  ;;  %v3971_v1 = vor.u32 %v4992_v63, %v3970_v62  ;;  %v5012_v63 = vld [vmem:[#allocation18 + $0x194] sm:$0xf] }
 0x2c3   :  { %2917 = vmatmul.bf16.vlgmr.msra.gmra.mxu0 %v5933_v7  ;;  %v5056_v5 = vld [vmem:[#allocation18 + $0x2ec] sm:$0xf0] }
 0x2c4   :  { %2942 = vmatpush.bf16.msra.mxu2 %v4639_v23  ;;  %2961 = vmatpush.bf16.msrb.mxu0 %v4355_v26  ;;  %v4482_v25 = vld [vmem:[#allocation18 + $0x4d0] sm:$0xf]  ;;  %v4227_v17 = vor.u32 %v5056_v5, %v4226_v8  ;;  %v4871_v8 = vor.u32 %v5212_v46, %v4868_v61  ;;  %v5076_v5 = vld [vmem:[#allocation18 + $0x394] sm:$0xf] }
 0x2c5   :  { %2930 = vmatmul.bf16.vlgmr.msra.gmra.mxu1 %v5937_v15  ;;  %v5120_v10 = vld [vmem:[#allocation18 + $0x4ec] sm:$0xf0]  ;;  %v4196_v46 = vld [vmem:[#allocation18 + $0x2b0] sm:$0xf0] }
 0x2c6   :  { %2974 = vmatpush.bf16.msrb.mxu1 %v4611_v29  ;;  %2949 = vmatpush.bf16.msra.mxu3 %v4067_v16  ;;  %v4738_v11 = vld [vmem:[#allocation18 + $0x6d0] sm:$0xf]  ;;  %v4483_v52 = vor.u32 %v5120_v10, %v4482_v25  ;;  %v4324_v25 = vld [vmem:[#allocation18 + $0x3b0] sm:$0xf0] }
 0x2c7   :  { %2943 = vmatmul.bf16.vlgmr.msra.gmra.mxu2 %v5935_v14  ;;  %v5184_v13 = vld [vmem:[#allocation18 + $0x6ec] sm:$0xf0]  ;;  %v5140_v10 = vld [vmem:[#allocation18 + $0x594] sm:$0xf] }
 0x2c8   :  { %2987 = vmatpush.bf16.msrb.mxu2 %v4867_v48  ;;  %2962 = vmatpush.bf16.msrb.mxu0 %v4323_v36  ;;  %v3938_v31 = vld [vmem:[#allocation18 + $0x90] sm:$0xf]  ;;  %v4739_v19 = vor.u32 %v5184_v13, %v4738_v11  ;;  %v4580_v11 = vld [vmem:[#allocation18 + $0x5b0] sm:$0xf0] }
 0x2c9   :  { %v4984_v18 = vld [vmem:[#allocation18 + $0xac] sm:$0xf0]  ;;  %v5204_v13 = vld [vmem:[#allocation18 + $0x794] sm:$0xf] }
 0x2ca   :  { %2975 = vmatpush.bf16.msrb.mxu1 %v4579_v40  ;;  %2950 = vmatpush.bf16.msra.mxu3 %v4035_v45  ;;  %v4194_v55 = vld [vmem:[#allocation18 + $0x290] sm:$0xf]  ;;  %v3939_v26 = vor.u32 %v4984_v18, %v3938_v31  ;;  %v4327_v31 = vor.u32 %v5076_v5, %v4324_v25  ;;  %v5004_v18 = vld [vmem:[#allocation18 + $0x154] sm:$0xf] }
 0x2cb   :  { %v5112_v22 = vld [vmem:[#allocation18 + $0x4ac] sm:$0xf0]  ;;  %v4195_v27 = vor.u32 %v5048_v20, %v4194_v55  ;;  %v5068_v20 = vld [vmem:[#allocation18 + $0x354] sm:$0xf] }
 0x2cc   :  { %2988 = vmatpush.bf16.msrb.mxu2 %v4835_v35  ;;  %2963 = vmatpush.bf16.msrb.mxu0 %v4291_v47  ;;  %v4706_v23 = vld [vmem:[#allocation18 + $0x690] sm:$0xf]  ;;  %v4451_v48 = vor.u32 %v5112_v22, %v4450_v21  ;;  %v5020_v47 = vld [vmem:[#allocation18 + $0x1d4] sm:$0xf] }
 0x2cd   :  { %v5176_v24 = vld [vmem:[#allocation18 + $0x6ac] sm:$0xf0]  ;;  %v4292_v21 = vld [vmem:[#allocation18 + $0x370] sm:$0xf0] }
 0x2ce   :  { %2976 = vmatpush.bf16.msrb.mxu1 %v4547_v54  ;;  %2951 = vmatpush.bf16.msra.mxu3 %v4003_v56  ;;  %v3906_v28 = vld [vmem:[#allocation18 + $0x50] sm:$0xf]  ;;  %v4707_v30 = vor.u32 %v5176_v24, %v4706_v23  ;;  %v4356_v54 = vld [vmem:[#allocation18 + $0x3f0] sm:$0xf0] }
 0x2cf   :  { %v4976_v29 = vld [vmem:[#allocation18 + $0x6c] sm:$0xf0]  ;;  %v4359_v62 = vor.u32 %v5084_v53, %v4356_v54  ;;  %v5132_v22 = vld [vmem:[#allocation18 + $0x554] sm:$0xf] }
 0x2d0   :  { %2989 = vmatpush.bf16.msrb.mxu2 %v4803_v57  ;;  %2964 = vmatpush.bf16.msrb.mxu0 %v4259_v49  ;;  %v4162_v12 = vld [vmem:[#allocation18 + $0x250] sm:$0xf]  ;;  %v3907_v2 = vor.u32 %v4976_v29, %v3906_v28  ;;  %v5148_v57 = vld [vmem:[#allocation18 + $0x5d4] sm:$0xf]  ;;  %v4103_v49 = vor.u32 %v5020_v47, %v4100_v51  ;;  %v4295_v28 = vor.u32 %v5068_v20, %v4292_v21 }
 0x2d1   :  { %v5040_v32 = vld [vmem:[#allocation18 + $0x26c] sm:$0xf0]  ;;  %v4548_v23 = vld [vmem:[#allocation18 + $0x570] sm:$0xf0] }
 0x2d2   :  { %2977 = vmatpush.bf16.msrb.mxu1 %v4515_v0  ;;  %2952 = vmatpush.bf16.msra.mxu3 %v3971_v1  ;;  %v4418_v33 = vld [vmem:[#allocation18 + $0x450] sm:$0xf]  ;;  %v4163_v38 = vor.u32 %v5040_v32, %v4162_v12  ;;  %v4068_v0 = vld [vmem:[#allocation18 + $0x1b0] sm:$0xf0] }
 0x2d3   :  { %v5104_v34 = vld [vmem:[#allocation18 + $0x46c] sm:$0xf0]  ;;  %v4836_v1 = vld [vmem:[#allocation18 + $0x7b0] sm:$0xf0] }
 0x2d4   :  { %2990 = vmatpush.bf16.msrb.mxu2 %v4771_v4  ;;  %2965 = vmatpush.bf16.msrb.mxu0 %v4227_v17  ;;  %v4674_v50 = vld [vmem:[#allocation18 + $0x650] sm:$0xf]  ;;  %v4419_v3 = vor.u32 %v5104_v34, %v4418_v33  ;;  %v4615_v4 = vor.u32 %v5148_v57, %v4612_v60  ;;  %v4071_v17 = vor.u32 %v5012_v63, %v4068_v0  ;;  %v5196_v24 = vld [vmem:[#allocation18 + $0x754] sm:$0xf] }
 0x2d5   :  { %v5168_v16 = vld [vmem:[#allocation18 + $0x66c] sm:$0xf0]  ;;  %v4839_v55 = vor.u32 %v5204_v13, %v4836_v1  ;;  %v4996_v29 = vld [vmem:[#allocation18 + $0x114] sm:$0xf] }
 0x2d6   :  { %2978 = vmatpush.bf16.msrb.mxu1 %v4483_v52  ;;  %v3874_v36 = vld [vmem:[#allocation18 + $0x10] sm:$0xf]  ;;  %2953 = vmatpush.bf16.msra.mxu3 %v3939_v26  ;;  %v4675_v42 = vor.u32 %v5168_v16, %v4674_v50  ;;  %v4036_v52 = vld [vmem:[#allocation18 + $0x170] sm:$0xf0] }
 0x2d7   :  { %v4968_v40 = vld [vmem:[#allocation18 + $0x2c] sm:$0xf0]  ;;  %v4804_v26 = vld [vmem:[#allocation18 + $0x770] sm:$0xf0] }
 0x2d8   :  { %2991 = vmatpush.bf16.msrb.mxu2 %v4739_v19  ;;  %2966 = vmatpush.bf16.msrb.mxu0 %v4195_v27  ;;  %v4130_v35 = vld [vmem:[#allocation18 + $0x210] sm:$0xf]  ;;  %v3875_v58 = vor.u32 %v4968_v40, %v3874_v36  ;;  %v4583_v19 = vor.u32 %v5140_v10, %v4580_v11  ;;  %v4039_v27 = vor.u32 %v5004_v18, %v4036_v52  ;;  %v5060_v32 = vld [vmem:[#allocation18 + $0x314] sm:$0xf] }
 0x2d9   :  { %v5032_v9 = vld [vmem:[#allocation18 + $0x22c] sm:$0xf0]  ;;  %v4807_v12 = vor.u32 %v5196_v24, %v4804_v26  ;;  %v4260_v33 = vld [vmem:[#allocation18 + $0x330] sm:$0xf0] }
 0x2da   :  { %2979 = vmatpush.bf16.msrb.mxu1 %v4451_v48  ;;  %v4386_v41 = vld [vmem:[#allocation18 + $0x410] sm:$0xf]  ;;  %2954 = vmatpush.bf16.msra.mxu3 %v3907_v2  ;;  %v4131_v59 = vor.u32 %v5032_v9, %v4130_v35  ;;  %v4004_v48 = vld [vmem:[#allocation18 + $0x130] sm:$0xf0] }
 0x2db   :  { %v5096_v43 = vld [vmem:[#allocation18 + $0x42c] sm:$0xf0]  ;;  %v5124_v34 = vld [vmem:[#allocation18 + $0x514] sm:$0xf]  ;;  %v4007_v2 = vor.u32 %v4996_v29, %v4004_v48  ;;  %v5025_v29 = vld [vmem:[#allocation18 + $0x1f4] sm:$0xf0] }
 0x2dc   :  { %2992 = vmatpush.bf16.msrb.mxu2 %v4707_v30  ;;  %v4642_v39 = vld [vmem:[#allocation18 + $0x610] sm:$0xf]  ;;  %2967 = vmatpush.bf16.msrb.mxu0 %v4163_v38  ;;  %v4387_v44 = vor.u32 %v5096_v43, %v4386_v41  ;;  %v4551_v30 = vor.u32 %v5132_v22, %v4548_v23  ;;  %v4516_v50 = vld [vmem:[#allocation18 + $0x530] sm:$0xf0]  ;;  %v4263_v38 = vor.u32 %v5060_v32, %v4260_v33  ;;  %v4362_v48 = vld [vmem:[#allocation18 + $0x3d8] sm:$0xf] }
 0x2dd   :  { %v5160_v45 = vld [vmem:[#allocation18 + $0x62c] sm:$0xf0]  ;;  %v5188_v16 = vld [vmem:[#allocation18 + $0x714] sm:$0xf]  ;;  %v4519_v9 = vor.u32 %v5124_v34, %v4516_v50  ;;  %v5153_v34 = vld [vmem:[#allocation18 + $0x5f4] sm:$0xf0] }
 0x2de   :  { %2980 = vmatpush.bf16.msrb.mxu1 %v4419_v3  ;;  %v4643_v56 = vor.u32 %v5160_v45, %v4642_v39  ;;  %2955 = vmatpush.bf16.msra.mxu3 %v3875_v58  ;;  %v4772_v36 = vld [vmem:[#allocation18 + $0x730] sm:$0xf0]  ;;  %v4874_v50 = vld [vmem:[#allocation18 + $0x7d8] sm:$0xf] }
 0x2df   :  { %v4988_v40 = vld [vmem:[#allocation18 + $0xd4] sm:$0xf]  ;;  %v4775_v3 = vor.u32 %v5188_v16, %v4772_v36  ;;  %v5217_v16 = vld [vmem:[#allocation18 + $0x7f4] sm:$0xf0] }
 0x2e0   :  { %2993 = vmatpush.bf16.msrb.mxu2 %v4675_v42  ;;  %2968 = vmatpush.bf16.msrb.mxu0 %v4131_v59  ;;  %v3972_v35 = vld [vmem:[#allocation18 + $0xf0] sm:$0xf0] }
 0x2e1   :  { %2956 = vmatmul.bf16.vlgmr.msra.gmra.mxu3 %v5931_v6  ;;  %v5052_v42 = vld [vmem:[#allocation18 + $0x2d4] sm:$0xf]  ;;  %v3975_v51 = vor.u32 %v4988_v40, %v3972_v35  ;;  %v4074_v35 = vld [vmem:[#allocation18 + $0x198] sm:$0xf] }
 0x2e2   :  { %2981 = vmatpush.bf16.msrb.mxu1 %v4387_v44  ;;  %3000 = vmatpush.bf16.msrb.mxu3 %v4103_v49  ;;  %v4228_v41 = vld [vmem:[#allocation18 + $0x2f0] sm:$0xf0] }
 0x2e3   :  { %2969 = vmatmul.bf16.vlgmr.msrb.gmra.mxu0 %v5933_v7  ;;  %v5116_v43 = vld [vmem:[#allocation18 + $0x4d4] sm:$0xf]  ;;  %v4231_v53 = vor.u32 %v5052_v42, %v4228_v41  ;;  %v4875_v42 = vor.u32 %v5217_v16, %v4874_v50  ;;  %v4330_v41 = vld [vmem:[#allocation18 + $0x398] sm:$0xf] }
 0x2e4   :  { %2994 = vmatpush.bf16.msrb.mxu2 %v4643_v56  ;;  %3013 = vmatpush.bf16.msra.mxu0 %v4359_v62  ;;  %v4484_v39 = vld [vmem:[#allocation18 + $0x4f0] sm:$0xf0] }
 0x2e5   :  { %2982 = vmatmul.bf16.vlgmr.msrb.gmra.mxu1 %v5937_v15  ;;  %v5180_v45 = vld [vmem:[#allocation18 + $0x6d4] sm:$0xf]  ;;  %v4487_v58 = vor.u32 %v5116_v43, %v4484_v39  ;;  %v5081_v43 = vld [vmem:[#allocation18 + $0x3b4] sm:$0xf0] }
 0x2e6   :  { %3026 = vmatpush.bf16.msra.mxu1 %v4615_v4  ;;  %3001 = vmatpush.bf16.msrb.mxu3 %v4071_v17  ;;  %v4740_v47 = vld [vmem:[#allocation18 + $0x6f0] sm:$0xf0]  ;;  %v4586_v39 = vld [vmem:[#allocation18 + $0x598] sm:$0xf] }
 0x2e7   :  { %2995 = vmatmul.bf16.vlgmr.msrb.gmra.mxu2 %v5935_v14  ;;  %v4980_v54 = vld [vmem:[#allocation18 + $0x94] sm:$0xf]  ;;  %v4743_v59 = vor.u32 %v5180_v45, %v4740_v47  ;;  %v5145_v45 = vld [vmem:[#allocation18 + $0x5b4] sm:$0xf0] }
 0x2e8   :  { %3039 = vmatpush.bf16.msra.mxu2 %v4871_v8  ;;  %3014 = vmatpush.bf16.msra.mxu0 %v4327_v31  ;;  %v3940_v57 = vld [vmem:[#allocation18 + $0xb0] sm:$0xf0]  ;;  %v4842_v47 = vld [vmem:[#allocation18 + $0x798] sm:$0xf] }
 0x2e9   :  { %v5044_v60 = vld [vmem:[#allocation18 + $0x294] sm:$0xf]  ;;  %v3943_v62 = vor.u32 %v4980_v54, %v3940_v57  ;;  %v4331_v54 = vor.u32 %v5081_v43, %v4330_v41  ;;  %v4042_v57 = vld [vmem:[#allocation18 + $0x158] sm:$0xf] }
 0x2ea   :  { %3027 = vmatpush.bf16.msra.mxu1 %v4583_v19  ;;  %3002 = vmatpush.bf16.msrb.mxu3 %v4039_v27  ;;  %v5108_v61 = vld [vmem:[#allocation18 + $0x494] sm:$0xf]  ;;  %v4199_v63 = vor.u32 %v5044_v60, %v4196_v46  ;;  %v4298_v46 = vld [vmem:[#allocation18 + $0x358] sm:$0xf] }
 0x2eb   :  { %v4452_v44 = vld [vmem:[#allocation18 + $0x4b0] sm:$0xf0]  ;;  %v5049_v41 = vld [vmem:[#allocation18 + $0x2b4] sm:$0xf0] }
 0x2ec   :  { %3040 = vmatpush.bf16.msra.mxu2 %v4839_v55  ;;  %3015 = vmatpush.bf16.msra.mxu0 %v4295_v28  ;;  %v5172_v56 = vld [vmem:[#allocation18 + $0x694] sm:$0xf]  ;;  %v4455_v8 = vor.u32 %v5108_v61, %v4452_v44  ;;  %v4106_v28 = vld [vmem:[#allocation18 + $0x1d8] sm:$0xf] }
 0x2ed   :  { %v4708_v49 = vld [vmem:[#allocation18 + $0x6b0] sm:$0xf0]  ;;  %v5073_v61 = vld [vmem:[#allocation18 + $0x374] sm:$0xf0] }
 0x2ee   :  { %3028 = vmatpush.bf16.msra.mxu1 %v4551_v30  ;;  %3003 = vmatpush.bf16.msrb.mxu3 %v4007_v2  ;;  %v4972_v0 = vld [vmem:[#allocation18 + $0x54] sm:$0xf]  ;;  %v4711_v5 = vor.u32 %v5172_v56, %v4708_v49  ;;  %v5089_v30 = vld [vmem:[#allocation18 + $0x3f4] sm:$0xf0] }
 0x2ef   :  { %v3908_v4 = vld [vmem:[#allocation18 + $0x70] sm:$0xf0]  ;;  %v4363_v40 = vor.u32 %v5089_v30, %v4362_v48  ;;  %v4554_v44 = vld [vmem:[#allocation18 + $0x558] sm:$0xf] }
 0x2f0   :  { %3041 = vmatpush.bf16.msra.mxu2 %v4807_v12  ;;  %3016 = vmatpush.bf16.msra.mxu0 %v4263_v38  ;;  %v5036_v25 = vld [vmem:[#allocation18 + $0x254] sm:$0xf]  ;;  %v3911_v18 = vor.u32 %v4972_v0, %v3908_v4  ;;  %v4618_v12 = vld [vmem:[#allocation18 + $0x5d8] sm:$0xf]  ;;  %v4107_v38 = vor.u32 %v5025_v29, %v4106_v28  ;;  %v5963_v0 = vld [vmem:[#allocation19] sm:$0xff] }
 0x2f1   :  { %v4164_v10 = vld [vmem:[#allocation18 + $0x270] sm:$0xf0]  ;;  %v5137_v56 = vld [vmem:[#allocation18 + $0x574] sm:$0xf0] }
 0x2f2   :  { %3029 = vmatpush.bf16.msra.mxu1 %v4519_v9  ;;  %3004 = vmatpush.bf16.msrb.mxu3 %v3975_v51  ;;  %v5100_v11 = vld [vmem:[#allocation18 + $0x454] sm:$0xf]  ;;  %v4167_v52 = vor.u32 %v5036_v25, %v4164_v10  ;;  %v5017_v9 = vld [vmem:[#allocation18 + $0x1b4] sm:$0xf0] }
 0x2f3   :  { %v4420_v13 = vld [vmem:[#allocation18 + $0x470] sm:$0xf0]  ;;  %v5209_v51 = vld [vmem:[#allocation18 + $0x7b4] sm:$0xf0] }
 0x2f4   :  { %3042 = vmatpush.bf16.msra.mxu2 %v4775_v3  ;;  %3017 = vmatpush.bf16.msra.mxu0 %v4231_v53  ;;  %v5164_v1 = vld [vmem:[#allocation18 + $0x654] sm:$0xf]  ;;  %v4423_v21 = vor.u32 %v5100_v11, %v4420_v13  ;;  %v4619_v3 = vor.u32 %v5153_v34, %v4618_v12  ;;  %v4075_v53 = vor.u32 %v5017_v9, %v4074_v35  ;;  %v4810_v49 = vld [vmem:[#allocation18 + $0x758] sm:$0xf] }
 0x2f5   :  { %v4676_v17 = vld [vmem:[#allocation18 + $0x670] sm:$0xf0]  ;;  %v4843_v60 = vor.u32 %v5209_v51, %v4842_v47  ;;  %v4010_v25 = vld [vmem:[#allocation18 + $0x118] sm:$0xf]  ;;  %v4555_v13 = vor.u32 %v5137_v56, %v4554_v44 }
 0x2f6   :  { %3030 = vmatpush.bf16.msra.mxu1 %v4487_v58  ;;  %v4964_v31 = vld [vmem:[#allocation18 + $0x14] sm:$0xf]  ;;  %3005 = vmatpush.bf16.msrb.mxu3 %v3943_v62  ;;  %v4679_v22 = vor.u32 %v5164_v1, %v4676_v17  ;;  %v5009_v58 = vld [vmem:[#allocation18 + $0x174] sm:$0xf0] }
 0x2f7   :  { %v3876_v19 = vld [vmem:[#allocation18 + $0x30] sm:$0xf0]  ;;  %v5201_v62 = vld [vmem:[#allocation18 + $0x774] sm:$0xf0]  ;;  %v4043_v4 = vor.u32 %v5009_v58, %v4042_v57 }
 0x2f8   :  { %3043 = vmatpush.bf16.msra.mxu2 %v4743_v59  ;;  %3018 = vmatpush.bf16.msra.mxu0 %v4199_v63  ;;  %v5028_v55 = vld [vmem:[#allocation18 + $0x214] sm:$0xf]  ;;  %v3879_v32 = vor.u32 %v4964_v31, %v3876_v19  ;;  %v4587_v59 = vor.u32 %v5145_v45, %v4586_v39  ;;  %v5001_v10 = vld [vmem:[#allocation18 + $0x134] sm:$0xf0]  ;;  %v4811_v1 = vor.u32 %v5201_v62, %v4810_v49 }
 0x2f9   :  { %v4132_v20 = vld [vmem:[#allocation18 + $0x230] sm:$0xf0]  ;;  %v2762_v63 = vpop.f32.mrf.mxu0  ;;  %v4266_v11 = vld [vmem:[#allocation18 + $0x318] sm:$0xf] }
 0x2fa   :  { %3031 = vmatpush.bf16.msra.mxu1 %v4455_v8  ;;  %v5092_v23 = vld [vmem:[#allocation18 + $0x414] sm:$0xf]  ;;  %3006 = vmatpush.bf16.msrb.mxu3 %v3911_v18  ;;  %v4135_v33 = vor.u32 %v5028_v55, %v4132_v20  ;;  %v4299_v8 = vor.u32 %v5073_v61, %v4298_v46  ;;  %v5065_v17 = vld [vmem:[#allocation18 + $0x334] sm:$0xf0]  ;;  %v1444_v55 = vperm.slane %v5963_v0, 0  ;;  %v4011_v20 = vor.u32 %v5001_v10, %v4010_v25 }
 0x2fb   :  { %v4388_v24 = vld [vmem:[#allocation18 + $0x430] sm:$0xf0]  ;;  %v4522_v31 = vld [vmem:[#allocation18 + $0x518] sm:$0xf] }
 0x2fc   :  { %3044 = vmatpush.bf16.msra.mxu2 %v4711_v5  ;;  %v5156_v26 = vld [vmem:[#allocation18 + $0x614] sm:$0xf]  ;;  %3019 = vmatpush.bf16.msra.mxu0 %v4167_v52  ;;  %v4391_v36 = vor.u32 %v5092_v23, %v4388_v24  ;;  %v2775_v5 = vpop.f32.mrf.mxu1  ;;  %v5129_v18 = vld [vmem:[#allocation18 + $0x534] sm:$0xf0] }
 0x2fd   :  { %v4644_v27 = vld [vmem:[#allocation18 + $0x630] sm:$0xf0]  ;;  %v4778_v52 = vld [vmem:[#allocation18 + $0x718] sm:$0xf]  ;;  %v4523_v24 = vor.u32 %v5129_v18, %v4522_v31 }
 0x2fe   :  { %3032 = vmatpush.bf16.msra.mxu1 %v4423_v21  ;;  %v4647_v2 = vor.u32 %v5156_v26, %v4644_v27  ;;  %3007 = vmatpush.bf16.msrb.mxu3 %v3879_v32  ;;  %v5193_v19 = vld [vmem:[#allocation18 + $0x734] sm:$0xf0]  ;;  %v4267_v21 = vor.u32 %v5065_v17, %v4266_v11 }
 0x2ff   :  { %v4993_v23 = vld [vmem:[#allocation18 + $0xf4] sm:$0xf0]  ;;  %v4779_v26 = vor.u32 %v5193_v19, %v4778_v52  ;;  %v2749_v27 = vpop.f32.mrf.mxu3 }
 0x300   :  { %3045 = vmatpush.bf16.msra.mxu2 %v4679_v22  ;;  %3020 = vmatpush.bf16.msra.mxu0 %v4135_v33  ;;  %v3978_v22 = vld [vmem:[#allocation18 + $0xd8] sm:$0xf]  ;;  %v2750_v30 = vadd.f32 %v2749_v27, %v1444_v55  ;;  %v2788_v12 = vpop.f32.mrf.mxu2  ;;  %v4364_v27 = vld [vmem:[#allocation18 + $0x3f8] sm:$0xf0] }
 0x301   :  { %3008 = vmatmul.bf16.vlgmr.msrb.gmra.mxu3 %v5931_v6  ;;  %v4234_v28 = vld [vmem:[#allocation18 + $0x2d8] sm:$0xf]  ;;  %v2764_v50 = vpop.f32.mrf.mxu0 }
 0x302   :  { %3033 = vmatpush.bf16.msra.mxu1 %v4391_v36  ;;  %3052 = vmatpush.bf16.msra.mxu3 %v4107_v38  ;;  %v5057_v29 = vld [vmem:[#allocation18 + $0x2f4] sm:$0xf0]  ;;  %v2763_v16 = vadd.f32 %v2762_v63, %v2750_v30  ;;  %v3979_v36 = vor.u32 %v4993_v23, %v3978_v22  ;;  %v5021_v22 = vld [vmem:[#allocation18 + $0x1dc] sm:$0xf] }
 0x303   :  { %3021 = vmatmul.bf16.vlgmr.msra.gmra.mxu0 %v5933_v7  ;;  %v4490_v48 = vld [vmem:[#allocation18 + $0x4d8] sm:$0xf]  ;;  %v4108_v23 = vld [vmem:[#allocation18 + $0x1f8] sm:$0xf0] }
 0x304   :  { %3046 = vmatpush.bf16.msra.mxu2 %v4647_v2  ;;  %3065 = vmatpush.bf16.msrb.mxu0 %v4363_v40  ;;  %v5121_v32 = vld [vmem:[#allocation18 + $0x4f4] sm:$0xf0]  ;;  %v4235_v2 = vor.u32 %v5057_v29, %v4234_v28  ;;  %v2777_v38 = vpop.f32.mrf.mxu1  ;;  %v2776_v39 = vadd.f32 %v2775_v5, %v2763_v16  ;;  %v5149_v28 = vld [vmem:[#allocation18 + $0x5dc] sm:$0xf]  ;;  %v4111_v16 = vor.u32 %v5021_v22, %v4108_v23 }
 0x305   :  { %3034 = vmatmul.bf16.vlgmr.msra.gmra.mxu1 %v5937_v15  ;;  %v4746_v33 = vld [vmem:[#allocation18 + $0x6d8] sm:$0xf]  ;;  %v4491_v9 = vor.u32 %v5121_v32, %v4490_v48  ;;  %v4620_v30 = vld [vmem:[#allocation18 + $0x5f8] sm:$0xf0] }
 0x306   :  { %3078 = vmatpush.bf16.msrb.mxu1 %v4619_v3  ;;  %3053 = vmatpush.bf16.msra.mxu3 %v4075_v53  ;;  %v5185_v34 = vld [vmem:[#allocation18 + $0x6f4] sm:$0xf0]  ;;  %v5966_v53 = vadd.f32 %v2788_v12, %v2776_v39  ;;  %v5213_v12 = vld [vmem:[#allocation18 + $0x7dc] sm:$0xf] }
 0x307   :  { %3047 = vmatmul.bf16.vlgmr.msra.gmra.mxu2 %v5935_v14  ;;  %v3946_v40 = vld [vmem:[#allocation18 + $0x98] sm:$0xf]  ;;  %v4747_v3 = vor.u32 %v5185_v34, %v4746_v33  ;;  %v2751_v61 = vpop.f32.mrf.mxu3  ;;  %v4876_v32 = vld [vmem:[#allocation18 + $0x7f8] sm:$0xf0] }
 0x308   :  { %3091 = vmatpush.bf16.msrb.mxu2 %v4875_v42  ;;  %3066 = vmatpush.bf16.msrb.mxu0 %v4331_v54  ;;  %v4985_v35 = vld [vmem:[#allocation18 + $0xb4] sm:$0xf0]  ;;  %v2790_v62 = vpop.f32.mrf.mxu2  ;;  %v5141_v39 = vld [vmem:[#allocation18 + $0x59c] sm:$0xf] }
 0x309   :  { %v4202_v42 = vld [vmem:[#allocation18 + $0x298] sm:$0xf]  ;;  %v3947_v54 = vor.u32 %v4985_v35, %v3946_v40  ;;  %v2814_v5 = vpop.f32.mrf.mxu0  ;;  %v5013_v40 = vld [vmem:[#allocation18 + $0x19c] sm:$0xf] }
 0x30a   :  { %3079 = vmatpush.bf16.msrb.mxu1 %v4587_v59  ;;  %3054 = vmatpush.bf16.msra.mxu3 %v4043_v4  ;;  %v4458_v43 = vld [vmem:[#allocation18 + $0x498] sm:$0xf]  ;;  %v4203_v57 = vor.u32 %v5049_v41, %v4202_v42  ;;  %v4076_v35 = vld [vmem:[#allocation18 + $0x1b8] sm:$0xf0] }
 0x30b   :  { %v5113_v45 = vld [vmem:[#allocation18 + $0x4b4] sm:$0xf0]  ;;  %v5077_v41 = vld [vmem:[#allocation18 + $0x39c] sm:$0xf] }
 0x30c   :  { %3092 = vmatpush.bf16.msrb.mxu2 %v4843_v60  ;;  %3067 = vmatpush.bf16.msrb.mxu0 %v4299_v8  ;;  %v4714_v47 = vld [vmem:[#allocation18 + $0x698] sm:$0xf]  ;;  %v4459_v60 = vor.u32 %v5113_v45, %v4458_v43  ;;  %v4332_v43 = vld [vmem:[#allocation18 + $0x3b8] sm:$0xf0] }
 0x30d   :  { %v5177_v51 = vld [vmem:[#allocation18 + $0x6b4] sm:$0xf0]  ;;  %v4044_v61 = vld [vmem:[#allocation18 + $0x178] sm:$0xf0] }
 0x30e   :  { %3080 = vmatpush.bf16.msrb.mxu1 %v4555_v13  ;;  %3055 = vmatpush.bf16.msra.mxu3 %v4011_v20  ;;  %v3914_v58 = vld [vmem:[#allocation18 + $0x58] sm:$0xf]  ;;  %v4715_v46 = vor.u32 %v5177_v51, %v4714_v47  ;;  %v4588_v51 = vld [vmem:[#allocation18 + $0x5b8] sm:$0xf0] }
 0x30f   :  { %v4977_v59 = vld [vmem:[#allocation18 + $0x74] sm:$0xf0]  ;;  %v2801_v50 = vpop.f32.mrf.mxu3  ;;  %v4300_v62 = vld [vmem:[#allocation18 + $0x378] sm:$0xf0] }
 0x310   :  { %3093 = vmatpush.bf16.msrb.mxu2 %v4811_v1  ;;  %3068 = vmatpush.bf16.msrb.mxu0 %v4267_v21  ;;  %v4170_v44 = vld [vmem:[#allocation18 + $0x258] sm:$0xf]  ;;  %v3915_v11 = vor.u32 %v4977_v59, %v3914_v58  ;;  %v2827_v1 = vpop.f32.mrf.mxu1  ;;  %v2840_v38 = vpop.f32.mrf.mxu2  ;;  %v4079_v59 = vor.u32 %v5013_v40, %v4076_v35  ;;  %v5189_v22 = vld [vmem:[#allocation18 + $0x71c] sm:$0xf] }
 0x311   :  { %v5041_v56 = vld [vmem:[#allocation18 + $0x274] sm:$0xf0]  ;;  %v2816_v42 = vpop.f32.mrf.mxu0  ;;  %v4780_v23 = vld [vmem:[#allocation18 + $0x738] sm:$0xf0] }
 0x312   :  { %3081 = vmatpush.bf16.msrb.mxu1 %v4523_v24  ;;  %3056 = vmatpush.bf16.msra.mxu3 %v3979_v36  ;;  %v4426_v49 = vld [vmem:[#allocation18 + $0x458] sm:$0xf]  ;;  %v4171_v13 = vor.u32 %v5041_v56, %v4170_v44  ;;  %v1445_v24 = vperm.slane %v5963_v0, 1  ;;  %v4591_v44 = vor.u32 %v5141_v39, %v4588_v51  ;;  %v4981_v35 = vld [vmem:[#allocation18 + $0x9c] sm:$0xf] }
 0x313   :  { %v5105_v63 = vld [vmem:[#allocation18 + $0x474] sm:$0xf0]  ;;  %v4204_v39 = vld [vmem:[#allocation18 + $0x2b8] sm:$0xf0] }
 0x314   :  { %3094 = vmatpush.bf16.msrb.mxu2 %v4779_v26  ;;  %3069 = vmatpush.bf16.msrb.mxu0 %v4235_v2  ;;  %v4682_v4 = vld [vmem:[#allocation18 + $0x658] sm:$0xf]  ;;  %v4427_v52 = vor.u32 %v5105_v63, %v4426_v49  ;;  %v5085_v26 = vld [vmem:[#allocation18 + $0x3dc] sm:$0xf]  ;;  %v2802_v2 = vadd.f32 %v2801_v50, %v1445_v24 }
 0x315   :  { %v5169_v8 = vld [vmem:[#allocation18 + $0x674] sm:$0xf0]  ;;  %v4367_v36 = vor.u32 %v5085_v26, %v4364_v27  ;;  %v5069_v49 = vld [vmem:[#allocation18 + $0x35c] sm:$0xf] }
 0x316   :  { %3082 = vmatpush.bf16.msrb.mxu1 %v4491_v9  ;;  %v3882_v25 = vld [vmem:[#allocation18 + $0x18] sm:$0xf]  ;;  %3057 = vmatpush.bf16.msra.mxu3 %v3947_v54  ;;  %v4683_v19 = vor.u32 %v5169_v8, %v4682_v4  ;;  %v4623_v9 = vor.u32 %v5149_v28, %v4620_v30  ;;  %v2815_v45 = vadd.f32 %v2814_v5, %v2802_v2  ;;  %v5205_v54 = vld [vmem:[#allocation18 + $0x79c] sm:$0xf]  ;;  %v1446_v2 = vperm.slane %v5963_v0, 2 }
 0x317   :  { %v4969_v10 = vld [vmem:[#allocation18 + $0x34] sm:$0xf0]  ;;  %v5133_v63 = vld [vmem:[#allocation18 + $0x55c] sm:$0xf] }
 0x318   :  { %3095 = vmatpush.bf16.msrb.mxu2 %v4747_v3  ;;  %3070 = vmatpush.bf16.msrb.mxu0 %v4203_v57  ;;  %v4138_v17 = vld [vmem:[#allocation18 + $0x218] sm:$0xf]  ;;  %v3883_v29 = vor.u32 %v4969_v10, %v3882_v25  ;;  %v4879_v3 = vor.u32 %v5213_v12, %v4876_v32  ;;  %v2829_v47 = vpop.f32.mrf.mxu1  ;;  %v4844_v57 = vld [vmem:[#allocation18 + $0x7b8] sm:$0xf0]  ;;  %v2828_v58 = vadd.f32 %v2827_v1, %v2815_v45  ;;  %v2803_v10 = vpop.f32.mrf.mxu3 }
 0x319   :  { %v5033_v31 = vld [vmem:[#allocation18 + $0x234] sm:$0xf0]  ;;  %v4847_v56 = vor.u32 %v5205_v54, %v4844_v57  ;;  %v4556_v8 = vld [vmem:[#allocation18 + $0x578] sm:$0xf0]  ;;  %v2842_v1 = vpop.f32.mrf.mxu2  ;;  %v4783_v32 = vor.u32 %v5189_v22, %v4780_v23 }
 0x31a   :  { %v4394_v18 = vld [vmem:[#allocation18 + $0x418] sm:$0xf]  ;;  %3083 = vmatpush.bf16.msrb.mxu1 %v4459_v60  ;;  %3058 = vmatpush.bf16.msra.mxu3 %v3915_v11  ;;  %v4139_v48 = vor.u32 %v5033_v31, %v4138_v17  ;;  %v4335_v60 = vor.u32 %v5077_v41, %v4332_v43  ;;  %v5969_v4 = vadd.f32 %v2840_v38, %v2828_v58  ;;  %v5197_v5 = vld [vmem:[#allocation18 + $0x75c] sm:$0xf] }
 0x31b   :  { %v5097_v55 = vld [vmem:[#allocation18 + $0x434] sm:$0xf0]  ;;  %v4812_v25 = vld [vmem:[#allocation18 + $0x778] sm:$0xf0] }
 0x31c   :  { %3096 = vmatpush.bf16.msrb.mxu2 %v4715_v46  ;;  %v4650_v20 = vld [vmem:[#allocation18 + $0x618] sm:$0xf]  ;;  %3071 = vmatpush.bf16.msrb.mxu0 %v4171_v13  ;;  %v4395_v33 = vor.u32 %v5097_v55, %v4394_v18  ;;  %v5005_v46 = vld [vmem:[#allocation18 + $0x15c] sm:$0xf]  ;;  %v4303_v13 = vor.u32 %v5069_v49, %v4300_v62  ;;  %v4559_v18 = vor.u32 %v5133_v63, %v4556_v8 }
 0x31d   :  { %v5161_v21 = vld [vmem:[#allocation18 + $0x634] sm:$0xf0]  ;;  %v4047_v11 = vor.u32 %v5005_v46, %v4044_v61  ;;  %v4997_v17 = vld [vmem:[#allocation18 + $0x11c] sm:$0xf] }
 0x31e   :  { %3084 = vmatpush.bf16.msrb.mxu1 %v4427_v52  ;;  %v4651_v34 = vor.u32 %v5161_v21, %v4650_v20  ;;  %3059 = vmatpush.bf16.msra.mxu3 %v3883_v29  ;;  %v4012_v31 = vld [vmem:[#allocation18 + $0x138] sm:$0xf0]  ;;  %v4815_v52 = vor.u32 %v5197_v5, %v4812_v25 }
 0x31f   :  { %v4268_v55 = vld [vmem:[#allocation18 + $0x338] sm:$0xf0]  ;;  %v4015_v27 = vor.u32 %v4997_v17, %v4012_v31 }
 0x320   :  { %3097 = vmatpush.bf16.msrb.mxu2 %v4683_v19  ;;  %3072 = vmatpush.bf16.msrb.mxu0 %v4139_v48  ;;  %v5061_v19 = vld [vmem:[#allocation18 + $0x31c] sm:$0xf]  ;;  %v2866_v24 = vpop.f32.mrf.mxu0 }
 0x321   :  { %3060 = vmatmul.bf16.vlgmr.msra.gmra.mxu3 %v5931_v6  ;;  %v5125_v20 = vld [vmem:[#allocation18 + $0x51c] sm:$0xf]  ;;  %v4271_v28 = vor.u32 %v5061_v19, %v4268_v55 }
 0x322   :  { %3085 = vmatpush.bf16.msrb.mxu1 %v4395_v33  ;;  %3104 = vmatpush.bf16.msrb.mxu3 %v4111_v16  ;;  %v4524_v21 = vld [vmem:[#allocation18 + $0x538] sm:$0xf0]  ;;  %v2879_v26 = vpop.f32.mrf.mxu1 }
 0x323   :  { %3073 = vmatmul.bf16.vlgmr.msrb.gmra.mxu0 %v5933_v7  ;;  %v4989_v29 = vld [vmem:[#allocation18 + $0xdc] sm:$0xf]  ;;  %v4527_v12 = vor.u32 %v5125_v20, %v4524_v21 }
 0x324   :  { %3098 = vmatpush.bf16.msrb.mxu2 %v4651_v34  ;;  %3117 = vmatpush.bf16.msra.mxu0 %v4367_v36  ;;  %v3980_v48 = vld [vmem:[#allocation18 + $0xf8] sm:$0xf0]  ;;  %v2853_v41 = vpop.f32.mrf.mxu3 }
 0x325   :  { %3086 = vmatmul.bf16.vlgmr.msrb.gmra.mxu1 %v5937_v15  ;;  %v5053_v30 = vld [vmem:[#allocation18 + $0x2dc] sm:$0xf]  ;;  %v3983_v38 = vor.u32 %v4989_v29, %v3980_v48  ;;  %v2854_v47 = vadd.f32 %v2853_v41, %v1446_v2 }
 0x326   :  { %3130 = vmatpush.bf16.msra.mxu1 %v4623_v9  ;;  %3105 = vmatpush.bf16.msrb.mxu3 %v4079_v59  ;;  %v4236_v33 = vld [vmem:[#allocation18 + $0x2f8] sm:$0xf0] }
 0x327   :  { %3099 = vmatmul.bf16.vlgmr.msrb.gmra.mxu2 %v5935_v14  ;;  %v5117_v34 = vld [vmem:[#allocation18 + $0x4dc] sm:$0xf]  ;;  %v4239_v40 = vor.u32 %v5053_v30, %v4236_v33 }
 0x328   :  { %3143 = vmatpush.bf16.msra.mxu2 %v4879_v3  ;;  %3118 = vmatpush.bf16.msra.mxu0 %v4335_v60  ;;  %v4492_v50 = vld [vmem:[#allocation18 + $0x4f8] sm:$0xf0]  ;;  %v2868_v59 = vpop.f32.mrf.mxu0  ;;  %v2867_v60 = vadd.f32 %v2866_v24, %v2854_v47 }
 0x329   :  { %v5181_v16 = vld [vmem:[#allocation18 + $0x6dc] sm:$0xf]  ;;  %v4495_v3 = vor.u32 %v5117_v34, %v4492_v50  ;;  %v1447_v50 = vperm.slane %v5963_v0, 3 }
 0x32a   :  { %3131 = vmatpush.bf16.msra.mxu1 %v4591_v44  ;;  %3106 = vmatpush.bf16.msrb.mxu3 %v4047_v11  ;;  %v4748_v36 = vld [vmem:[#allocation18 + $0x6f8] sm:$0xf0]  ;;  %v2892_v51 = vpop.f32.mrf.mxu2  ;;  %v2881_v46 = vpop.f32.mrf.mxu1  ;;  %v2880_v10 = vadd.f32 %v2879_v26, %v2867_v60 }
 0x32b   :  { %v3948_v9 = vld [vmem:[#allocation18 + $0xb8] sm:$0xf0]  ;;  %v4751_v42 = vor.u32 %v5181_v16, %v4748_v36 }
 0x32c   :  { %3144 = vmatpush.bf16.msra.mxu2 %v4847_v56  ;;  %3119 = vmatpush.bf16.msra.mxu0 %v4303_v13  ;;  %v5045_v43 = vld [vmem:[#allocation18 + $0x29c] sm:$0xf]  ;;  %v3951_v61 = vor.u32 %v4981_v35, %v3948_v9  ;;  %v5976_v17 = vadd.f32 %v2892_v51, %v2880_v10  ;;  %v2855_v21 = vpop.f32.mrf.mxu3 }
 0x32d   :  { %v5109_v45 = vld [vmem:[#allocation18 + $0x49c] sm:$0xf]  ;;  %v4207_v44 = vor.u32 %v5045_v43, %v4204_v39 }
 0x32e   :  { %3132 = vmatpush.bf16.msra.mxu1 %v4559_v18  ;;  %3107 = vmatpush.bf16.msrb.mxu3 %v4015_v27  ;;  %v4460_v54 = vld [vmem:[#allocation18 + $0x4b8] sm:$0xf0] }
 0x32f   :  { %v5173_v57 = vld [vmem:[#allocation18 + $0x69c] sm:$0xf]  ;;  %v4463_v62 = vor.u32 %v5109_v45, %v4460_v54 }
 0x330   :  { %3145 = vmatpush.bf16.msra.mxu2 %v4815_v52  ;;  %3120 = vmatpush.bf16.msra.mxu0 %v4271_v28  ;;  %v4716_v58 = vld [vmem:[#allocation18 + $0x6b8] sm:$0xf0] }
 0x331   :  { %v4973_v56 = vld [vmem:[#allocation18 + $0x5c] sm:$0xf]  ;;  %v4719_v63 = vor.u32 %v5173_v57, %v4716_v58 }
 0x332   :  { %3133 = vmatpush.bf16.msra.mxu1 %v4527_v12  ;;  %3108 = vmatpush.bf16.msrb.mxu3 %v3983_v38  ;;  %v3916_v49 = vld [vmem:[#allocation18 + $0x78] sm:$0xf0]  ;;  %v2894_v26 = vpop.f32.mrf.mxu2 }
 0x333   :  { %v5037_v8 = vld [vmem:[#allocation18 + $0x25c] sm:$0xf]  ;;  %v3919_v31 = vor.u32 %v4973_v56, %v3916_v49 }
 0x334   :  { %3146 = vmatpush.bf16.msra.mxu2 %v4783_v32  ;;  %3121 = vmatpush.bf16.msra.mxu0 %v4239_v40  ;;  %v4172_v5 = vld [vmem:[#allocation18 + $0x278] sm:$0xf0] }
 0x335   :  { %v5101_v25 = vld [vmem:[#allocation18 + $0x45c] sm:$0xf]  ;;  %v4175_v18 = vor.u32 %v5037_v8, %v4172_v5 }
 0x336   :  { %3134 = vmatpush.bf16.msra.mxu1 %v4495_v3  ;;  %v4428_v11 = vld [vmem:[#allocation18 + $0x478] sm:$0xf0]  ;;  %3109 = vmatpush.bf16.msrb.mxu3 %v3951_v61  ;;  %v1449_v61 = vperm.slane %v5963_v0, 5 }
 0x337   :  { %v5165_v13 = vld [vmem:[#allocation18 + $0x65c] sm:$0xf]  ;;  %v4431_v55 = vor.u32 %v5101_v25, %v4428_v11 }
 0x338   :  { %3147 = vmatpush.bf16.msra.mxu2 %v4751_v42  ;;  %v4684_v1 = vld [vmem:[#allocation18 + $0x678] sm:$0xf0]  ;;  %3122 = vmatpush.bf16.msra.mxu0 %v4207_v44 }
 0x339   :  { %v4965_v52 = vld [vmem:[#allocation18 + $0x1c] sm:$0xf]  ;;  %v4687_v20 = vor.u32 %v5165_v13, %v4684_v1  ;;  %v3168_v1 = vrot.slane %v5976_v17, 4 }
 0x33a   :  { %v3884_v19 = vld [vmem:[#allocation18 + $0x38] sm:$0xf0]  ;;  %3135 = vmatpush.bf16.msra.mxu1 %v4463_v62  ;;  %3110 = vmatpush.bf16.msrb.mxu3 %v3919_v31  ;;  %v3162_v31 = vrot.slane %v5969_v4, 4 }
 0x33b   :  { %v5029_v22 = vld [vmem:[#allocation18 + $0x21c] sm:$0xf]  ;;  %v3887_v48 = vor.u32 %v4965_v52, %v3884_v19  ;;  %v3169_v19 = vadd.f32 %v3168_v1, %v5976_v17 }
 0x33c   :  { %3148 = vmatpush.bf16.msra.mxu2 %v4719_v63  ;;  %v4140_v23 = vld [vmem:[#allocation18 + $0x238] sm:$0xf0]  ;;  %3123 = vmatpush.bf16.msra.mxu0 %v4175_v18  ;;  %v3163_v21 = vadd.f32 %v3162_v31, %v5969_v4 }
 0x33d   :  { %v5093_v24 = vld [vmem:[#allocation18 + $0x41c] sm:$0xf]  ;;  %v4143_v30 = vor.u32 %v5029_v22, %v4140_v23 }
 0x33e   :  { %v4396_v27 = vld [vmem:[#allocation18 + $0x438] sm:$0xf0]  ;;  %3136 = vmatpush.bf16.msra.mxu1 %v4431_v55  ;;  %3111 = vmatpush.bf16.msrb.mxu3 %v3887_v48 }
 0x33f   :  { %v5157_v28 = vld [vmem:[#allocation18 + $0x61c] sm:$0xf]  ;;  %v4399_v12 = vor.u32 %v5093_v24, %v4396_v27  ;;  %v3170_v24 = vrot.slane %v3169_v19, 2 }
 0x340   :  { %v4652_v29 = vld [vmem:[#allocation18 + $0x638] sm:$0xf0]  ;;  %3149 = vmatpush.bf16.msra.mxu2 %v4687_v20  ;;  %3124 = vmatpush.bf16.msra.mxu0 %v4143_v30  ;;  %v2918_v33 = vpop.f32.mrf.mxu0  ;;  %v3156_v20 = vrot.slane %v5966_v53, 4 }
 0x341   :  { %v4655_v32 = vor.u32 %v5157_v28, %v4652_v29  ;;  %3112 = vmatmul.bf16.vlgmr.msrb.gmra.mxu3 %v5931_v6  ;;  %v3164_v29 = vrot.slane %v3163_v21, 2 }
 0x342   :  { %3137 = vmatpush.bf16.msra.mxu1 %v4399_v12  ;;  %v2931_v34 = vpop.f32.mrf.mxu1  ;;  %v3157_v28 = vadd.f32 %v3156_v20, %v5966_v53 }
 0x343   :  { %3125 = vmatmul.bf16.vlgmr.msra.gmra.mxu0 %v5933_v7 }
 0x344   :  { %3150 = vmatpush.bf16.msra.mxu2 %v4655_v32  ;;  %v2905_v16 = vpop.f32.mrf.mxu3  ;;  %v3171_v32 = vadd.f32 %v3170_v24, %v3169_v19 }
 0x345   :  { %3138 = vmatmul.bf16.vlgmr.msra.gmra.mxu1 %v5937_v15  ;;  %v2906_v36 = vadd.f32 %v2905_v16, %v1447_v50  ;;  %v1448_v15 = vperm.slane %v5963_v0, 4  ;;  %v3158_v50 = vrot.slane %v3157_v28, 2  ;;  %v3165_v16 = vadd.f32 %v3164_v29, %v3163_v21 }
 0x347   :  { %3151 = vmatmul.bf16.vlgmr.msra.gmra.mxu2 %v5935_v14  ;;  %v2919_v40 = vadd.f32 %v2918_v33, %v2906_v36 }
 0x348   :  { %v2920_v38 = vpop.f32.mrf.mxu0 }
 0x349   :  { %v2932_v9 = vadd.f32 %v2931_v34, %v2919_v40  ;;  %v1450_v34 = vperm.slane %v5963_v0, 6  ;;  %v3172_v40 = vrot.slane %v3171_v32, 1 }
 0x34a   :  { %v2944_v2 = vpop.f32.mrf.mxu2  ;;  %v2933_v35 = vpop.f32.mrf.mxu1 }
 0x34b   :  { %v5983_v3 = vadd.f32 %v2944_v2, %v2932_v9 }
 0x34c   :  { %v2907_v6 = vpop.f32.mrf.mxu3 }
 0x34d   :  { %v3174_v13 = vrot.slane %v5983_v3, 4 }
 0x34f   :  { %v3175_v18 = vadd.f32 %v3174_v13, %v5983_v3 }
 0x351   :  { %v3176_v22 = vrot.slane %v3175_v18, 2 }
 0x352   :  { %v2946_v42 = vpop.f32.mrf.mxu2 }
 0x353   :  { %v3177_v30 = vadd.f32 %v3176_v22, %v3175_v18 }
 0x355   :  { %v3178_v36 = vrot.slane %v3177_v30, 1 }
 0x360   :  { %v2970_v7 = vpop.f32.mrf.mxu0 }
 0x362   :  { %v2983_v41 = vpop.f32.mrf.mxu1 }
 0x364   :  { %v2957_v14 = vpop.f32.mrf.mxu3 }
 0x365   :  { %v2958_v43 = vadd.f32 %v2957_v14, %v1448_v15 }
 0x367   :  { %v2971_v47 = vadd.f32 %v2970_v7, %v2958_v43  ;;  %v3159_v7 = vadd.f32 %v3158_v50, %v3157_v28  ;;  %v3179_v43 = vadd.f32 %v3178_v36, %v3177_v30 }
 0x368   :  { %v2972_v45 = vpop.f32.mrf.mxu0 }
 0x369   :  { %v2984_v54 = vadd.f32 %v2983_v41, %v2971_v47  ;;  %v3166_v41 = vrot.slane %v3165_v16, 1  ;;  %v3173_v45 = vadd.f32 %v3172_v40, %v3171_v32 }
 0x36a   :  { %v2996_v39 = vpop.f32.mrf.mxu2  ;;  %v2985_v51 = vpop.f32.mrf.mxu1 }
 0x36b   :  { %v5986_v57 = vadd.f32 %v2996_v39, %v2984_v54  ;;  %v3160_v54 = vrot.slane %v3159_v7, 1 }
 0x36c   :  { %v2959_v58 = vpop.f32.mrf.mxu3 }
 0x36d   :  { %v3180_v55 = vrot.slane %v5986_v57, 4  ;;  %v3167_v58 = vadd.f32 %v3166_v41, %v3165_v16 }
 0x36f   :  { %v3181_v26 = vadd.f32 %v3180_v55, %v5986_v57 }
 0x371   :  { %v3182_v33 = vrot.slane %v3181_v26, 2 }
 0x372   :  { %v2998_v59 = vpop.f32.mrf.mxu2 }
 0x373   :  { %v3183_v35 = vadd.f32 %v3182_v33, %v3181_v26 }
 0x375   :  { %v3184_v47 = vrot.slane %v3183_v35, 1 }
 0x380   :  { %v3022_v60 = vpop.f32.mrf.mxu0 }
 0x382   :  { %v3035_v46 = vpop.f32.mrf.mxu1 }
 0x384   :  { %v3009_v44 = vpop.f32.mrf.mxu3 }
 0x385   :  { %v3010_v56 = vadd.f32 %v3009_v44, %v1449_v61  ;;  %v6010_v44 = vmul.f32 %v3173_v45, %v5747_v37 }
 0x387   :  { %v3023_v63 = vadd.f32 %v3022_v60, %v3010_v56  ;;  %v6007_v60 = vmul.f32 %v3179_v43, %v5747_v37  ;;  %v3185_v56 = vadd.f32 %v3184_v47, %v3183_v35  ;;  %v3214_v13 = vsub.f32 %v5976_v17, %v6010_v44 }
 0x388   :  { %v3024_v62 = vpop.f32.mrf.mxu0 }
 0x389   :  { %v3036_v5 = vadd.f32 %v3035_v46, %v3023_v63  ;;  %v3161_v63 = vadd.f32 %v3160_v54, %v3159_v7  ;;  %v6025_v1 = vmul.f32 %v3185_v56, %v5747_v37  ;;  %v3222_v21 = vmul.f32 %v3214_v13, %v3214_v13 }
 0x38a   :  { %v3048_v49 = vpop.f32.mrf.mxu2  ;;  %v3037_v8 = vpop.f32.mrf.mxu1 }
 0x38b   :  { %v5989_v25 = vadd.f32 %v3048_v49, %v3036_v5  ;;  %v6014_v8 = vmul.f32 %v3167_v58, %v5747_v37  ;;  %v6028_v18 = vmul.f32 %v3161_v63, %v5747_v37  ;;  %v3216_v22 = vsub.f32 %v5986_v57, %v6025_v1 }
 0x38c   :  { %v3011_v10 = vpop.f32.mrf.mxu3 }
 0x38d   :  { %v3186_v52 = vrot.slane %v5989_v25, 4  ;;  %v3215_v10 = vsub.f32 %v5983_v3, %v6007_v60  ;;  %v3212_v24 = vsub.f32 %v5966_v53, %v6028_v18  ;;  %v3224_v30 = vmul.f32 %v3216_v22, %v3216_v22 }
 0x38f   :  { %v3187_v23 = vadd.f32 %v3186_v52, %v5989_v25  ;;  %v3213_v52 = vsub.f32 %v5969_v4, %v6014_v8  ;;  %v3223_v55 = vmul.f32 %v3215_v10, %v3215_v10  ;;  %v3220_v32 = vmul.f32 %v3212_v24, %v3212_v24 }
 0x390   :  { %v3252_v40 = vrot.slane %v3224_v30, 4 }
 0x391   :  { %v3188_v12 = vrot.slane %v3187_v23, 2  ;;  %v3221_v26 = vmul.f32 %v3213_v52, %v3213_v52  ;;  %v3246_v28 = vrot.slane %v3223_v55, 4 }
 0x392   :  { %v3050_v11 = vpop.f32.mrf.mxu2  ;;  %v3253_v43 = vadd.f32 %v3252_v40, %v3224_v30 }
 0x393   :  { %v3189_v2 = vadd.f32 %v3188_v12, %v3187_v23  ;;  %v3234_v33 = vrot.slane %v3221_v26, 4  ;;  %v3247_v16 = vadd.f32 %v3246_v28, %v3223_v55 }
 0x395   :  { %v3190_v39 = vrot.slane %v3189_v2, 1  ;;  %v3248_v41 = vrot.slane %v3247_v16, 2 }
 0x397   :  { %v3191_v46 = vadd.f32 %v3190_v39, %v3189_v2 }
 0x399   :  { %v6020_v11 = vmul.f32 %v3191_v46, %v5747_v37 }
 0x39b   :  { %v3217_v20 = vsub.f32 %v5989_v25, %v6020_v11 }
 0x39d   :  { %v3225_v29 = vmul.f32 %v3217_v20, %v3217_v20 }
 0x39f   :  { %v3258_v36 = vrot.slane %v3225_v29, 4 }
 0x3a0   :  { %v3074_v27 = vpop.f32.mrf.mxu0 }
 0x3a2   :  { %v3087_v48 = vpop.f32.mrf.mxu1 }
 0x3a4   :  { %v3061_v38 = vpop.f32.mrf.mxu3 }
 0x3a5   :  { %v3062_v9 = vadd.f32 %v3061_v38, %v1450_v34 }
 0x3a7   :  { %v3075_v15 = vadd.f32 %v3074_v27, %v3062_v9  ;;  %v1451_v9 = vperm.slane %v5963_v0, 7  ;;  %v3254_v0 = vrot.slane %v3253_v43, 2 }
 0x3a8   :  { %v3076_v42 = vpop.f32.mrf.mxu0 }
 0x3a9   :  { %v3088_v51 = vadd.f32 %v3087_v48, %v3075_v15  ;;  %v3240_v48 = vrot.slane %v3222_v21, 4  ;;  %v3235_v42 = vadd.f32 %v3234_v33, %v3221_v26  ;;  %v3259_v15 = vadd.f32 %v3258_v36, %v3225_v29 }
 0x3aa   :  { %v3100_v6 = vpop.f32.mrf.mxu2  ;;  %v3089_v14 = vpop.f32.mrf.mxu1 }
 0x3ab   :  { %v6004_v59 = vadd.f32 %v3100_v6, %v3088_v51  ;;  %v3241_v38 = vadd.f32 %v3240_v48, %v3222_v21  ;;  %v3228_v6 = vrot.slane %v3220_v32, 4  ;;  %v3236_v58 = vrot.slane %v3235_v42, 2 }
 0x3ac   :  { %v3063_v61 = vpop.f32.mrf.mxu3  ;;  %v3260_v56 = vrot.slane %v3259_v15, 2  ;;  %v3255_v21 = vadd.f32 %v3254_v0, %v3253_v43 }
 0x3ad   :  { %v3192_v49 = vrot.slane %v6004_v59, 4  ;;  %v3242_v14 = vrot.slane %v3241_v38, 2  ;;  %v3229_v54 = vadd.f32 %v3228_v6, %v3220_v32  ;;  %v3249_v61 = vadd.f32 %v3248_v41, %v3247_v16 }
 0x3ae   :  { %v3256_v33 = vrot.slane %v3255_v21, 1 }
 0x3af   :  { %v3193_v5 = vadd.f32 %v3192_v49, %v6004_v59  ;;  %v3243_v63 = vadd.f32 %v3242_v14, %v3241_v38  ;;  %v3230_v13 = vrot.slane %v3229_v54, 2  ;;  %v3250_v52 = vrot.slane %v3249_v61, 1 }
 0x3b1   :  { %v3194_v31 = vrot.slane %v3193_v5, 2  ;;  %v3244_v20 = vrot.slane %v3243_v63, 1  ;;  %v3251_v29 = vadd.f32 %v3250_v52, %v3249_v61 }
 0x3b2   :  { %v3102_v62 = vpop.f32.mrf.mxu2 }
 0x3b3   :  { %v3195_v19 = vadd.f32 %v3194_v31, %v3193_v5  ;;  %v3237_v31 = vadd.f32 %v3236_v58, %v3235_v42  ;;  %v3245_v32 = vadd.f32 %v3244_v20, %v3243_v63 }
 0x3b5   :  { %v3196_v23 = vrot.slane %v3195_v19, 1  ;;  %v3238_v28 = vrot.slane %v3237_v31, 1 }
 0x3b7   :  { %v3197_v27 = vadd.f32 %v3196_v23, %v3195_v19  ;;  %v3261_v19 = vadd.f32 %v3260_v56, %v3259_v15  ;;  %v3239_v36 = vadd.f32 %v3238_v28, %v3237_v31 }
 0x3b9   :  { %v6039_v12 = vmul.f32 %v3197_v27, %v5747_v37  ;;  %v3231_v27 = vadd.f32 %v3230_v13, %v3229_v54  ;;  %v3262_v48 = vrot.slane %v3261_v19, 1  ;;  %v3277_v41 = vmul.f32 %v3239_v36, %v5747_v37 }
 0x3bb   :  { %v3218_v34 = vsub.f32 %v6004_v59, %v6039_v12  ;;  %v3232_v16 = vrot.slane %v3231_v27, 1  ;;  %v3263_v38 = vadd.f32 %v3262_v48, %v3261_v19  ;;  %v6062_v58 = vadd.f32 0.8, %v3277_v41 }
 0x3bd   :  { %v3226_v35 = vmul.f32 %v3218_v34, %v3218_v34  ;;  %v3281_v14 = vmul.f32 %v3263_v38, %v5747_v37  ;;  %vm3309_vm8 = vweird.f32 %v6062_v58 }
 0x3bf   :  { %v3264_v7 = vrot.slane %v3226_v35, 4 }
 0x3c0   :  { %v3126_v50 = vpop.f32.mrf.mxu0 }
 0x3c1   :  { %v3265_v45 = vadd.f32 %v3264_v7, %v3226_v35  ;;  %v3278_v35 = vmul.f32 %v3245_v32, %v5747_v37  ;;  %v3233_v7 = vadd.f32 %v3232_v16, %v3231_v27 }
 0x3c2   :  { %v3139_v2 = vpop.f32.mrf.mxu1 }
 0x3c3   :  { %v3266_v5 = vrot.slane %v3265_v45, 2  ;;  %v3276_v54 = vmul.f32 %v3233_v7, %v5747_v37 }
 0x3c4   :  { %v3113_v39 = vpop.f32.mrf.mxu3 }
 0x3c5   :  { %v3114_v47 = vadd.f32 %v3113_v39, %v1451_v9  ;;  %v3267_v23 = vadd.f32 %v3266_v5, %v3265_v45  ;;  %v3257_v9 = vadd.f32 %v3256_v33, %v3255_v21  ;;  %v6054_v39 = vadd.f32 0.8, %v3278_v35 }
 0x3c6   :  { %v6074_v63 = vadd.f32 0.8, %v3276_v54 }
 0x3c7   :  { %v3127_v49 = vadd.f32 %v3126_v50, %v3114_v47  ;;  %v3268_v34 = vrot.slane %v3267_v23, 1  ;;  %v3280_v45 = vmul.f32 %v3257_v9, %v5747_v37  ;;  %vm3319_vm3 = vweird.f32 %v6054_v39 }
 0x3c8   :  { %v3128_v46 = vpop.f32.mrf.mxu0 }
 0x3c9   :  { %v3140_v10 = vadd.f32 %v3139_v2, %v3127_v49  ;;  %v3279_v2 = vmul.f32 %v3251_v29, %v5747_v37  ;;  %v3269_v6 = vadd.f32 %v3268_v34, %v3267_v23  ;;  %v6065_v46 = vadd.f32 0.8, %v3281_v14 }
 0x3ca   :  { %v3152_v51 = vpop.f32.mrf.mxu2  ;;  %v3141_v62 = vpop.f32.mrf.mxu1  ;;  %v6070_v56 = vadd.f32 0.8, %v3280_v45 }
 0x3cb   :  { %v6044_v55 = vadd.f32 %v3152_v51, %v3140_v10  ;;  %v6051_v15 = vadd.f32 0.8, %v3279_v2  ;;  %v3282_v47 = vmul.f32 %v3269_v6, %v5747_v37  ;;  %vm3349_vm13 = vweird.f32 %v6065_v46 }
 0x3cc   :  { %v3115_v22 = vpop.f32.mrf.mxu3 }
 0x3cd   :  { %v3198_v24 = vrot.slane %v6044_v55, 4  ;;  %5255 = vrsqrt.f32 %v6051_v15  ;;  %v6072_v49 = vadd.f32 0.8, %v3282_v47  ;;  %vm3329_vm1 = vweird.f32 %v6051_v15 }
 0x3ce   :  { %5257 = vrsqrt.f32 %v6054_v39 }
 0x3cf   :  { %v3199_v30 = vadd.f32 %v3198_v24, %v6044_v55  ;;  %5259 = vrsqrt.f32 %v6062_v58 }
 0x3d0   :  { %5261 = vrsqrt.f32 %v6065_v46 }
 0x3d1   :  { %v3200_v50 = vrot.slane %v3199_v30, 2  ;;  %5263 = vrsqrt.f32 %v6070_v56 }
 0x3d2   :  { %v3154_v26 = vpop.f32.mrf.mxu2  ;;  %5265 = vrsqrt.f32 %v6072_v49 }
 0x3d3   :  { %v3201_v40 = vadd.f32 %v3200_v50, %v3199_v30  ;;  %v6079_v5 = vpop.eup %5255  ;;  %5267 = vrsqrt.f32 %v6074_v63 }
 0x3d4   :  { %v6082_v13 = vpop.eup %5257  ;;  %v3324_v19 = vmul.f32 %v6079_v5, %v6051_v15  ;;  %vm3330_vm15 = vweird.f32 %v6079_v5 }
 0x3d5   :  { %v3202_v42 = vrot.slane %v3201_v40, 1  ;;  %v6085_v52 = vpop.eup %5259  ;;  %v3314_v21 = vmul.f32 %v6082_v13, %v6054_v39  ;;  %vm3320_vm0 = vweird.f32 %v6082_v13  ;;  %vm6125_vm4 = vmor %vm3329_vm1, %vm3330_vm15  ;;  %vm3339_vm15 = vweird.f32 %v6070_v56 }
 0x3d6   :  { %v6089_v20 = vpop.eup %5261  ;;  %v3304_v26 = vmul.f32 %v6085_v52, %v6062_v58  ;;  %v3325_v29 = vmul.f32 %v6079_v5, %v3324_v19  ;;  %vm3310_vm2 = vweird.f32 %v6085_v52  ;;  %vm6129_vm5 = vmor %vm3319_vm3, %vm3320_vm0 }
 0x3d7   :  { %v3203_v43 = vadd.f32 %v3202_v42, %v3201_v40  ;;  %v6093_v23 = vpop.eup %5263  ;;  %v3344_v48 = vmul.f32 %v6089_v20, %v6065_v46  ;;  %v3315_v30 = vmul.f32 %v6082_v13, %v3314_v21  ;;  %vm3350_vm7 = vweird.f32 %v6089_v20  ;;  %vm6144_vm12 = vmor %vm3309_vm8, %vm3310_vm2 }
 0x3d8   :  { %v6095_v24 = vpop.eup %5265  ;;  %v3334_v32 = vmul.f32 %v6093_v23, %v6070_v56  ;;  %v3305_v16 = vmul.f32 %v6085_v52, %v3304_v26  ;;  %v3326_v2 = vmul.f32 0.5, %v3325_v29  ;;  %vm3340_vm11 = vweird.f32 %v6093_v23  ;;  %vm6155_vm0 = vmor %vm3349_vm13, %vm3350_vm7 }
 0x3d9   :  { %v6059_v51 = vmul.f32 %v3203_v43, %v5747_v37  ;;  %v6099_v28 = vpop.eup %5267  ;;  %v3354_v34 = vmul.f32 %v6095_v24, %v6072_v49  ;;  %v3345_v38 = vmul.f32 %v6089_v20, %v3344_v48  ;;  %v3316_v40 = vmul.f32 0.5, %v3315_v30  ;;  %vm6159_vm1 = vmor %vm3339_vm15, %vm3340_vm11 }
 0x3da   :  { %v3294_v50 = vmul.f32 %v6099_v28, %v6074_v63  ;;  %v3335_v35 = vmul.f32 %v6093_v23, %v3334_v32  ;;  %v3306_v7 = vmul.f32 0.5, %v3305_v16  ;;  %v3327_v41 = vsub.f32 1.5, %v3326_v2 }
 0x3db   :  { %v3219_v61 = vsub.f32 %v6044_v55, %v6059_v51  ;;  %v3355_v6 = vmul.f32 %v6095_v24, %v3354_v34  ;;  %v3346_v14 = vmul.f32 0.5, %v3345_v38  ;;  %v3317_v43 = vsub.f32 1.5, %v3316_v40 }
 0x3dc   :  { %v3295_v42 = vmul.f32 %v6099_v28, %v3294_v50  ;;  %v3336_v45 = vmul.f32 0.5, %v3335_v35  ;;  %vm3360_vm14 = vweird.f32 %v6095_v24  ;;  %vm3359_vm2 = vweird.f32 %v6072_v49 }
 0x3dd   :  { %v3227_v62 = vmul.f32 %v3219_v61, %v3219_v61  ;;  %v3356_v47 = vmul.f32 0.5, %v3355_v6  ;;  %v3328_v61 = vmul.f32 %v6079_v5, %v3327_v41  ;;  %vm3299_vm8 = vweird.f32 %v6074_v63 }
 0x3de   :  { %v3296_v54 = vmul.f32 0.5, %v3295_v42  ;;  %vm3393_vm13 = vcmask 1046534   ;;  %vm3395_vm15 = vcmask 1045508  }
 0x3df   :  { %v3270_v0 = vrot.slane %v3227_v62, 4  ;;  %v3357_v19 = vsub.f32 1.5, %v3356_v47  ;;  %v3332_v15 = vsel %vm6125_vm4, %v6079_v5, %v3328_v61  ;;  %vm3300_vm4 = vweird.f32 %v6099_v28 }
 0x3e1   :  { %v3271_v10 = vadd.f32 %v3270_v0, %v3227_v62  ;;  %v3347_v62 = vsub.f32 1.5, %v3346_v14  ;;  %v3358_v5 = vmul.f32 %v6095_v24, %v3357_v19 }
 0x3e3   :  { %v3272_v31 = vrot.slane %v3271_v10, 2  ;;  %v3348_v48 = vmul.f32 %v6089_v20, %v3347_v62 }
 0x3e5   :  { %v3273_v22 = vadd.f32 %v3272_v31, %v3271_v10  ;;  %v3318_v10 = vmul.f32 %v6082_v13, %v3317_v43  ;;  %v3337_v31 = vsub.f32 1.5, %v3336_v45  ;;  %v3352_v46 = vsel %vm6155_vm0, %v6089_v20, %v3348_v48 }
 0x3e6   :  { %v3385_v49 = vrot.slane %v3352_v46, 3  ;;  %vm3397_vm0 = vcmask 1043456  }
 0x3e7   :  { %v3274_v27 = vrot.slane %v3273_v22, 1  ;;  %v3322_v39 = vsel %vm6129_vm5, %v6082_v13, %v3318_v10  ;;  %v3338_v32 = vmul.f32 %v6093_v23, %v3337_v31  ;;  %v3383_v13 = vrot.slane %v3332_v15, 5  ;;  %vm3361_vm5 = vmor %vm3359_vm2, %vm3360_vm14 }
 0x3e8   :  { %v3382_v56 = vrot.slane %v3322_v39, 6  ;;  %v3362_v38 = vsel %vm3361_vm5, %v6095_v24, %v3358_v5  ;;  %vm3301_vm14 = vmor %vm3299_vm8, %vm3300_vm4 }
 0x3e9   :  { %v3275_v33 = vadd.f32 %v3274_v27, %v3273_v22  ;;  %v3297_v22 = vsub.f32 1.5, %v3296_v54  ;;  %v3342_v2 = vsel %vm6159_vm1, %v6093_v23, %v3338_v32 }
 0x3ea   :  { %v3389_v35 = vsel %vm1121_vm9, %v3382_v56, %v3383_v13  ;;  %v3384_v42 = vrot.slane %v3342_v2, 4 }
 0x3eb   :  { %v3283_v36 = vmul.f32 %v3275_v33, %v5747_v37  ;;  %v3307_v37 = vsub.f32 1.5, %v3306_v7  ;;  %v3386_v7 = vrot.slane %v3362_v38, 2 }
 0x3ed   :  { %v3292_v9 = vadd.f32 0.8, %v3283_v36  ;;  %v3308_v26 = vmul.f32 %v6085_v52, %v3307_v37 }
 0x3ef   :  { %5269 = vrsqrt.f32 %v3292_v9  ;;  %v3312_v58 = vsel %vm6144_vm12, %v6085_v52, %v3308_v26  ;;  %v3298_v52 = vmul.f32 %v6099_v28, %v3297_v22  ;;  %vm3369_vm7 = vweird.f32 %v3292_v9 }
 0x3f0   :  { %v3381_v20 = vrot.slane %v3312_v58, 7  ;;  %vm3391_vm12 = vcmask 1044484  }
 0x3f1   :  { %v3302_v24 = vsel %vm3301_vm14, %v6099_v28, %v3298_v52  ;;  %v3392_v41 = vsel %vm3391_vm12, %v3384_v42, %v3385_v49 }
 0x3f2   :  { %v3388_v63 = vsel %vm471_vm6, %v3302_v24, %v3381_v20 }
 0x3f3   :  { %v3390_v43 = vsel %vm1123_vm10, %v3388_v63, %v3389_v35 }
 0x3f5   :  { %v5270_v0 = vpop.eup %5269 }
 0x3f6   :  { %v3364_v21 = vmul.f32 %v5270_v0, %v3292_v9  ;;  %vm3370_vm3 = vweird.f32 %v5270_v0  ;;  %v3284_v9 = vld [vmem:[%s6243_s13] sm:$0xff] }
 0x3f7   :  { %vm3371_vm11 = vmor %vm3369_vm7, %vm3370_vm3 }
 0x3f8   :  { %v3365_v30 = vmul.f32 %v5270_v0, %v3364_v21 }
 0x3fa   :  { %v3366_v34 = vmul.f32 0.5, %v3365_v30 }
 0x3fc   :  { %v3367_v36 = vsub.f32 1.5, %v3366_v34 }
 0x3fe   :  { %v3368_v40 = vmul.f32 %v5270_v0, %v3367_v36 }
 0x400   :  { %v3372_v6 = vsel %vm3371_vm11, %v5270_v0, %v3368_v40 }
 0x401   :  { %v3387_v23 = vrot.slane %v3372_v6, 1 }
 0x403   :  { %v3394_v14 = vsel %vm3393_vm13, %v3386_v7, %v3387_v23 }
 0x404   :  { %v3396_v45 = vsel %vm3395_vm15, %v3392_v41, %v3394_v14 }
 0x405   :  { %v3398_v47 = vsel %vm3397_vm0, %v3390_v43, %v3396_v45 }
 0x406   :  { %v3400_v54 = vmul.f32 %v3398_v47, %v3284_v9 }
 0x408   :  { %v3403_v37 = vperm.slane %v3400_v54, 0  ;;  %v3404_v28 = vperm.slane %v3400_v54, 1  ;;  %v3405_v61 = vperm.slane %v3400_v54, 2  ;;  %v3406_v62 = vperm.slane %v3400_v54, 3 }
 0x409   :  { %v3407_v0 = vperm.slane %v3400_v54, 4  ;;  %v3408_v10 = vperm.slane %v3400_v54, 5  ;;  %v3409_v31 = vperm.slane %v3400_v54, 6  ;;  %v3410_v19 = vperm.slane %v3400_v54, 7 }
 0x40a   :  { %v3420_v21 = vmul.f32 %v3404_v28, %v6014_v8  ;;  %v3421_v22 = vmul.f32 %v3405_v61, %v6010_v44  ;;  %v3422_v26 = vmul.f32 %v3406_v62, %v6007_v60  ;;  %v3419_v30 = vmul.f32 %v3403_v37, %v6028_v18 }
 0x40b   :  { %v3423_v27 = vmul.f32 %v3407_v0, %v6025_v1  ;;  %v3424_v29 = vmul.f32 %v3408_v10, %v6020_v11  ;;  %v3425_v15 = vmul.f32 %v3409_v31, %v6039_v12  ;;  %v3426_v48 = vmul.f32 %v3410_v19, %v6059_v51  ;;  %v3401_v1 = vld [vmem:[#allocation21] sm:$0xff] }
 0x40c   :  { %v3435_v39 = vrot.slane %v3420_v21, 7  ;;  %v3436_v32 = vrot.slane %v3421_v22, 6  ;;  %v3437_v33 = vrot.slane %v3422_v26, 5  ;;  %v3451_v50 = vmul.f32 %v3403_v37, %v5966_v53 }
 0x40d   :  { %v3438_v5 = vrot.slane %v3423_v27, 4  ;;  %v3439_v34 = vrot.slane %v3424_v29, 3  ;;  %v3440_v8 = vrot.slane %v3425_v15, 2  ;;  %v3441_v58 = vrot.slane %v3426_v48, 1 }
 0x40e   :  { %v3442_v44 = vsel %vm471_vm6, %v3419_v30, %v3435_v39  ;;  %v3443_v60 = vsel %vm1121_vm9, %v3436_v32, %v3437_v33  ;;  %v3452_v46 = vmul.f32 %v3404_v28, %v5969_v4  ;;  %v3453_v36 = vmul.f32 %v3405_v61, %v5976_v17 }
 0x40f   :  { %v3444_v11 = vsel %vm1123_vm10, %v3442_v44, %v3443_v60  ;;  %v3445_v12 = vsel %vm3391_vm12, %v3438_v5, %v3439_v34  ;;  %v3446_v51 = vsel %vm3393_vm13, %v3440_v8, %v3441_v58  ;;  %v3454_v52 = vmul.f32 %v3406_v62, %v5983_v3 }
 0x410   :  { %v3447_v18 = vsel %vm3395_vm15, %v3445_v12, %v3446_v51  ;;  %v3455_v56 = vmul.f32 %v3407_v0, %v5986_v57  ;;  %v3456_v2 = vmul.f32 %v3408_v10, %v5989_v25  ;;  %v3457_v38 = vmul.f32 %v3409_v31, %v6004_v59 }
 0x411   :  { %v3448_v13 = vsel %vm3397_vm0, %v3444_v11, %v3447_v18  ;;  %v3458_v40 = vmul.f32 %v3410_v19, %v6044_v55 }
 0x412   :  { %v3450_v16 = vsub.f32 %v3401_v1, %v3448_v13 }
 0x414   :  { %v3460_v20 = vperm.slane %v3450_v16, 0  ;;  %v3461_v49 = vperm.slane %v3450_v16, 1  ;;  %v3462_v35 = vperm.slane %v3450_v16, 2  ;;  %v3463_v6 = vperm.slane %v3450_v16, 3 }
 0x415   :  { %v3464_v53 = vperm.slane %v3450_v16, 4  ;;  %v3465_v42 = vperm.slane %v3450_v16, 5  ;;  %v3466_v7 = vperm.slane %v3450_v16, 6  ;;  %v3467_v4 = vperm.slane %v3450_v16, 7 }
 0x416   :  { %v3476_v23 = vadd.f32 %v3460_v20, %v3451_v50  ;;  %v3477_v17 = vadd.f32 %v3461_v49, %v3452_v46  ;;  %v3478_v24 = vadd.f32 %v3462_v35, %v3453_v36  ;;  %v3479_v3 = vadd.f32 %v3463_v6, %v3454_v52 }
 0x417   :  { %v3480_v63 = vadd.f32 %v3464_v53, %v3455_v56  ;;  %v3481_v57 = vadd.f32 %v3465_v42, %v3456_v2  ;;  %v3482_v9 = vadd.f32 %v3466_v7, %v3457_v38  ;;  %v3483_v25 = vadd.f32 %v3467_v4, %v3458_v40 }
 0x418   :  { %vm3484_vm6 = vcmp.gt.f32.partialorder %v3476_v23, 0.0  ;;  %vm3485_vm9 = vcmp.gt.f32.partialorder %v3477_v17, 0.0  ;;  %vm3486_vm10 = vcmp.gt.f32.partialorder %v3478_v24, 0.0  ;;  %vm3487_vm1 = vcmp.gt.f32.partialorder %v3479_v3, 0.0 }
 0x419   :  { %vm3488_vm2 = vcmp.gt.f32.partialorder %v3480_v63, 0.0  ;;  %vm3489_vm3 = vcmp.gt.f32.partialorder %v3481_v57, 0.0  ;;  %vm3490_vm4 = vcmp.gt.f32.partialorder %v3482_v9, 0.0  ;;  %vm3491_vm5 = vcmp.gt.f32.partialorder %v3483_v25, 0.0 }
 0x41a   :  { %v3492_v59 = vmul.f32 0.2, %v3476_v23  ;;  %v3493_v55 = vmul.f32 0.2, %v3477_v17  ;;  %v3494_v41 = vmul.f32 0.2, %v3478_v24 }
 0x41b   :  { %v3495_v14 = vmul.f32 0.2, %v3479_v3  ;;  %v3496_v43 = vmul.f32 0.2, %v3480_v63  ;;  %v3497_v45 = vmul.f32 0.2, %v3481_v57 }
 0x41c   :  { %v3498_v47 = vmul.f32 0.2, %v3482_v9  ;;  %v3499_v54 = vmul.f32 0.2, %v3483_v25  ;;  %v3500_v37 = vsel %vm3484_vm6, %v3476_v23, %v3492_v59  ;;  %v3501_v28 = vsel %vm3485_vm9, %v3477_v17, %v3493_v55 }
 0x41d   :  { %v3502_v61 = vsel %vm3486_vm10, %v3478_v24, %v3494_v41  ;;  %v3503_v62 = vsel %vm3487_vm1, %v3479_v3, %v3495_v14  ;;  %v3504_v0 = vsel %vm3488_vm2, %v3480_v63, %v3496_v43  ;;  %v3505_v10 = vsel %vm3489_vm3, %v3481_v57, %v3497_v45 }
 0x41e   :  { %v3506_v31 = vsel %vm3490_vm4, %v3482_v9, %v3498_v47  ;;  %v3507_v19 = vsel %vm3491_vm5, %v3483_v25, %v3499_v54  ;;  %v3508_v21 = vpack.c.bf16 %v3501_v28, %v3500_v37  ;;  %v3509_v22 = vpack.c.bf16 %v3503_v62, %v3502_v61 }
 0x41f   :  { %v3510_v26 = vpack.c.bf16 %v3505_v10, %v3504_v0  ;;  %v3511_v27 = vpack.c.bf16 %v3507_v19, %v3506_v31 }
 0x420   :  { %3512 = vst [vmem:[%s6245_s15] sm:$0xff] %v3508_v21 }
 0x421   :  { %3513 = vst [vmem:[%s6245_s15 + $0x8] sm:$0xff] %v3509_v22 }
 0x422   :  { %3514 = vst [vmem:[%s6245_s15 + $0x10] sm:$0xff] %v3510_v26 }
 0x423   :  { %3515 = vst [vmem:[%s6245_s15 + $0x18] sm:$0xff] %v3511_v27 }
 0x424   :  { %3520 = vsyncpa [#allocation3], 1 }
 0x425   :  { %3521 = vsyncpa [#allocation5], 1 }
 0x426   :  { %3522 = vsyncpa [#allocation8], 1 }
 0x427   :  { %3523 = vsyncpa [#allocation11], 1 }
 0x428   :  { %3524 = vsyncpa [#allocation14], 1 }
 0x429   :  { %3525 = vsyncpa [#allocation17], 1 }
 0x42a   :  { %3526 = vsyncpa [#allocation20], 1 }

</bundles_post_ra>
